<compile_context>
chip_gen: v7x
topology: tpu7x:2x2x1
jax: 0.10.0
libtpu: 0.0.40
codegen_flags: <defaults>
</compile_context>

<pallas_src>
import functools
import math

import jax
import jax.numpy as jnp
from jax.experimental import pallas as pl
from jax.experimental.pallas import tpu as pltpu

_LANE = 128


def _adapter_kernel(x_ref, y_ref, g_ref, qt_ref, hp_ref, out_ref, *,
                    num_head, inverse, eps):
    """One batch tile of TILE_N rows.

    x_ref  : (TILE_N, x_dim)  input rows (natural layout, compute dtype)
    y_ref  : (1, TILE_N)      targets, lane-dense, f32
    g_ref  : (x_dim, x_dim)   G = W^T W (resident)        ||v||^2 = x G x^T
    qt_ref : (x_dim, H)       Q^T, Q = (P/((||P||+eps)*temp)) @ W (resident)
    hp_ref : (H, 2)           col0 = (w+1e-9) or 1/(w+1e-9), col1 = bias
    out_ref: (1, TILE_N)      lane-dense output row
    """
    f32 = jnp.float32
    x = x_ref[...]                                                     # (T, D)
    xf = x.astype(f32)

    # ||v||^2 without materializing v:  s = rowsum((x @ G) * x)
    xg = jnp.dot(x, g_ref[...], preferred_element_type=f32)           # (T, D)
    prod = xg * xf                                                     # (T, D)

    # raw gate logits; ||P|| normalization and 1/temperature pre-folded into Q
    raw = jnp.dot(x, qt_ref[...], preferred_element_type=f32)         # (T, H)

    # row-sum via MXU (keeps the XLU free for the small transpose below)
    ones_col = jnp.ones((prod.shape[-1], 1), f32)
    s = jnp.dot(prod, ones_col, preferred_element_type=f32)           # (T, 1)

    # Single small transpose to head-major / lane-dense: pack [logits | s]
    # and pad to 8 columns so the transpose works on a full sublane group.
    t = raw.shape[0]
    pad = (-(num_head + 1)) % 8
    pieces = [raw, s] + ([jnp.zeros((t, pad), f32)] if pad else [])
    packed = jnp.concatenate(pieces, axis=-1)                          # (T, 8)
    packed_t = packed.T                                                # (8, T)
    raw_hm = packed_t[:num_head, :]                                    # (H, T)
    s_hm = packed_t[num_head:num_head + 1, :]                          # (1, T)

    # normalize the logits (H values/row) instead of v; PyTorch eps placement
    inv_norm = pl.reciprocal(jnp.sqrt(jnp.maximum(s_hm, 0.0)) + eps,
                             approx=True)                              # (1, T)
    logits = raw_hm * inv_norm                                         # (H, T)

    # softmax over heads (sublane axis, H small)
    m = jnp.max(logits, axis=0, keepdims=True)                         # (1, T)
    e = jnp.exp(logits - m)                                            # (H, T)
    den = jnp.sum(e, axis=0, keepdims=True)                            # (1, T)

    # ModelAdaptHeads, head-major
    y_row = y_ref[...]                                                 # (1, T)
    hw = hp_ref[:, 0:1]                                                # (H, 1)
    hb = hp_ref[:, 1:2]                                                # (H, 1)
    if inverse:
        heads = (y_row - hb) * hw      # hw = 1 / (weight + 1e-9)
    else:
        heads = hw * y_row + hb        # hw = weight + 1e-9

    num = jnp.sum(e * heads, axis=0, keepdims=True)                    # (1, T)
    out_ref[...] = num * pl.reciprocal(den, approx=True)


def _round_up(a, m):
    return ((a + m - 1) // m) * m


def _choose_tile(n, requested):
    """128-aligned batch tile; >=2 grid steps when the batch allows (v7x)."""
    t = max(1, min(int(requested), n))
    if n >= 2 * _LANE:
        t = min(t, n // 2)             # keep both v7x TensorCores busy
    t = max(_LANE, (t // _LANE) * _LANE)
    return t


def model_adapter_forward(x, y, params, *, temperature=4, inverse=False,
                          tile_n=8192, eps=1e-8,
                          compute_dtype=jnp.bfloat16):
    n = x.shape[0]
    x_flat = jnp.asarray(x).reshape(n, -1).astype(compute_dtype)       # (N, D)
    x_dim = x_flat.shape[1]
    y_row = jnp.asarray(y, jnp.float32).reshape(1, n)                  # (1, N)

    # ---- parameter-side work hoisted out of the per-tile body -----------
    w = jnp.asarray(params["linear_w"], jnp.float32)                   # (hid, D)
    p = jnp.asarray(params["P"], jnp.float32)                          # (H, hid)
    p_norm = jnp.sqrt(jnp.sum(p * p, axis=-1, keepdims=True))
    p_hat = p / ((p_norm + eps) * float(temperature))                  # norm + 1/T
    qt = (p_hat @ w).T.astype(compute_dtype)                           # (D, H)
    g = (w.T @ w).astype(compute_dtype)                                # (D, D)

    hw = jnp.asarray(params["head_w"], jnp.float32).reshape(-1)        # (H,)
    hb = jnp.asarray(params["head_b"], jnp.float32).reshape(-1)        # (H,)
    w_eff = 1.0 / (hw + 1e-9) if inverse else hw + 1e-9
    head_params = jnp.stack([w_eff, hb], axis=-1)                      # (H, 2)
    num_head = int(head_params.shape[0])

    # ---- batch tiling: big 128-aligned tiles, exact division via padding ---
    tile = _choose_tile(n, tile_n)
    n_pad = _round_up(n, tile)
    if n_pad != n:
        x_flat = jnp.pad(x_flat, ((0, n_pad - n), (0, 0)))
        y_row = jnp.pad(y_row, ((0, 0), (0, n_pad - n)))
    grid = (n_pad // tile,)

    kernel = functools.partial(_adapter_kernel, num_head=num_head,
                               inverse=bool(inverse), eps=float(eps))

    out = pl.pallas_call(
        kernel,
        out_shape=jax.ShapeDtypeStruct((1, n_pad), jnp.float32),
        grid=grid,
        in_specs=[
            pl.BlockSpec((tile, x_dim), lambda i: (i, 0)),      # x: tiled rows
            pl.BlockSpec((1, tile), lambda i: (0, i)),          # y: lane-dense
            pl.BlockSpec((x_dim, x_dim), lambda i: (0, 0)),     # G: resident
            pl.BlockSpec((x_dim, num_head), lambda i: (0, 0)),  # Q^T: resident
            pl.BlockSpec((num_head, 2), lambda i: (0, 0)),      # head params
        ],
        out_specs=pl.BlockSpec((1, tile), lambda i: (0, i)),
        compiler_params=pltpu.CompilerParams(
            dimension_semantics=("parallel",),
            vmem_limit_bytes=32 * 1024 * 1024),
    )(x_flat, y_row, g, qt, head_params)
    return out[0, :n]


def _reference_forward(x, y, params, *, temperature=4, inverse=False, eps=1e-8):
    """Pure-JAX reference mirroring the PyTorch forward exactly (f32)."""
    n = x.shape[0]
    xf = jnp.asarray(x, jnp.float32).reshape(n, -1)
    v = xf @ params["linear_w"].T
    v_n = v / (jnp.sqrt(jnp.sum(v * v, axis=-1, keepdims=True)) + eps)
    p = params["P"]
    p_n = p / (jnp.sqrt(jnp.sum(p * p, axis=-1, keepdims=True)) + eps)
    gate = jax.nn.softmax((v_n @ p_n.T) / temperature, axis=-1)
    yc = jnp.asarray(y, jnp.float32).reshape(-1, 1)
    if inverse:
        heads = (yc - params["head_b"]) / (params["head_w"] + 1e-9)
    else:
        heads = (params["head_w"] + 1e-9) * yc + params["head_b"]
    return jnp.sum(gate * heads, axis=-1)


def init_params(key, x_dim, num_head=4, hid_dim=32):
    """Deterministic init mirroring the PyTorch module's shapes/distributions."""
    k_lin, k_p, k_hw = jax.random.split(key, 3)
    # nn.Linear default init: U(-1/sqrt(fan_in), 1/sqrt(fan_in))
    b_lin = 1.0 / math.sqrt(x_dim)
    linear_w = jax.random.uniform(k_lin, (hid_dim, x_dim), jnp.float32, -b_lin, b_lin)
    # kaiming_uniform_(P, a=sqrt(5)), fan_in = hid_dim
    b_p = math.sqrt(6.0 / ((1.0 + 5.0) * hid_dim))
    P = jax.random.uniform(k_p, (num_head, hid_dim), jnp.float32, -b_p, b_p)
    # heads: weight ~ U(0.75, 1.25), bias = ones / 8
    head_w = jax.random.uniform(k_hw, (1, num_head), jnp.float32, 0.75, 1.25)
    head_b = jnp.ones((1, num_head), jnp.float32) / 8.0
    return {"linear_w": linear_w, "P": P, "head_w": head_w, "head_b": head_b}


if __name__ == "__main__":
    key = jax.random.PRNGKey(0)
    kx, ky, kp = jax.random.split(key, 3)

    # batch N=2048 (two grid tiles after the >=2-step cap), x (N,4,8) -> x_dim=32
    N, C, S = 2048, 4, 8
    num_head, hid_dim, temperature = 4, 32, 4

    x = jax.random.normal(kx, (N, C, S), jnp.float32)
    y = jax.random.normal(ky, (N,), jnp.float32)
    params = init_params(kp, x_dim=C * S, num_head=num_head, hid_dim=hid_dim)

    out = model_adapter_forward(x, y, params, temperature=temperature, inverse=False)
    out_inv = model_adapter_forward(x, y, params, temperature=temperature, inverse=True)
    jax.block_until_ready((out, out_inv))

    ref = _reference_forward(x, y, params, temperature=temperature, inverse=False)
    ref_inv = _reference_forward(x, y, params, temperature=temperature, inverse=True)

    assert out.shape == (N,) and out_inv.shape == (N,)
    assert bool(jnp.all(jnp.isfinite(out))) and bool(jnp.all(jnp.isfinite(out_inv)))
    assert bool(jnp.allclose(out, ref, rtol=1e-2, atol=1e-2)), \
        float(jnp.max(jnp.abs(out - ref)))
    assert bool(jnp.allclose(out_inv, ref_inv, rtol=1e-2, atol=1e-2)), \
        float(jnp.max(jnp.abs(out_inv - ref_inv)))

    # ragged batch: exercises 128-alignment padding + multi-tile grid
    Nr = 777
    xr = jax.random.normal(kx, (Nr, C, S), jnp.float32)
    yr = jax.random.normal(ky, (Nr,), jnp.float32)
    out_r = model_adapter_forward(xr, yr, params, temperature=temperature, inverse=False)
    jax.block_until_ready(out_r)
    ref_r = _reference_forward(xr, yr, params, temperature=temperature, inverse=False)
    assert out_r.shape == (Nr,)
    assert bool(jnp.allclose(out_r, ref_r, rtol=1e-2, atol=1e-2)), \
        float(jnp.max(jnp.abs(out_r - ref_r)))

    print("KERNEL_OK")
</pallas_src>

<mosaic_0001>
module attributes {stable_mosaic.version = 11 : i64} {
  func.func @_adapter_kernel(%arg0: i32, %arg1: memref<1024x32xbf16, #tpu.memory_space<vmem>>, %arg2: memref<1x1024xf32, #tpu.memory_space<vmem>>, %arg3: memref<32x32xbf16, #tpu.memory_space<vmem>>, %arg4: memref<32x4xbf16, #tpu.memory_space<vmem>>, %arg5: memref<4x2xf32, #tpu.memory_space<vmem>>, %arg6: memref<1x1024xf32, #tpu.memory_space<vmem>>) attributes {dimension_semantics = [#tpu.dimension_semantics<parallel>], iteration_bounds = array<i64: 2>, scalar_prefetch = 0 : i64, scratch_operands = 0 : i64, tpu.core_type = #tpu.core_type<tc>, window_params = [{transform_indices = @transform_0, window_bounds = array<i64: 1024, 32>}, {transform_indices = @transform_1, window_bounds = array<i64: 1, 1024>}, {pipeline_mode = #tpu.pipeline_mode<synchronous>, transform_indices = @transform_2, window_bounds = array<i64: 32, 32>}, {pipeline_mode = #tpu.pipeline_mode<synchronous>, transform_indices = @transform_3, window_bounds = array<i64: 32, 4>}, {pipeline_mode = #tpu.pipeline_mode<synchronous>, transform_indices = @transform_4, window_bounds = array<i64: 4, 2>}, {transform_indices = @transform_5, window_bounds = array<i64: 1, 1024>}]} {
    %c0 = arith.constant 0 : index
    %c0_0 = arith.constant 0 : index
    %0 = vector.load %arg1[%c0, %c0_0] : memref<1024x32xbf16, #tpu.memory_space<vmem>>, vector<1024x32xbf16>
    %1 = arith.extf %0 : vector<1024x32xbf16> to vector<1024x32xf32>
    %c0_1 = arith.constant 0 : index
    %c0_2 = arith.constant 0 : index
    %2 = vector.load %arg3[%c0_1, %c0_2] : memref<32x32xbf16, #tpu.memory_space<vmem>>, vector<32x32xbf16>
    %cst = arith.constant dense<0.000000e+00> : vector<1024x32xf32>
    %3 = tpu.matmul %0, %2, %cst {dimension_numbers = #tpu.dot_dimension_numbers<[1], [0], [0], [1], [0, 0, 1, 1], [], []>} : vector<1024x32xbf16>, vector<32x32xbf16>, vector<1024x32xf32> -> vector<1024x32xf32>
    %4 = arith.mulf %3, %1 : vector<1024x32xf32>
    %c0_3 = arith.constant 0 : index
    %c0_4 = arith.constant 0 : index
    %5 = vector.load %arg4[%c0_3, %c0_4] : memref<32x4xbf16, #tpu.memory_space<vmem>>, vector<32x4xbf16>
    %cst_5 = arith.constant dense<0.000000e+00> : vector<1024x4xf32>
    %6 = tpu.matmul %0, %5, %cst_5 {dimension_numbers = #tpu.dot_dimension_numbers<[1], [0], [0], [1], [0, 0, 1, 1], [], []>} : vector<1024x32xbf16>, vector<32x4xbf16>, vector<1024x4xf32> -> vector<1024x4xf32>
    %cst_6 = arith.constant 1.000000e+00 : f32
    %7 = vector.broadcast %cst_6 : f32 to vector<32x1xf32>
    %cst_7 = arith.constant dense<0.000000e+00> : vector<1024x1xf32>
    %8 = tpu.matmul %4, %7, %cst_7 {dimension_numbers = #tpu.dot_dimension_numbers<[1], [0], [0], [1], [0, 0, 1, 1], [], []>} : vector<1024x32xf32>, vector<32x1xf32>, vector<1024x1xf32> -> vector<1024x1xf32>
    %cst_8 = arith.constant 0.000000e+00 : f32
    %9 = vector.broadcast %cst_8 : f32 to vector<1024x3xf32>
    %10 = tpu.concatenate %6, %8, %9 in 1 : vector<1024x4xf32>, vector<1024x1xf32>, vector<1024x3xf32> -> vector<1024x8xf32>
    %11 = tpu.transpose %10, [1, 0] : vector<1024x8xf32> -> vector<8x1024xf32>
    %12 = vector.extract_strided_slice %11 {offsets = [0, 0], sizes = [4, 1024], strides = [1, 1]} : vector<8x1024xf32> to vector<4x1024xf32>
    %13 = vector.extract_strided_slice %11 {offsets = [4, 0], sizes = [1, 1024], strides = [1, 1]} : vector<8x1024xf32> to vector<1x1024xf32>
    %cst_9 = arith.constant 0.000000e+00 : f32
    %14 = vector.broadcast %cst_9 : f32 to vector<1x1024xf32>
    %15 = arith.maximumf %13, %14 : vector<1x1024xf32>
    %16 = math.sqrt %15 : vector<1x1024xf32>
    %cst_10 = arith.constant 9.99999993E-9 : f32
    %17 = vector.broadcast %cst_10 : f32 to vector<1x1024xf32>
    %18 = arith.addf %16, %17 : vector<1x1024xf32>
    %19 = tpu.reciprocal %18 {approx = true} : vector<1x1024xf32> -> vector<1x1024xf32>
    %20 = vector.broadcast %19 : vector<1x1024xf32> to vector<4x1024xf32>
    %21 = arith.mulf %12, %20 : vector<4x1024xf32>
    %cst_11 = arith.constant dense<0xFF800000> : vector<1024xf32>
    %22 = vector.multi_reduction <maximumf>, %21, %cst_11 [0] : vector<4x1024xf32> to vector<1024xf32>
    %23 = vector.shape_cast %22 : vector<1024xf32> to vector<1x1024xf32>
    %24 = vector.broadcast %23 : vector<1x1024xf32> to vector<4x1024xf32>
    %25 = arith.subf %21, %24 : vector<4x1024xf32>
    %26 = math.exp %25 : vector<4x1024xf32>
    %cst_12 = arith.constant dense<0.000000e+00> : vector<1024xf32>
    %27 = vector.multi_reduction <add>, %26, %cst_12 [0] : vector<4x1024xf32> to vector<1024xf32>
    %28 = vector.shape_cast %27 : vector<1024xf32> to vector<1x1024xf32>
    %c0_13 = arith.constant 0 : index
    %c0_14 = arith.constant 0 : index
    %29 = vector.load %arg2[%c0_13, %c0_14] : memref<1x1024xf32, #tpu.memory_space<vmem>>, vector<1x1024xf32>
    %c0_15 = arith.constant 0 : index
    %c0_16 = arith.constant 0 : index
    %30 = vector.load %arg5[%c0_15, %c0_16] : memref<4x2xf32, #tpu.memory_space<vmem>>, vector<4x1xf32>
    %c0_17 = arith.constant 0 : index
    %c1 = arith.constant 1 : index
    %31 = vector.load %arg5[%c0_17, %c1] : memref<4x2xf32, #tpu.memory_space<vmem>>, vector<4x1xf32>
    %32 = vector.broadcast %30 : vector<4x1xf32> to vector<4x1024xf32>
    %33 = vector.broadcast %29 : vector<1x1024xf32> to vector<4x1024xf32>
    %34 = arith.mulf %32, %33 : vector<4x1024xf32>
    %35 = vector.broadcast %31 : vector<4x1xf32> to vector<4x1024xf32>
    %36 = arith.addf %34, %35 : vector<4x1024xf32>
    %37 = arith.mulf %26, %36 : vector<4x1024xf32>
    %cst_18 = arith.constant dense<0.000000e+00> : vector<1024xf32>
    %38 = vector.multi_reduction <add>, %37, %cst_18 [0] : vector<4x1024xf32> to vector<1024xf32>
    %39 = vector.shape_cast %38 : vector<1024xf32> to vector<1x1024xf32>
    %40 = tpu.reciprocal %28 {approx = true} : vector<1x1024xf32> -> vector<1x1024xf32>
    %41 = arith.mulf %39, %40 : vector<1x1024xf32>
    %c0_19 = arith.constant 0 : index
    %c0_20 = arith.constant 0 : index
    %42 = vector.load %arg6[%c0_19, %c0_20] : memref<1x1024xf32, #tpu.memory_space<vmem>>, vector<1x1024xf32>
    tpu.vector_store %arg6[%c0_19, %c0_20], %41 {strides = array<i32>} : memref<1x1024xf32, #tpu.memory_space<vmem>>, vector<1x1024xf32>,
    return
  }
  func.func @transform_0(%arg0: i32) -> (i32, i32) {
    %c0_i32 = arith.constant 0 : i32
    %c0_i32_0 = arith.constant 0 : i32
    return %arg0, %c0_i32 : i32, i32
  }
  func.func @transform_1(%arg0: i32) -> (i32, i32) {
    %c0_i32 = arith.constant 0 : i32
    %c0_i32_0 = arith.constant 0 : i32
    return %c0_i32, %arg0 : i32, i32
  }
  func.func @transform_2(%arg0: i32) -> (i32, i32) {
    %c0_i32 = arith.constant 0 : i32
    %c0_i32_0 = arith.constant 0 : i32
    %c0_i32_1 = arith.constant 0 : i32
    return %c0_i32, %c0_i32_0 : i32, i32
  }
  func.func @transform_3(%arg0: i32) -> (i32, i32) {
    %c0_i32 = arith.constant 0 : i32
    %c0_i32_0 = arith.constant 0 : i32
    %c0_i32_1 = arith.constant 0 : i32
    return %c0_i32, %c0_i32_0 : i32, i32
  }
  func.func @transform_4(%arg0: i32) -> (i32, i32) {
    %c0_i32 = arith.constant 0 : i32
    %c0_i32_0 = arith.constant 0 : i32
    %c0_i32_1 = arith.constant 0 : i32
    return %c0_i32, %c0_i32_0 : i32, i32
  }
  func.func @transform_5(%arg0: i32) -> (i32, i32) {
    %c0_i32 = arith.constant 0 : i32
    %c0_i32_0 = arith.constant 0 : i32
    return %c0_i32, %arg0 : i32, i32
  }
}

</mosaic_0001>

<bundles_post_ra>
// kernel: tpu_custom_call.1
= control target key start
LH: loop header
LB: loop body
LE: loop exit
PB: predicated region body
PF: predicated region fallthrough
CT: control target
= control target key end

     0   :  { %10 = vsyncpa [#allocation3], 0  ;;  %s8727_s0 = inlined_call_operand.vmem [shape: bf16[2048,32], index: 0, kind: input, shape index: {}]   ;;  %s8728_s1 = inlined_call_operand.vmem [shape: f32[1,2048], index: 1, kind: input, shape index: {}]   ;;  %s8729_s2 = inlined_call_operand.vmem [shape: bf16[32,32], index: 2, kind: input, shape index: {}]   ;;  %s8730_s3 = inlined_call_operand.vmem [shape: bf16[32,4], index: 3, kind: input, shape index: {}]   ;;  %s8731_s4 = inlined_call_operand.vmem [shape: f32[4,2], index: 4, kind: input, shape index: {}]   ;;  %s8732_s5 = inlined_call_operand.hbm [shape: f32[1,2048], index: 5, kind: output, shape index: {}]  }
   0x1   :  { %12 = vsyncpa [#allocation3 + $0x1], 0  ;;  %s6376_s18 = smov 0   ;;  %s6378_s19 = smov 0  }
   0x2   :  { %s6380_s20 = smov 0   ;;  %s6382_s21 = smov 0  }
   0x3 LB: > { %s6397_s22 = sadd.s32 4294967295, %s6338_s21   ;;  %s4927_s23 = sadd.s32 4294967294, %s6338_s21   ;;  %s6338_s21 = sphi %s6382_s21, %s9096_s21   ;;  %s6334_s20 = sphi %s6380_s20, %s9095_s20   ;;  %s6330_s19 = sphi %s6378_s19, %s9094_s19   ;;  %s6326_s18 = sphi %s6376_s18, %s9093_s18  }
   0x4   : > { %s6401_s24 = sadd.s32 1, %s6338_s21   ;;  %s140_s25 = sadd.s32 1, %s6334_s20 }
   0x5   : > { %s137_s26 = ssub.s32 %s6338_s21, %s6401_s24  ;;  %p150_p0 = scmp.ne.s32.totalorder %s6334_s20, %s6330_s19 }
   0x6   : > { %p138_p1 = scmp.eq.s32.totalorder %s137_s26, 0  ;;  %p151_p2 = scmp.eq.s32.totalorder %s6397_s22, 1 }
   0x7   : > { %p156_p3 = scmp.ne.s32.totalorder %s6330_s19, %s6326_s18  ;;  %p157_p4 = scmp.eq.s32.totalorder %s4927_s23, 1 }
   0x8   : > { %s6412_s27 = scalar_select %p138_p1, %s6334_s20, %s140_s25  }
   0x9   : > { %p6414_p5 = por %p151_p2, %p150_p0  ;;  %p6418_p6 = por %p157_p4, %p156_p3 }
   0xa   : > { %p4930_p7 = scmp.ge.s32.totalorder %s6338_s21, 1  ;;  %p201_p8 = scmp.lt.s32.totalorder %s6338_s21, 3 }
   0xc   : > { %p202_p9 = pnand %p4930_p7, %p201_p8 }
   0xe   : > { %205 = sbr.rel (%p202_p9) target bundleno = 1338 (0x53a), region = 40 }
  0x15   : > { %v6048_v0 = vld [vmem:[%s8729_s2] sm:$0xff]   ;;  %s6428_s7 = sshll.u32 %s6397_s22, 7  ;;  %v6049_v1 = vld [vmem:[%s8729_s2 + $0x8] sm:$0xff]   ;;  %vm838_vm0 = vcmask 261120   ;;  %v6340_v5 = vmov 1.0|1.0  }
  0x16   : > { %p234_p10 = scmp.lt.s32.totalorder %s6428_s7, 255  ;;  %5529 = vmatprep.subr.bf16.mxu0 %v6048_v0  ;;  %5997 = vmatprep.subr.bf16.mxu1 %v6048_v0  ;;  %v6106_v59 = vld [vmem:[%s8730_s3] sm:$0xff]   ;;  %s6341_s25 = smov 4   ;;  %vm3866_vm1 = vcmask 31744   ;;  %vm3995_vm2 = vcmask 39936  }
  0x17   : > { %5530 = vmatpush3.bf16.msra.mxu0 %v6048_v0  ;;  %5999 = vmatpush3.bf16.msra.mxu1 %v6048_v0  ;;  %s4934_s6 = sshll.u32 %s6397_s22, 3  ;;  %s8685_s16 = scalar_lea.hbm %s8732_s5, %s6428_s7 }
  0x18   : > { %s235_s10 = scalar_select %p234_p10, %s6428_s7, 255  ;;  %5531 = vmatprep.subr.bf16.mxu0 %v6049_v1  ;;  %5998 = vmatprep.subr.bf16.mxu1 %v6049_v1 }
  0x19   : > { %p240_p11 = scmp.lt.s32.totalorder %s4934_s6, 15 }
  0x1a   : > { %s4933_s11 = sshll.u32 %s235_s10, 2  ;;  %s230_s10 = sand.u32 1, %s6330_s19  }
  0x1b   : > { %s6438_s14 = scalar_lea.vmem %s8727_s0, %s4933_s11  ;;  %5532 = vmatpush3.bf16.msra.mxu0 %v6049_v1  ;;  %6000 = vmatpush3.bf16.msra.mxu1 %v6049_v1  ;;  %s9098_s6 = smov (!%p240_p11, %s4934_s6), 15 }
  0x1c   : > { %v6441_v2 = vld [vmem:[%s6438_s14] sm:$0xff]   ;;  %v6444_v3 = vld [vmem:[%s6438_s14 + $0x8] sm:$0xff]   ;;  %v6447_v4 = vld [vmem:[%s6438_s14 + $0x10] sm:$0xff]   ;;  %5993 = vmatprep.subr.bf16.mxu0 %v6340_v5  ;;  %5661 = vmatprep.subr.bf16.mxu1 %v6106_v59  ;;  %s242_s9 = scalar_lea.vmem %s8728_s1, %s9098_s6  ;;  %s4931_s11 = sshll.u32 %s230_s10, 3 }
  0x1d   : > { %5533 = vmatprep.mubr.msk.bf16.mxu0 %vm838_vm0, %v6441_v2  ;;  %v6456_v6 = vld [vmem:[%s6438_s14 + $0x18] sm:$0xff]   ;;  %v6459_v7 = vld [vmem:[%s6438_s14 + $0x20] sm:$0xff]   ;;  %v6465_v9 = vld [vmem:[%s6438_s14 + $0x108] sm:$0xff]   ;;  %s232_s12 = scalar_lea.vmem [#allocation2], %s4931_s11  ;;  %s4845_s17 = scalar_lea.sflag [#allocation3], %s230_s10 }
  0x1e   : > { %5534 = vmatmul.mubr.msk.bf16.vlgmr.msra.gmra.mrb[0].mxu0 %vm838_vm0, %v6444_v3  ;;  %v6462_v8 = vld [vmem:[%s6438_s14 + $0x100] sm:$0xff]   ;;  %v6468_v10 = vld [vmem:[%s6438_s14 + $0x110] sm:$0xff]   ;;  %v6475_v11 = vld [vmem:[%s6438_s14 + $0x28] sm:$0xff]   ;;  %s4859_s13 = sshll.u32 %s232_s12, 4  ;;  %s8687_s13 = int_to_ptr.vmem [resolvable:$true] %s4859_s13 }
  0x1f   : > { %5537 = vmatprep.mubr.msk.bf16.mxu0 %vm838_vm0, %v6447_v4  ;;  %5994 = vmatpush3.bf16.msra.mxu0 %v6340_v5  ;;  %v6480_v12 = vld [vmem:[%s6438_s14 + $0x30] sm:$0xff]   ;;  %v6487_v13 = vld [vmem:[%s6438_s14 + $0x118] sm:$0xff]   ;;  %v6490_v14 = vld [vmem:[%s6438_s14 + $0x120] sm:$0xff]   ;;  %s6276_s23 = scalar_lea.vmem %s8687_s13, 128 }
  0x20   : > { %5995 = vmatprep.subr.bf16.mxu0 %v6340_v5  ;;  %5597 = vmatprep.mubr.msk.bf16.mxu1 %vm838_vm0, %v6462_v8  ;;  %v6497_v15 = vld [vmem:[%s6438_s14 + $0x38] sm:$0xff]   ;;  %v6500_v16 = vld [vmem:[%s6438_s14 + $0x40] sm:$0xff]   ;;  %v6507_v17 = vld [vmem:[%s6438_s14 + $0x128] sm:$0xff]   ;;  %p6277_p12 = scmp.ne.s32.totalorder %s8687_s13, %s6276_s23 }
  0x21   : > { %5598 = vmatmul.mubr.msk.bf16.vlgmr.msra.gmra.mrb[0].mxu1 %vm838_vm0, %v6465_v9  ;;  %v6510_v18 = vld [vmem:[%s6438_s14 + $0x130] sm:$0xff]   ;;  %v6517_v19 = vld [vmem:[%s6438_s14 + $0x48] sm:$0xff]   ;;  %v6527_v21 = vld [vmem:[%s6438_s14 + $0x138] sm:$0xff]  }
  0x22   : > { %5601 = vmatprep.mubr.msk.bf16.mxu1 %vm838_vm0, %v6468_v10  ;;  %v6520_v20 = vld [vmem:[%s6438_s14 + $0x50] sm:$0xff]   ;;  %v6530_v22 = vld [vmem:[%s6438_s14 + $0x140] sm:$0xff]   ;;  %v6537_v23 = vld [vmem:[%s6438_s14 + $0x58] sm:$0xff]   ;;  %5662 = vmatpush3.bf16.msra.mxu1 %v6106_v59  ;;  %p6278_p13 = pnand %p6277_p12, %p6414_p5 }
  0x23   : > { %5996 = vmatpush3.bf16.msra.mxu0 %v6340_v5  ;;  %v6540_v24 = vld [vmem:[%s6438_s14 + $0x60] sm:$0xff]   ;;  %v6547_v25 = vld [vmem:[%s6438_s14 + $0x148] sm:$0xff]   ;;  %v6550_v26 = vld [vmem:[%s6438_s14 + $0x150] sm:$0xff]  }
  0x24   : > { %v6557_v27 = vld [vmem:[%s6438_s14 + $0x68] sm:$0xff]   ;;  %v6560_v28 = vld [vmem:[%s6438_s14 + $0x70] sm:$0xff]   ;;  %v6567_v29 = vld [vmem:[%s6438_s14 + $0x158] sm:$0xff]   ;;  %p6279_p0 = pneg %p6278_p13 }
  0x25   : > { %v6570_v30 = vld [vmem:[%s6438_s14 + $0x160] sm:$0xff]   ;;  %v6577_v31 = vld [vmem:[%s6438_s14 + $0x78] sm:$0xff]   ;;  %v6587_v33 = vld [vmem:[%s6438_s14 + $0x168] sm:$0xff]  }
  0x26   : > { %5538 = vmatmul.mubr.msk.bf16.gmra.mrb[4].mxu0 %vm838_vm0, %v6456_v6  ;;  %8757 = vst [vmem:[#allocation5_spill] sm:$0xff] %v6570_v30  ;;  %v6580_v32 = vld [vmem:[%s6438_s14 + $0x80] sm:$0xff]   ;;  %8758 = vst [vmem:[#allocation6_spill] sm:$0xff] %v6587_v33  ;;  %v6590_v34 = vld [vmem:[%s6438_s14 + $0x170] sm:$0xff]  }
  0x27   : > { %5541 = vmatprep.mubr.msk.bf16.mxu0 %vm838_vm0, %v6459_v7  ;;  %8759 = vst [vmem:[#allocation7_spill] sm:$0xff] %v6590_v34  ;;  %v6597_v35 = vld [vmem:[%s6438_s14 + $0x88] sm:$0xff]   ;;  %v6600_v36 = vld [vmem:[%s6438_s14 + $0x90] sm:$0xff]   ;;  %v6607_v37 = vld [vmem:[%s6438_s14 + $0x178] sm:$0xff]  }
  0x28   : > { %8760 = vst [vmem:[#allocation8_spill] sm:$0xff] %v6607_v37  ;;  %v6610_v38 = vld [vmem:[%s6438_s14 + $0x180] sm:$0xff]   ;;  %v6617_v39 = vld [vmem:[%s6438_s14 + $0x98] sm:$0xff]   ;;  %v6627_v41 = vld [vmem:[%s6438_s14 + $0x188] sm:$0xff]  }
  0x29   : > { %5602 = vmatmul.mubr.msk.bf16.gmra.mrb[4].mxu1 %vm838_vm0, %v6487_v13  ;;  %8761 = vst [vmem:[#allocation9_spill] sm:$0xff] %v6610_v38  ;;  %v6620_v40 = vld [vmem:[%s6438_s14 + $0xa0] sm:$0xff]   ;;  %8762 = vst [vmem:[#allocation10_spill] sm:$0xff] %v6627_v41  ;;  %v6630_v42 = vld [vmem:[%s6438_s14 + $0x190] sm:$0xff]  }
  0x2a   : > { %5605 = vmatprep.mubr.msk.bf16.mxu1 %vm838_vm0, %v6490_v14  ;;  %8763 = vst [vmem:[#allocation11_spill] sm:$0xff] %v6630_v42  ;;  %v6637_v43 = vld [vmem:[%s6438_s14 + $0xa8] sm:$0xff]   ;;  %v6640_v44 = vld [vmem:[%s6438_s14 + $0xb0] sm:$0xff]   ;;  %v6647_v45 = vld [vmem:[%s6438_s14 + $0x198] sm:$0xff]  }
  0x2b   : > { %8764 = vst [vmem:[#allocation12_spill] sm:$0xff] %v6647_v45  ;;  %v6652_v46 = vld [vmem:[%s6438_s14 + $0x1a0] sm:$0xff]   ;;  %v6657_v47 = vld [vmem:[%s6438_s14 + $0xb8] sm:$0xff]   ;;  %v6667_v49 = vld [vmem:[%s6438_s14 + $0x1a8] sm:$0xff]  }
  0x2c   : > { %8765 = vst [vmem:[#allocation13_spill] sm:$0xff] %v6652_v46  ;;  %v6660_v48 = vld [vmem:[%s6438_s14 + $0xc0] sm:$0xff]   ;;  %8766 = vst [vmem:[#allocation14_spill] sm:$0xff] %v6667_v49  ;;  %v6674_v50 = vld [vmem:[%s6438_s14 + $0xc8] sm:$0xff]  }
  0x2d   : > { %v6677_v51 = vld [vmem:[%s6438_s14 + $0xd0] sm:$0xff]   ;;  %v6686_v52 = vld [vmem:[%s6438_s14 + $0xd8] sm:$0xff]   ;;  %v6689_v53 = vld [vmem:[%s6438_s14 + $0xe0] sm:$0xff]  }
  0x2e   : > { %5542 = vmatmul.mubr.msk.bf16.gmra.mrb[8].mxu0 %vm838_vm0, %v6475_v11  ;;  %v6696_v54 = vld [vmem:[%s6438_s14 + $0xe8] sm:$0xff]   ;;  %v6699_v55 = vld [vmem:[%s6438_s14 + $0xf0] sm:$0xff]   ;;  %v6706_v56 = vld [vmem:[%s6438_s14 + $0xf8] sm:$0xff]  }
  0x2f   : > { %5545 = vmatprep.mubr.msk.bf16.mxu0 %vm838_vm0, %v6480_v12  ;;  %v6711_v57 = vld [vmem:[%s6438_s14 + $0x1b0] sm:$0xff]   ;;  %v6714_v58 = vld [vmem:[%s6438_s14 + $0x1b8] sm:$0xff]   ;;  %v6724_v60 = vld [vmem:[%s6438_s14 + $0x1c0] sm:$0xff]  }
  0x30   : > { %8767 = vst [vmem:[#allocation15_spill] sm:$0xff] %v6711_v57  ;;  %8768 = vst [vmem:[#allocation16_spill] sm:$0xff] %v6714_v58  ;;  %v6727_v61 = vld [vmem:[%s6438_s14 + $0x1c8] sm:$0xff]   ;;  %v6734_v62 = vld [vmem:[%s6438_s14 + $0x1d0] sm:$0xff]  }
  0x31   : > { %5606 = vmatmul.mubr.msk.bf16.gmra.mrb[8].mxu1 %vm838_vm0, %v6507_v17  ;;  %8769 = vst [vmem:[#allocation17_spill] sm:$0xff] %v6724_v60  ;;  %8770 = vst [vmem:[#allocation18_spill] sm:$0xff] %v6727_v61  ;;  %v6737_v63 = vld [vmem:[%s6438_s14 + $0x1d8] sm:$0xff]   ;;  %v6744_v0 = vld [vmem:[%s6438_s14 + $0x1e0] sm:$0xff]  }
  0x32   : > { %5609 = vmatprep.mubr.msk.bf16.mxu1 %vm838_vm0, %v6510_v18  ;;  %8771 = vst [vmem:[#allocation19_spill] sm:$0xff] %v6734_v62  ;;  %8772 = vst [vmem:[#allocation20_spill] sm:$0xff] %v6737_v63  ;;  %v6747_v1 = vld [vmem:[%s6438_s14 + $0x1e8] sm:$0xff]   ;;  %v6754_v5 = vld [vmem:[%s6438_s14 + $0x1f0] sm:$0xff]  }
  0x33   : > { %8773 = vst [vmem:[#allocation21_spill] sm:$0xff] %v6744_v0  ;;  %8774 = vst [vmem:[#allocation22_spill] sm:$0xff] %v6747_v1  ;;  %v6757_v59 = vld [vmem:[%s6438_s14 + $0x1f8] sm:$0xff]  }
  0x34   : > { %8775 = vst [vmem:[#allocation23_spill] sm:$0xff] %v6754_v5  ;;  %8776 = vst [vmem:[#allocation24_spill] sm:$0xff] %v6757_v59 }
  0x36   : > { %5546 = vmatmul.mubr.msk.bf16.gmra.mrb[12].mxu0 %vm838_vm0, %v6497_v15 }
  0x37   : > { %5549 = vmatprep.mubr.msk.bf16.mxu0 %vm838_vm0, %v6500_v16 }
  0x39   : > { %5610 = vmatmul.mubr.msk.bf16.gmra.mrb[12].mxu1 %vm838_vm0, %v6527_v21 }
  0x3a   : > { %5613 = vmatprep.mubr.msk.bf16.mxu1 %vm838_vm0, %v6530_v22 }
  0x3e   : > { %5550 = vmatmul.mubr.msk.bf16.gmra.mrb[16].mxu0 %vm838_vm0, %v6517_v19 }
  0x3f   : > { %5553 = vmatprep.mubr.msk.bf16.mxu0 %vm838_vm0, %v6520_v20 }
  0x41   : > { %5614 = vmatmul.mubr.msk.bf16.gmra.mrb[16].mxu1 %vm838_vm0, %v6547_v25 }
  0x42   : > { %5617 = vmatprep.mubr.msk.bf16.mxu1 %vm838_vm0, %v6550_v26 }
  0x46   : > { %5554 = vmatmul.mubr.msk.bf16.gmra.mrb[20].mxu0 %vm838_vm0, %v6537_v23 }
  0x47   : > { %5557 = vmatprep.mubr.msk.bf16.mxu0 %vm838_vm0, %v6540_v24 }
  0x49   : > { %5618 = vmatmul.mubr.msk.bf16.gmra.mrb[20].mxu1 %vm838_vm0, %v6567_v29 }
  0x4a   : > { %5621 = vmatprep.mubr.msk.bf16.mxu1 %vm838_vm0, %v6570_v30 }
  0x4e   : > { %5558 = vmatmul.mubr.msk.bf16.gmra.mrb[24].mxu0 %vm838_vm0, %v6557_v27 }
  0x4f   : > { %5561 = vmatprep.mubr.msk.bf16.mxu0 %vm838_vm0, %v6560_v28 }
  0x51   : > { %5622 = vmatmul.mubr.msk.bf16.gmra.mrb[24].mxu1 %vm838_vm0, %v6587_v33 }
  0x52   : > { %5625 = vmatprep.mubr.msk.bf16.mxu1 %vm838_vm0, %v6590_v34 }
  0x56   : > { %5562 = vmatmul.mubr.msk.bf16.gmra.mrb[28].mxu0 %vm838_vm0, %v6577_v31 }
  0x57   : > { %5565 = vmatprep.mubr.msk.bf16.mxu0 %vm838_vm0, %v6580_v32 }
  0x59   : > { %5626 = vmatmul.mubr.msk.bf16.gmra.mrb[28].mxu1 %vm838_vm0, %v6607_v37 }
  0x5a   : > { %5629 = vmatprep.mubr.msk.bf16.mxu1 %vm838_vm0, %v6610_v38 }
  0x5e   : > { %5566 = vmatmul.mubr.msk.bf16.gmra.mrb[32].mxu0 %vm838_vm0, %v6597_v35 }
  0x5f   : > { %5569 = vmatprep.mubr.msk.bf16.mxu0 %vm838_vm0, %v6600_v36 }
  0x61   : > { %5630 = vmatmul.mubr.msk.bf16.gmra.mrb[32].mxu1 %vm838_vm0, %v6627_v41 }
  0x62   : > { %5633 = vmatprep.mubr.msk.bf16.mxu1 %vm838_vm0, %v6630_v42 }
  0x66   : > { %5570 = vmatmul.mubr.msk.bf16.gmra.mrb[36].mxu0 %vm838_vm0, %v6617_v39 }
  0x67   : > { %5573 = vmatprep.mubr.msk.bf16.mxu0 %vm838_vm0, %v6620_v40 }
  0x69   : > { %5634 = vmatmul.mubr.msk.bf16.gmra.mrb[36].mxu1 %vm838_vm0, %v6647_v45 }
  0x6a   : > { %5637 = vmatprep.mubr.msk.bf16.mxu1 %vm838_vm0, %v6652_v46  ;;  %v378_v46 = vunpack.c.l.bf16 %v6447_v4 }
  0x6e   : > { %5574 = vmatmul.mubr.msk.bf16.gmra.mrb[40].mxu0 %vm838_vm0, %v6637_v43 }
  0x6f   : > { %5577 = vmatprep.mubr.msk.bf16.mxu0 %vm838_vm0, %v6640_v44 }
  0x71   : > { %5638 = vmatmul.mubr.msk.bf16.gmra.mrb[40].mxu1 %vm838_vm0, %v6667_v49 }
  0x72   : > { %5641 = vmatprep.mubr.msk.bf16.mxu1 %vm838_vm0, %v6711_v57 }
  0x76   : > { %5578 = vmatmul.mubr.msk.bf16.gmra.mrb[44].mxu0 %vm838_vm0, %v6657_v47 }
  0x77   : > { %5581 = vmatprep.mubr.msk.bf16.mxu0 %vm838_vm0, %v6660_v48 }
  0x79   : > { %5642 = vmatmul.mubr.msk.bf16.gmra.mrb[44].mxu1 %vm838_vm0, %v6714_v58  ;;  %v377_v58 = vunpack.c.h.bf16 %v6444_v3 }
  0x7a   : > { %5645 = vmatprep.mubr.msk.bf16.mxu1 %vm838_vm0, %v6724_v60 }
  0x7e   : > { %5582 = vmatmul.mubr.msk.bf16.gmra.mrb[48].mxu0 %vm838_vm0, %v6674_v50 }
  0x7f   : > { %5585 = vmatprep.mubr.msk.bf16.mxu0 %vm838_vm0, %v6677_v51 }
  0x81   : > { %5646 = vmatmul.mubr.msk.bf16.gmra.mrb[48].mxu1 %vm838_vm0, %v6727_v61 }
  0x82   : > { %5649 = vmatprep.mubr.msk.bf16.mxu1 %vm838_vm0, %v6734_v62 }
  0x86   : > { %5586 = vmatmul.mubr.msk.bf16.gmra.mrb[52].mxu0 %vm838_vm0, %v6686_v52 }
  0x87   : > { %5589 = vmatprep.mubr.msk.bf16.mxu0 %vm838_vm0, %v6689_v53 }
  0x89   : > { %5650 = vmatmul.mubr.msk.bf16.gmra.mrb[52].mxu1 %vm838_vm0, %v6737_v63  ;;  %v376_v63 = vunpack.c.l.bf16 %v6444_v3 }
  0x8a   : > { %5653 = vmatprep.mubr.msk.bf16.mxu1 %vm838_vm0, %v6744_v0  ;;  %v6115_v0 = vld [vmem:[%s8730_s3 + $0x8] sm:$0xff]  }
  0x8b   : > { %5663 = vmatprep.subr.bf16.mxu1 %v6115_v0 }
  0x8c   : > { %5664 = vmatpush3.bf16.msra.mxu1 %v6115_v0 }
  0x8e   : > { %5590 = vmatmul.mubr.msk.bf16.gmra.mrb[56].mxu0 %vm838_vm0, %v6696_v54 }
  0x8f   : > { %5593 = vmatprep.mubr.msk.bf16.mxu0 %vm838_vm0, %v6699_v55 }
  0x91   : > { %5654 = vmatmul.mubr.msk.bf16.gmra.mrb[56].mxu1 %vm838_vm0, %v6747_v1  ;;  %v375_v1 = vunpack.c.h.bf16 %v6441_v2 }
  0x92   : > { %5657 = vmatprep.mubr.msk.bf16.mxu1 %vm838_vm0, %v6754_v5  ;;  %v374_v5 = vunpack.c.l.bf16 %v6441_v2 }
  0x96   : > { %5594 = vmatmul.mubr.msk.bf16.gmra.mrb[60].mxu0 %vm838_vm0, %v6706_v56 }
  0x99   : > { %5658 = vmatmul.mubr.msk.bf16.gmra.mrb[60].mxu1 %vm838_vm0, %v6757_v59 }
  0x9a   : > { %5665 = vmatprep.mubr.msk.bf16.mxu1 %vm838_vm0, %v6441_v2 }
  0xa1   : > { %5666 = vmatmul.mubr.msk.bf16.vlgmr.msra.gmra.mrb[64].mxu1 %vm838_vm0, %v6444_v3  ;;  %v379_v3 = vunpack.c.h.bf16 %v6447_v4 }
  0xa2   : > { %5669 = vmatprep.mubr.msk.bf16.mxu1 %vm838_vm0, %v6447_v4 }
  0xa9   : > { %5670 = vmatmul.mubr.msk.bf16.gmra.mrb[68].mxu1 %vm838_vm0, %v6456_v6 }
  0xaa   : > { %5673 = vmatprep.mubr.msk.bf16.mxu1 %vm838_vm0, %v6459_v7 }
  0xb1   : > { %5674 = vmatmul.mubr.msk.bf16.gmra.mrb[72].mxu1 %vm838_vm0, %v6475_v11 }
  0xb2   : > { %5677 = vmatprep.mubr.msk.bf16.mxu1 %vm838_vm0, %v6480_v12 }
  0xb9   : > { %5678 = vmatmul.mubr.msk.bf16.gmra.mrb[76].mxu1 %vm838_vm0, %v6497_v15 }
  0xba   : > { %5681 = vmatprep.mubr.msk.bf16.mxu1 %vm838_vm0, %v6500_v16 }
  0xc1   : > { %5682 = vmatmul.mubr.msk.bf16.gmra.mrb[80].mxu1 %vm838_vm0, %v6517_v19 }
  0xc2   : > { %5685 = vmatprep.mubr.msk.bf16.mxu1 %vm838_vm0, %v6520_v20 }
  0xc9   : > { %5686 = vmatmul.mubr.msk.bf16.gmra.mrb[84].mxu1 %vm838_vm0, %v6537_v23 }
  0xca   : > { %5689 = vmatprep.mubr.msk.bf16.mxu1 %vm838_vm0, %v6540_v24 }
  0xd1   : > { %5690 = vmatmul.mubr.msk.bf16.gmra.mrb[88].mxu1 %vm838_vm0, %v6557_v27 }
  0xd2   : > { %5693 = vmatprep.mubr.msk.bf16.mxu1 %vm838_vm0, %v6560_v28 }
  0xd9   : > { %5694 = vmatmul.mubr.msk.bf16.gmra.mrb[92].mxu1 %vm838_vm0, %v6577_v31 }
  0xda   : > { %5697 = vmatprep.mubr.msk.bf16.mxu1 %vm838_vm0, %v6580_v32 }
  0xe1   : > { %5698 = vmatmul.mubr.msk.bf16.gmra.mrb[96].mxu1 %vm838_vm0, %v6597_v35 }
  0xe2   : > { %5701 = vmatprep.mubr.msk.bf16.mxu1 %vm838_vm0, %v6600_v36 }
  0xe9   : > { %5702 = vmatmul.mubr.msk.bf16.gmra.mrb[100].mxu1 %vm838_vm0, %v6617_v39 }
  0xea   : > { %5705 = vmatprep.mubr.msk.bf16.mxu1 %vm838_vm0, %v6620_v40 }
  0xf1   : > { %v5535_v59 = vpop.f32.mrb[0].mxu0  ;;  %5706 = vmatmul.mubr.msk.bf16.gmra.mrb[104].mxu1 %vm838_vm0, %v6637_v43 }
  0xf2   : > { %v1065_v0 = vpop.f32.mrb[1].mxu0  ;;  %v1578_v49 = vmul.f32 %v5535_v59, %v376_v63  ;;  %5709 = vmatprep.mubr.msk.bf16.mxu1 %vm838_vm0, %v6640_v44 }
  0xf3   : > { %v1576_v62 = vmul.f32 %v1065_v0, %v374_v5  ;;  %v5536_v61 = vpop.f32.mrb[2].mxu0 }
  0xf4   : > { %v1068_v60 = vpop.f32.mrb[3].mxu0  ;;  %v1579_v2 = vmul.f32 %v5536_v61, %v377_v58 }
  0xf5   : > { %v1577_v57 = vmul.f32 %v1068_v60, %v375_v1  ;;  %5801 = vmatprep.mubr.msk.f32.mxu0 %vm838_vm0, %v1576_v62  ;;  %v380_v60 = vunpack.c.l.bf16 %v6456_v6 }
  0xf7   : > { %5802 = vmatmul.mubr.msk.f32.vlgmr.msra.gmra.mrb[64].mxu0 %vm838_vm0, %v1577_v57  ;;  %v6791_v57 = vpop.f32.mrb[0].mxu1 }
  0xf8   : > { %5804 = vmatprep.mubr.msk.f32.mxu0 %vm838_vm0, %v1578_v49  ;;  %v6793_v0 = vpop.f32.mrb[1].mxu1  ;;  %v381_v49 = vunpack.c.h.bf16 %v6456_v6 }
  0xf9   : > { %v5539_v5 = vpop.f32.mrb[4].mxu0  ;;  %v6797_v58 = vpop.f32.mrb[2].mxu1  ;;  %5710 = vmatmul.mubr.msk.bf16.gmra.mrb[108].mxu1 %vm838_vm0, %v6657_v47 }
  0xfa   : > { %v1081_v62 = vpop.f32.mrb[5].mxu0  ;;  %v1582_v4 = vmul.f32 %v5539_v5, %v380_v60  ;;  %v6799_v61 = vpop.f32.mrb[3].mxu1  ;;  %v384_v5 = vunpack.c.l.bf16 %v6475_v11  ;;  %5713 = vmatprep.mubr.msk.bf16.mxu1 %vm838_vm0, %v6660_v48 }
  0xfb   : > { %v1580_v63 = vmul.f32 %v1081_v62, %v378_v46  ;;  %v5540_v1 = vpop.f32.mrb[6].mxu0  ;;  %5805 = vmatmul.mubr.msk.f32.gmra.mrb[66].mxu0 %vm838_vm0, %v1579_v2  ;;  %v382_v46 = vunpack.c.l.bf16 %v6459_v7 }
  0xfc   : > { %v1084_v59 = vpop.f32.mrb[7].mxu0  ;;  %v1583_v6 = vmul.f32 %v5540_v1, %v381_v49 }
  0xfd   : > { %v1581_v45 = vmul.f32 %v1084_v59, %v379_v3  ;;  %5807 = vmatprep.mubr.msk.f32.mxu0 %vm838_vm0, %v1580_v63  ;;  %v383_v3 = vunpack.c.h.bf16 %v6459_v7 }
  0xff   : > { %5808 = vmatmul.mubr.msk.f32.gmra.mrb[68].mxu0 %vm838_vm0, %v1581_v45  ;;  %v6811_v45 = vpop.f32.mrb[4].mxu1 }
 0x100   : > { %5810 = vmatprep.mubr.msk.f32.mxu0 %vm838_vm0, %v1582_v4  ;;  %v6813_v42 = vpop.f32.mrb[5].mxu1  ;;  %v385_v4 = vunpack.c.h.bf16 %v6475_v11 }
 0x101   : > { %v5543_v2 = vpop.f32.mrb[8].mxu0  ;;  %v6817_v1 = vpop.f32.mrb[6].mxu1  ;;  %5714 = vmatmul.mubr.msk.bf16.gmra.mrb[112].mxu1 %vm838_vm0, %v6674_v50 }
 0x102   : > { %v1097_v60 = vpop.f32.mrb[9].mxu0  ;;  %v1586_v7 = vmul.f32 %v5543_v2, %v384_v5  ;;  %v6819_v49 = vpop.f32.mrb[7].mxu1  ;;  %v388_v2 = vunpack.c.l.bf16 %v6497_v15  ;;  %5717 = vmatprep.mubr.msk.bf16.mxu1 %vm838_vm0, %v6677_v51 }
 0x103   : > { %v1584_v62 = vmul.f32 %v1097_v60, %v382_v46  ;;  %v5544_v63 = vpop.f32.mrb[10].mxu0  ;;  %5811 = vmatmul.mubr.msk.f32.gmra.mrb[70].mxu0 %vm838_vm0, %v1583_v6  ;;  %v386_v46 = vunpack.c.l.bf16 %v6480_v12 }
 0x104   : > { %v1100_v59 = vpop.f32.mrb[11].mxu0  ;;  %v1587_v11 = vmul.f32 %v5544_v63, %v385_v4 }
 0x105   : > { %v1585_v41 = vmul.f32 %v1100_v59, %v383_v3  ;;  %5813 = vmatprep.mubr.msk.f32.mxu0 %vm838_vm0, %v1584_v62  ;;  %v387_v3 = vunpack.c.h.bf16 %v6480_v12 }
 0x107   : > { %5814 = vmatmul.mubr.msk.f32.gmra.mrb[72].mxu0 %vm838_vm0, %v1585_v41  ;;  %v6831_v41 = vpop.f32.mrb[8].mxu1 }
 0x108   : > { %5816 = vmatprep.mubr.msk.f32.mxu0 %vm838_vm0, %v1586_v7  ;;  %v6833_v38 = vpop.f32.mrb[9].mxu1  ;;  %v389_v7 = vunpack.c.h.bf16 %v6497_v15 }
 0x109   : > { %v5547_v6 = vpop.f32.mrb[12].mxu0  ;;  %v6837_v63 = vpop.f32.mrb[10].mxu1  ;;  %5718 = vmatmul.mubr.msk.bf16.gmra.mrb[116].mxu1 %vm838_vm0, %v6686_v52 }
 0x10a   : > { %v1113_v5 = vpop.f32.mrb[13].mxu0  ;;  %v1590_v12 = vmul.f32 %v5547_v6, %v388_v2  ;;  %v6839_v4 = vpop.f32.mrb[11].mxu1  ;;  %v392_v6 = vunpack.c.l.bf16 %v6517_v19  ;;  %5721 = vmatprep.mubr.msk.bf16.mxu1 %vm838_vm0, %v6689_v53 }
 0x10b   : > { %v1588_v60 = vmul.f32 %v1113_v5, %v386_v46  ;;  %v5548_v62 = vpop.f32.mrb[14].mxu0  ;;  %5817 = vmatmul.mubr.msk.f32.gmra.mrb[74].mxu0 %vm838_vm0, %v1587_v11  ;;  %v390_v46 = vunpack.c.l.bf16 %v6500_v16 }
 0x10c   : > { %v1116_v59 = vpop.f32.mrb[15].mxu0  ;;  %v1591_v15 = vmul.f32 %v5548_v62, %v389_v7 }
 0x10d   : > { %v1589_v37 = vmul.f32 %v1116_v59, %v387_v3  ;;  %5819 = vmatprep.mubr.msk.f32.mxu0 %vm838_vm0, %v1588_v60  ;;  %v391_v3 = vunpack.c.h.bf16 %v6500_v16 }
 0x10f   : > { %5820 = vmatmul.mubr.msk.f32.gmra.mrb[76].mxu0 %vm838_vm0, %v1589_v37  ;;  %v6851_v37 = vpop.f32.mrb[12].mxu1 }
 0x110   : > { %5822 = vmatprep.mubr.msk.f32.mxu0 %vm838_vm0, %v1590_v12  ;;  %v6853_v34 = vpop.f32.mrb[13].mxu1  ;;  %v393_v12 = vunpack.c.h.bf16 %v6517_v19 }
 0x111   : > { %v5551_v11 = vpop.f32.mrb[16].mxu0  ;;  %v6857_v62 = vpop.f32.mrb[14].mxu1  ;;  %5722 = vmatmul.mubr.msk.bf16.gmra.mrb[120].mxu1 %vm838_vm0, %v6696_v54 }
 0x112   : > { %v1129_v2 = vpop.f32.mrb[17].mxu0  ;;  %8777 = vst [vmem:[#allocation25_spill] sm:$0xff] %v6857_v62  ;;  %v1594_v16 = vmul.f32 %v5551_v11, %v392_v6  ;;  %v6859_v7 = vpop.f32.mrb[15].mxu1  ;;  %v396_v11 = vunpack.c.l.bf16 %v6537_v23  ;;  %5725 = vmatprep.mubr.msk.bf16.mxu1 %vm838_vm0, %v6699_v55 }
 0x113   : > { %v1592_v5 = vmul.f32 %v1129_v2, %v390_v46  ;;  %v5552_v60 = vpop.f32.mrb[18].mxu0  ;;  %5823 = vmatmul.mubr.msk.f32.gmra.mrb[78].mxu0 %vm838_vm0, %v1591_v15  ;;  %v394_v46 = vunpack.c.l.bf16 %v6520_v20 }
 0x114   : > { %v1132_v59 = vpop.f32.mrb[19].mxu0  ;;  %v1595_v19 = vmul.f32 %v5552_v60, %v393_v12 }
 0x115   : > { %v1593_v33 = vmul.f32 %v1132_v59, %v391_v3  ;;  %5825 = vmatprep.mubr.msk.f32.mxu0 %vm838_vm0, %v1592_v5  ;;  %v395_v3 = vunpack.c.h.bf16 %v6520_v20 }
 0x117   : > { %5826 = vmatmul.mubr.msk.f32.gmra.mrb[80].mxu0 %vm838_vm0, %v1593_v33  ;;  %v6871_v33 = vpop.f32.mrb[16].mxu1 }
 0x118   : > { %5828 = vmatprep.mubr.msk.f32.mxu0 %vm838_vm0, %v1594_v16  ;;  %8778 = vst [vmem:[#allocation26_spill] sm:$0xff] %v6871_v33  ;;  %v6873_v62 = vpop.f32.mrb[17].mxu1  ;;  %v397_v16 = vunpack.c.h.bf16 %v6537_v23 }
 0x119   : > { %v5555_v15 = vpop.f32.mrb[20].mxu0  ;;  %v6877_v60 = vpop.f32.mrb[18].mxu1  ;;  %5726 = vmatmul.mubr.msk.bf16.gmra.mrb[124].mxu1 %vm838_vm0, %v6706_v56 }
 0x11a   : > { %v1145_v6 = vpop.f32.mrb[21].mxu0  ;;  %8779 = vst [vmem:[#allocation27_spill] sm:$0xff] %v6877_v60  ;;  %v1598_v20 = vmul.f32 %v5555_v15, %v396_v11  ;;  %v6879_v12 = vpop.f32.mrb[19].mxu1  ;;  %v400_v15 = vunpack.c.l.bf16 %v6557_v27  ;;  %5729 = vmatprep.mubr.msk.bf16.mxu1 %vm838_vm0, %v6462_v8  ;;  %v434_v8 = vunpack.c.l.bf16 %v6699_v55 }
 0x11b   : > { %v1596_v2 = vmul.f32 %v1145_v6, %v394_v46  ;;  %v5556_v5 = vpop.f32.mrb[22].mxu0  ;;  %5829 = vmatmul.mubr.msk.f32.gmra.mrb[82].mxu0 %vm838_vm0, %v1595_v19  ;;  %v398_v46 = vunpack.c.l.bf16 %v6540_v24 }
 0x11c   : > { %v1148_v59 = vpop.f32.mrb[23].mxu0  ;;  %v1599_v23 = vmul.f32 %v5556_v5, %v397_v16 }
 0x11d   : > { %v1597_v30 = vmul.f32 %v1148_v59, %v395_v3  ;;  %5831 = vmatprep.mubr.msk.f32.mxu0 %vm838_vm0, %v1596_v2  ;;  %v399_v3 = vunpack.c.h.bf16 %v6540_v24 }
 0x11f   : > { %5832 = vmatmul.mubr.msk.f32.gmra.mrb[84].mxu0 %vm838_vm0, %v1597_v30  ;;  %v6891_v30 = vpop.f32.mrb[20].mxu1 }
 0x120   : > { %5834 = vmatprep.mubr.msk.f32.mxu0 %vm838_vm0, %v1598_v20  ;;  %8780 = vst [vmem:[#allocation28_spill] sm:$0xff] %v6891_v30  ;;  %v6893_v60 = vpop.f32.mrb[21].mxu1  ;;  %v401_v20 = vunpack.c.h.bf16 %v6557_v27 }
 0x121   : > { %v5559_v19 = vpop.f32.mrb[24].mxu0  ;;  %v6897_v5 = vpop.f32.mrb[22].mxu1  ;;  %5730 = vmatmul.mubr.msk.bf16.gmra.mrb[128].mxu1 %vm838_vm0, %v6465_v9 }
 0x122   : > { %v1161_v11 = vpop.f32.mrb[25].mxu0  ;;  %8781 = vst [vmem:[#allocation29_spill] sm:$0xff] %v6897_v5  ;;  %v1602_v24 = vmul.f32 %v5559_v19, %v400_v15  ;;  %v6899_v16 = vpop.f32.mrb[23].mxu1  ;;  %v404_v19 = vunpack.c.l.bf16 %v6577_v31  ;;  %5733 = vmatprep.mubr.msk.bf16.mxu1 %vm838_vm0, %v6468_v10 }
 0x123   : > { %v1600_v6 = vmul.f32 %v1161_v11, %v398_v46  ;;  %v5560_v2 = vpop.f32.mrb[26].mxu0  ;;  %5835 = vmatmul.mubr.msk.f32.gmra.mrb[86].mxu0 %vm838_vm0, %v1599_v23  ;;  %v402_v46 = vunpack.c.l.bf16 %v6560_v28 }
 0x124   : > { %v1164_v59 = vpop.f32.mrb[27].mxu0  ;;  %v1603_v27 = vmul.f32 %v5560_v2, %v401_v20 }
 0x125   : > { %v1601_v33 = vmul.f32 %v1164_v59, %v399_v3  ;;  %5837 = vmatprep.mubr.msk.f32.mxu0 %vm838_vm0, %v1600_v6  ;;  %v403_v3 = vunpack.c.h.bf16 %v6560_v28 }
 0x127   : > { %5838 = vmatmul.mubr.msk.f32.gmra.mrb[88].mxu0 %vm838_vm0, %v1601_v33  ;;  %v6911_v33 = vpop.f32.mrb[24].mxu1 }
 0x128   : > { %5840 = vmatprep.mubr.msk.f32.mxu0 %vm838_vm0, %v1602_v24  ;;  %8782 = vst [vmem:[#allocation30_spill] sm:$0xff] %v6911_v33  ;;  %v6913_v5 = vpop.f32.mrb[25].mxu1  ;;  %v405_v24 = vunpack.c.h.bf16 %v6577_v31 }
 0x129   : > { %v5563_v23 = vpop.f32.mrb[28].mxu0  ;;  %v6917_v2 = vpop.f32.mrb[26].mxu1  ;;  %5734 = vmatmul.mubr.msk.bf16.gmra.mrb[132].mxu1 %vm838_vm0, %v6487_v13 }
 0x12a   : > { %v1177_v15 = vpop.f32.mrb[29].mxu0  ;;  %8783 = vst [vmem:[#allocation31_spill] sm:$0xff] %v6917_v2  ;;  %v1606_v28 = vmul.f32 %v5563_v23, %v404_v19  ;;  %v6919_v20 = vpop.f32.mrb[27].mxu1  ;;  %v408_v23 = vunpack.c.l.bf16 %v6597_v35  ;;  %5737 = vmatprep.mubr.msk.bf16.mxu1 %vm838_vm0, %v6490_v14 }
 0x12b   : > { %v1604_v11 = vmul.f32 %v1177_v15, %v402_v46  ;;  %v5564_v6 = vpop.f32.mrb[30].mxu0  ;;  %5841 = vmatmul.mubr.msk.f32.gmra.mrb[90].mxu0 %vm838_vm0, %v1603_v27  ;;  %v406_v46 = vunpack.c.l.bf16 %v6580_v32 }
 0x12c   : > { %v1180_v59 = vpop.f32.mrb[31].mxu0  ;;  %v1607_v31 = vmul.f32 %v5564_v6, %v405_v24 }
 0x12d   : > { %v1605_v30 = vmul.f32 %v1180_v59, %v403_v3  ;;  %5843 = vmatprep.mubr.msk.f32.mxu0 %vm838_vm0, %v1604_v11  ;;  %v407_v3 = vunpack.c.h.bf16 %v6580_v32 }
 0x12f   : > { %5844 = vmatmul.mubr.msk.f32.gmra.mrb[92].mxu0 %vm838_vm0, %v1605_v30  ;;  %v6931_v30 = vpop.f32.mrb[28].mxu1 }
 0x130   : > { %5846 = vmatprep.mubr.msk.f32.mxu0 %vm838_vm0, %v1606_v28  ;;  %8784 = vst [vmem:[#allocation32_spill] sm:$0xff] %v6931_v30  ;;  %v6933_v2 = vpop.f32.mrb[29].mxu1  ;;  %v409_v28 = vunpack.c.h.bf16 %v6597_v35 }
 0x131   : > { %v5567_v27 = vpop.f32.mrb[32].mxu0  ;;  %v6937_v6 = vpop.f32.mrb[30].mxu1  ;;  %5738 = vmatmul.mubr.msk.bf16.gmra.mrb[136].mxu1 %vm838_vm0, %v6507_v17 }
 0x132   : > { %v1193_v19 = vpop.f32.mrb[33].mxu0  ;;  %8785 = vst [vmem:[#allocation33_spill] sm:$0xff] %v6937_v6  ;;  %v1610_v32 = vmul.f32 %v5567_v27, %v408_v23  ;;  %v6939_v24 = vpop.f32.mrb[31].mxu1  ;;  %v412_v27 = vunpack.c.l.bf16 %v6617_v39  ;;  %5741 = vmatprep.mubr.msk.bf16.mxu1 %vm838_vm0, %v6510_v18 }
 0x133   : > { %v1608_v15 = vmul.f32 %v1193_v19, %v406_v46  ;;  %v5568_v11 = vpop.f32.mrb[34].mxu0  ;;  %5847 = vmatmul.mubr.msk.f32.gmra.mrb[94].mxu0 %vm838_vm0, %v1607_v31  ;;  %v410_v46 = vunpack.c.l.bf16 %v6600_v36 }
 0x134   : > { %v1196_v59 = vpop.f32.mrb[35].mxu0  ;;  %v1611_v35 = vmul.f32 %v5568_v11, %v409_v28 }
 0x135   : > { %v1609_v33 = vmul.f32 %v1196_v59, %v407_v3  ;;  %5849 = vmatprep.mubr.msk.f32.mxu0 %vm838_vm0, %v1608_v15  ;;  %v411_v3 = vunpack.c.h.bf16 %v6600_v36 }
 0x137   : > { %5850 = vmatmul.mubr.msk.f32.gmra.mrb[96].mxu0 %vm838_vm0, %v1609_v33  ;;  %v6951_v33 = vpop.f32.mrb[32].mxu1 }
 0x138   : > { %5852 = vmatprep.mubr.msk.f32.mxu0 %vm838_vm0, %v1610_v32  ;;  %8786 = vst [vmem:[#allocation34_spill] sm:$0xff] %v6951_v33  ;;  %v6953_v6 = vpop.f32.mrb[33].mxu1  ;;  %v413_v32 = vunpack.c.h.bf16 %v6617_v39 }
 0x139   : > { %v5571_v31 = vpop.f32.mrb[36].mxu0  ;;  %v6957_v11 = vpop.f32.mrb[34].mxu1  ;;  %5742 = vmatmul.mubr.msk.bf16.gmra.mrb[140].mxu1 %vm838_vm0, %v6527_v21 }
 0x13a   : > { %v1209_v23 = vpop.f32.mrb[37].mxu0  ;;  %8787 = vst [vmem:[#allocation35_spill] sm:$0xff] %v6957_v11  ;;  %v1614_v36 = vmul.f32 %v5571_v31, %v412_v27  ;;  %v6959_v28 = vpop.f32.mrb[35].mxu1  ;;  %v416_v31 = vunpack.c.l.bf16 %v6637_v43  ;;  %5745 = vmatprep.mubr.msk.bf16.mxu1 %vm838_vm0, %v6530_v22 }
 0x13b   : > { %v1612_v19 = vmul.f32 %v1209_v23, %v410_v46  ;;  %v5572_v15 = vpop.f32.mrb[38].mxu0  ;;  %5853 = vmatmul.mubr.msk.f32.gmra.mrb[98].mxu0 %vm838_vm0, %v1611_v35  ;;  %v414_v46 = vunpack.c.l.bf16 %v6620_v40 }
 0x13c   : > { %v1212_v59 = vpop.f32.mrb[39].mxu0  ;;  %v1615_v39 = vmul.f32 %v5572_v15, %v413_v32 }
 0x13d   : > { %v1613_v30 = vmul.f32 %v1212_v59, %v411_v3  ;;  %5855 = vmatprep.mubr.msk.f32.mxu0 %vm838_vm0, %v1612_v19  ;;  %v415_v3 = vunpack.c.h.bf16 %v6620_v40 }
 0x13f   : > { %5856 = vmatmul.mubr.msk.f32.gmra.mrb[100].mxu0 %vm838_vm0, %v1613_v30  ;;  %v6971_v30 = vpop.f32.mrb[36].mxu1 }
 0x140   : > { %5858 = vmatprep.mubr.msk.f32.mxu0 %vm838_vm0, %v1614_v36  ;;  %8788 = vst [vmem:[#allocation36_spill] sm:$0xff] %v6971_v30  ;;  %v6973_v11 = vpop.f32.mrb[37].mxu1  ;;  %v417_v36 = vunpack.c.h.bf16 %v6637_v43 }
 0x141   : > { %v5575_v35 = vpop.f32.mrb[40].mxu0  ;;  %v6977_v15 = vpop.f32.mrb[38].mxu1  ;;  %5746 = vmatmul.mubr.msk.bf16.gmra.mrb[144].mxu1 %vm838_vm0, %v6547_v25 }
 0x142   : > { %v1225_v27 = vpop.f32.mrb[41].mxu0  ;;  %8789 = vst [vmem:[#allocation37_spill] sm:$0xff] %v6977_v15  ;;  %v1618_v40 = vmul.f32 %v5575_v35, %v416_v31  ;;  %v6979_v32 = vpop.f32.mrb[39].mxu1  ;;  %v420_v35 = vunpack.c.l.bf16 %v6657_v47  ;;  %5749 = vmatprep.mubr.msk.bf16.mxu1 %vm838_vm0, %v6550_v26 }
 0x143   : > { %v1616_v23 = vmul.f32 %v1225_v27, %v414_v46  ;;  %v5576_v19 = vpop.f32.mrb[42].mxu0  ;;  %5859 = vmatmul.mubr.msk.f32.gmra.mrb[102].mxu0 %vm838_vm0, %v1615_v39  ;;  %v418_v46 = vunpack.c.l.bf16 %v6640_v44 }
 0x144   : > { %v1228_v59 = vpop.f32.mrb[43].mxu0  ;;  %v1619_v43 = vmul.f32 %v5576_v19, %v417_v36 }
 0x145   : > { %v1617_v33 = vmul.f32 %v1228_v59, %v415_v3  ;;  %5861 = vmatprep.mubr.msk.f32.mxu0 %vm838_vm0, %v1616_v23  ;;  %v419_v3 = vunpack.c.h.bf16 %v6640_v44 }
 0x147   : > { %5862 = vmatmul.mubr.msk.f32.gmra.mrb[104].mxu0 %vm838_vm0, %v1617_v33  ;;  %v6991_v33 = vpop.f32.mrb[40].mxu1 }
 0x148   : > { %5864 = vmatprep.mubr.msk.f32.mxu0 %vm838_vm0, %v1618_v40  ;;  %v6993_v15 = vpop.f32.mrb[41].mxu1  ;;  %v421_v40 = vunpack.c.h.bf16 %v6657_v47 }
 0x149   : > { %v5579_v39 = vpop.f32.mrb[44].mxu0  ;;  %v6997_v19 = vpop.f32.mrb[42].mxu1  ;;  %5750 = vmatmul.mubr.msk.bf16.gmra.mrb[148].mxu1 %vm838_vm0, %v6567_v29 }
 0x14a   : > { %v1241_v31 = vpop.f32.mrb[45].mxu0  ;;  %8790 = vst [vmem:[#allocation38_spill] sm:$0xff] %v6997_v19  ;;  %v1622_v44 = vmul.f32 %v5579_v39, %v420_v35  ;;  %v6999_v36 = vpop.f32.mrb[43].mxu1  ;;  %v424_v39 = vunpack.c.l.bf16 %v6674_v50 }
 0x14b   : > { %v1620_v27 = vmul.f32 %v1241_v31, %v418_v46  ;;  %v5580_v23 = vpop.f32.mrb[46].mxu0  ;;  %5865 = vmatmul.mubr.msk.f32.gmra.mrb[106].mxu0 %vm838_vm0, %v1619_v43  ;;  %v422_v46 = vunpack.c.l.bf16 %v6660_v48 }
 0x14c   : > { %v1244_v59 = vpop.f32.mrb[47].mxu0  ;;  %v1623_v47 = vmul.f32 %v5580_v23, %v421_v40  ;;  %v426_v23 = vunpack.c.l.bf16 %v6677_v51 }
 0x14d   : > { %v1621_v30 = vmul.f32 %v1244_v59, %v419_v3  ;;  %5867 = vmatprep.mubr.msk.f32.mxu0 %vm838_vm0, %v1620_v27  ;;  %v423_v3 = vunpack.c.h.bf16 %v6660_v48  ;;  %v425_v59 = vunpack.c.h.bf16 %v6674_v50  ;;  %v427_v50 = vunpack.c.h.bf16 %v6677_v51 }
 0x14f   : > { %5868 = vmatmul.mubr.msk.f32.gmra.mrb[108].mxu0 %vm838_vm0, %v1621_v30 }
 0x150   : > { %5870 = vmatprep.mubr.msk.f32.mxu0 %vm838_vm0, %v1622_v44 }
 0x151   : > { %v5583_v43 = vpop.f32.mrb[48].mxu0 }
 0x152   : > { %v1257_v35 = vpop.f32.mrb[49].mxu0  ;;  %v1626_v44 = vmul.f32 %v5583_v43, %v424_v39  ;;  %v429_v39 = vunpack.c.h.bf16 %v6686_v52 }
 0x153   : > { %v1624_v31 = vmul.f32 %v1257_v35, %v422_v46  ;;  %v5584_v27 = vpop.f32.mrb[50].mxu0  ;;  %5871 = vmatmul.mubr.msk.f32.gmra.mrb[110].mxu0 %vm838_vm0, %v1623_v47  ;;  %v428_v46 = vunpack.c.l.bf16 %v6686_v52  ;;  %v431_v52 = vunpack.c.h.bf16 %v6689_v53 }
 0x154   : > { %v1260_v30 = vpop.f32.mrb[51].mxu0  ;;  %v1627_v48 = vmul.f32 %v5584_v27, %v425_v59  ;;  %v430_v27 = vunpack.c.l.bf16 %v6689_v53  ;;  %v432_v59 = vunpack.c.l.bf16 %v6696_v54 }
 0x155   : > { %v1625_v19 = vmul.f32 %v1260_v30, %v423_v3  ;;  %5873 = vmatprep.mubr.msk.f32.mxu0 %vm838_vm0, %v1624_v31 }
 0x157   : > { %5874 = vmatmul.mubr.msk.f32.gmra.mrb[112].mxu0 %vm838_vm0, %v1625_v19 }
 0x158   : > { %5876 = vmatprep.mubr.msk.f32.mxu0 %vm838_vm0, %v1626_v44 }
 0x159   : > { %v5587_v40 = vpop.f32.mrb[52].mxu0 }
 0x15a   : > { %v1273_v47 = vpop.f32.mrb[53].mxu0  ;;  %v1630_v31 = vmul.f32 %v5587_v40, %v428_v46 }
 0x15b   : > { %v1628_v43 = vmul.f32 %v1273_v47, %v426_v23  ;;  %v5588_v3 = vpop.f32.mrb[54].mxu0  ;;  %5877 = vmatmul.mubr.msk.f32.gmra.mrb[114].mxu0 %vm838_vm0, %v1627_v48 }
 0x15c   : > { %v1276_v19 = vpop.f32.mrb[55].mxu0  ;;  %v1631_v51 = vmul.f32 %v5588_v3, %v429_v39  ;;  %v436_v3 = vunpack.c.l.bf16 %v6706_v56 }
 0x15d   : > { %v1629_v35 = vmul.f32 %v1276_v19, %v427_v50  ;;  %5879 = vmatprep.mubr.msk.f32.mxu0 %vm838_vm0, %v1628_v43  ;;  %v433_v50 = vunpack.c.h.bf16 %v6696_v54  ;;  %v435_v54 = vunpack.c.h.bf16 %v6699_v55 }
 0x15f   : > { %5880 = vmatmul.mubr.msk.f32.gmra.mrb[116].mxu0 %vm838_vm0, %v1629_v35 }
 0x160   : > { %5882 = vmatprep.mubr.msk.f32.mxu0 %vm838_vm0, %v1630_v31 }
 0x161   : > { %v5591_v30 = vpop.f32.mrb[56].mxu0 }
 0x162   : > { %v1289_v44 = vpop.f32.mrb[57].mxu0  ;;  %v1634_v47 = vmul.f32 %v5591_v30, %v432_v59 }
 0x163   : > { %v1632_v23 = vmul.f32 %v1289_v44, %v430_v27  ;;  %v5592_v48 = vpop.f32.mrb[58].mxu0  ;;  %5883 = vmatmul.mubr.msk.f32.gmra.mrb[118].mxu0 %vm838_vm0, %v1631_v51  ;;  %v6244_v27 = vld [vmem:[%s6438_s14 + $0x100] sm:$0xff]   ;;  %v437_v51 = vunpack.c.h.bf16 %v6706_v56  ;;  %v6245_v44 = vld [vmem:[%s6438_s14 + $0x108] sm:$0xff]  }
 0x164   : > { %v1292_v40 = vpop.f32.mrb[59].mxu0  ;;  %v1635_v53 = vmul.f32 %v5592_v48, %v433_v50  ;;  %v438_v9 = vunpack.c.l.bf16 %v6244_v27  ;;  %v439_v59 = vunpack.c.h.bf16 %v6244_v27  ;;  %v440_v56 = vunpack.c.l.bf16 %v6245_v44 }
 0x165   : > { %v1633_v46 = vmul.f32 %v1292_v40, %v431_v52  ;;  %5885 = vmatprep.mubr.msk.f32.mxu0 %vm838_vm0, %v1632_v23  ;;  %v6246_v23 = vld [vmem:[%s6438_s14 + $0x110] sm:$0xff]   ;;  %v441_v13 = vunpack.c.h.bf16 %v6245_v44  ;;  %v8794_v44 = vld [vmem:[#allocation6_spill] sm:$0xff] }
 0x166   : > { %v1640_v55 = vmul.f32 %v6793_v0, %v438_v9  ;;  %v442_v48 = vunpack.c.l.bf16 %v6246_v23  ;;  %v1641_v0 = vmul.f32 %v6799_v61, %v439_v59  ;;  %v1642_v40 = vmul.f32 %v6791_v57, %v440_v56  ;;  %v6248_v57 = vld [vmem:[%s6438_s14 + $0x120] sm:$0xff]   ;;  %v8792_v9 = vld [vmem:[#allocation25_spill] sm:$0xff] }
 0x167   : > { %5886 = vmatmul.mubr.msk.f32.gmra.mrb[120].mxu0 %vm838_vm0, %v1633_v46  ;;  %v1643_v50 = vmul.f32 %v6797_v58, %v441_v13  ;;  %v443_v46 = vunpack.c.h.bf16 %v6246_v23  ;;  %v446_v17 = vunpack.c.l.bf16 %v6248_v57  ;;  %v8795_v23 = vld [vmem:[#allocation7_spill] sm:$0xff] }
 0x168   : > { %5888 = vmatprep.mubr.msk.f32.mxu0 %vm838_vm0, %v1634_v47  ;;  %v1644_v14 = vmul.f32 %v6813_v42, %v442_v48  ;;  %v6247_v47 = vld [vmem:[%s6438_s14 + $0x118] sm:$0xff]   ;;  %v8796_v48 = vld [vmem:[#allocation27_spill] sm:$0xff] }
 0x169   : > { %v5595_v43 = vpop.f32.mrb[60].mxu0  ;;  %v444_v61 = vunpack.c.l.bf16 %v6247_v47  ;;  %v1645_v42 = vmul.f32 %v6819_v49, %v443_v46  ;;  %v1648_v18 = vmul.f32 %v6833_v38, %v446_v17 }
 0x16a   : > { %v1305_v19 = vpop.f32.mrb[61].mxu0  ;;  %v1638_v10 = vmul.f32 %v5595_v43, %v436_v3  ;;  %v447_v43 = vunpack.c.h.bf16 %v6248_v57  ;;  %v8798_v57 = vld [vmem:[#allocation8_spill] sm:$0xff] }
 0x16b   : > { %v1636_v39 = vmul.f32 %v1305_v19, %v434_v8  ;;  %v5596_v35 = vpop.f32.mrb[62].mxu0  ;;  %5889 = vmatmul.mubr.msk.f32.gmra.mrb[122].mxu0 %vm838_vm0, %v1635_v53  ;;  %v445_v8 = vunpack.c.h.bf16 %v6247_v47  ;;  %v1646_v53 = vmul.f32 %v6811_v45, %v444_v61  ;;  %v6250_v45 = vld [vmem:[%s6438_s14 + $0x130] sm:$0xff]   ;;  %v8797_v47 = vld [vmem:[#allocation28_spill] sm:$0xff] }
 0x16c   : > { %v1308_v31 = vpop.f32.mrb[63].mxu0  ;;  %v1639_v52 = vmul.f32 %v5596_v35, %v437_v51  ;;  %v450_v21 = vunpack.c.l.bf16 %v6250_v45  ;;  %v1649_v38 = vmul.f32 %v6839_v4, %v447_v43  ;;  %v6251_v35 = vld [vmem:[%s6438_s14 + $0x138] sm:$0xff]   ;;  %v6258_v43 = vld [vmem:[%s6438_s14 + $0x170] sm:$0xff]  }
 0x16d   : > { %v1637_v30 = vmul.f32 %v1308_v31, %v435_v54  ;;  %5891 = vmatprep.mubr.msk.f32.mxu0 %vm838_vm0, %v1636_v39  ;;  %v1647_v58 = vmul.f32 %v6817_v1, %v445_v8  ;;  %v6249_v54 = vld [vmem:[%s6438_s14 + $0x128] sm:$0xff]   ;;  %v451_v39 = vunpack.c.h.bf16 %v6250_v45  ;;  %v452_v4 = vunpack.c.l.bf16 %v6251_v35  ;;  %v8799_v8 = vld [vmem:[#allocation9_spill] sm:$0xff] }
 0x16e   : > { %v448_v49 = vunpack.c.l.bf16 %v6249_v54  ;;  %v449_v3 = vunpack.c.h.bf16 %v6249_v54  ;;  %v1652_v22 = vmul.f32 %v6853_v34, %v450_v21  ;;  %v453_v31 = vunpack.c.h.bf16 %v6251_v35  ;;  %v8801_v21 = vld [vmem:[#allocation30_spill] sm:$0xff] }
 0x16f   : > { %5892 = vmatmul.mubr.msk.f32.gmra.mrb[124].mxu0 %vm838_vm0, %v1637_v30  ;;  %v1653_v34 = vmul.f32 %v6859_v7, %v451_v39  ;;  %v1654_v27 = vmul.f32 %v6851_v37, %v452_v4  ;;  %v6254_v37 = vld [vmem:[%s6438_s14 + $0x150] sm:$0xff]   ;;  %v466_v54 = vunpack.c.l.bf16 %v6258_v43  ;;  %v6259_v39 = vld [vmem:[%s6438_s14 + $0x178] sm:$0xff]  }
 0x170   : > { %5894 = vmatprep.mubr.msk.f32.mxu0 %vm838_vm0, %v1638_v10  ;;  %v1650_v19 = vmul.f32 %v6831_v41, %v448_v49  ;;  %v1651_v1 = vmul.f32 %v6837_v63, %v449_v3  ;;  %v6252_v41 = vld [vmem:[%s6438_s14 + $0x140] sm:$0xff]   ;;  %v8791_v63 = vld [vmem:[#allocation5_spill] sm:$0xff]  ;;  %v1655_v51 = vmul.f32 %v8792_v9, %v453_v31  ;;  %v6253_v10 = vld [vmem:[%s6438_s14 + $0x148] sm:$0xff]   ;;  %v458_v29 = vunpack.c.l.bf16 %v6254_v37  ;;  %v7145_v49 = vpop.f32.mrb[44].mxu1 }
 0x171   : > { %v454_v25 = vunpack.c.l.bf16 %v6252_v41  ;;  %5753 = vmatprep.mubr.msk.bf16.mxu1 %vm838_vm0, %v8791_v63  ;;  %v455_v30 = vunpack.c.h.bf16 %v6252_v41  ;;  %v456_v7 = vunpack.c.l.bf16 %v6253_v10  ;;  %v468_v35 = vunpack.c.l.bf16 %v6259_v39  ;;  %v8803_v41 = vld [vmem:[#allocation11_spill] sm:$0xff] }
 0x172   : > { %5754 = vmatmul.mubr.msk.bf16.gmra.mrb[152].mxu1 %vm838_vm0, %v8794_v44  ;;  %v1660_v56 = vmul.f32 %v6893_v60, %v458_v29  ;;  %v1668_v4 = vmul.f32 %v6933_v2, %v466_v54  ;;  %v8805_v2 = vld [vmem:[#allocation32_spill] sm:$0xff] }
 0x173   : > { %5895 = vmatmul.mubr.msk.f32.gmra.mrb[126].mxu0 %vm838_vm0, %v1639_v52  ;;  %v1656_v26 = vmul.f32 %v6873_v62, %v454_v25  ;;  %v1657_v62 = vmul.f32 %v6879_v12, %v455_v30  ;;  %v8793_v52 = vld [vmem:[#allocation26_spill] sm:$0xff]  ;;  %5757 = vmatprep.mubr.msk.bf16.mxu1 %vm838_vm0, %v8795_v23  ;;  %v8804_v25 = vld [vmem:[#allocation31_spill] sm:$0xff]  ;;  %v6261_v44 = vld [vmem:[%s6438_s14 + $0x188] sm:$0xff]  }
 0x174   : > { %5897 = vmatprep.mubr.msk.f32.mxu0 %vm838_vm0, %v1640_v55  ;;  %v457_v55 = vunpack.c.h.bf16 %v6253_v10  ;;  %v1658_v59 = vmul.f32 %v8793_v52, %v456_v7  ;;  %v6260_v30 = vld [vmem:[%s6438_s14 + $0x180] sm:$0xff]  }
 0x175   : > { %v470_v10 = vunpack.c.l.bf16 %v6260_v30  ;;  %v471_v52 = vunpack.c.h.bf16 %v6260_v30  ;;  %v8816_v30 = vld [vmem:[#allocation17_spill] sm:$0xff] }
 0x176   : > { %v1659_v13 = vmul.f32 %v8796_v48, %v457_v55  ;;  %v8806_v55 = vld [vmem:[#allocation33_spill] sm:$0xff] }
 0x177   : > { %5898 = vmatmul.mubr.msk.f32.gmra.mrb[128].mxu0 %vm838_vm0, %v1641_v0  ;;  %v459_v0 = vunpack.c.h.bf16 %v6254_v37  ;;  %v1672_v23 = vmul.f32 %v6953_v6, %v470_v10  ;;  %v8809_v6 = vld [vmem:[#allocation34_spill] sm:$0xff] }
 0x178   : > { %5900 = vmatprep.mubr.msk.f32.mxu0 %vm838_vm0, %v1642_v40  ;;  %v6255_v40 = vld [vmem:[%s6438_s14 + $0x158] sm:$0xff]  }
 0x179   : > { %v460_v12 = vunpack.c.l.bf16 %v6255_v40  ;;  %v461_v46 = vunpack.c.h.bf16 %v6255_v40  ;;  %v1661_v60 = vmul.f32 %v6899_v16, %v459_v0 }
 0x17a   : > { %5758 = vmatmul.mubr.msk.bf16.gmra.mrb[156].mxu1 %vm838_vm0, %v8798_v57 }
 0x17b   : > { %5901 = vmatmul.mubr.msk.f32.gmra.mrb[130].mxu0 %vm838_vm0, %v1643_v50  ;;  %v1662_v61 = vmul.f32 %v8797_v47, %v460_v12  ;;  %5761 = vmatprep.mubr.msk.bf16.mxu1 %vm838_vm0, %v8799_v8  ;;  %v473_v12 = vunpack.c.h.bf16 %v6261_v44  ;;  %v8810_v8 = vld [vmem:[#allocation35_spill] sm:$0xff] }
 0x17c   : > { %5903 = vmatprep.mubr.msk.f32.mxu0 %vm838_vm0, %v1644_v14  ;;  %v6256_v14 = vld [vmem:[%s6438_s14 + $0x160] sm:$0xff]  }
 0x17d   : > { %v462_v50 = vunpack.c.l.bf16 %v6256_v14 }
 0x17f   : > { %5904 = vmatmul.mubr.msk.f32.gmra.mrb[132].mxu0 %vm838_vm0, %v1645_v42  ;;  %v1664_v17 = vmul.f32 %v6913_v5, %v462_v50  ;;  %v8800_v42 = vld [vmem:[#allocation29_spill] sm:$0xff] }
 0x180   : > { %5906 = vmatprep.mubr.msk.f32.mxu0 %vm838_vm0, %v1646_v53  ;;  %v1663_v53 = vmul.f32 %v8800_v42, %v461_v46  ;;  %v1675_v42 = vmul.f32 %v8810_v8, %v473_v12  ;;  %v8818_v12 = vld [vmem:[#allocation18_spill] sm:$0xff] }
 0x183   : > { %5907 = vmatmul.mubr.msk.f32.gmra.mrb[134].mxu0 %vm838_vm0, %v1647_v58  ;;  %v6257_v58 = vld [vmem:[%s6438_s14 + $0x168] sm:$0xff]  }
 0x184   : > { %5909 = vmatprep.mubr.msk.f32.mxu0 %vm838_vm0, %v1648_v18  ;;  %v463_v18 = vunpack.c.h.bf16 %v6256_v14  ;;  %v464_v16 = vunpack.c.l.bf16 %v6257_v58  ;;  %v465_v5 = vunpack.c.h.bf16 %v6257_v58  ;;  %v1673_v14 = vmul.f32 %v6959_v28, %v471_v52  ;;  %v6263_v58 = vld [vmem:[%s6438_s14 + $0x198] sm:$0xff]   ;;  %v6266_v52 = vld [vmem:[%s6438_s14 + $0x1b0] sm:$0xff]  }
 0x186   : > { %v1665_v45 = vmul.f32 %v6919_v20, %v463_v18  ;;  %v1666_v3 = vmul.f32 %v8801_v21, %v464_v16  ;;  %v1667_v31 = vmul.f32 %v8804_v25, %v465_v5  ;;  %v8811_v18 = vld [vmem:[#allocation14_spill] sm:$0xff]  ;;  %v476_v16 = vunpack.c.l.bf16 %v6263_v58  ;;  %v8812_v5 = vld [vmem:[#allocation15_spill] sm:$0xff]  ;;  %v8814_v25 = vld [vmem:[#allocation37_spill] sm:$0xff] }
 0x187   : > { %5910 = vmatmul.mubr.msk.f32.gmra.mrb[136].mxu0 %vm838_vm0, %v1649_v38  ;;  %v7149_v38 = vpop.f32.mrb[45].mxu1  ;;  %v477_v21 = vunpack.c.h.bf16 %v6263_v58  ;;  %v6268_v58 = vld [vmem:[%s6438_s14 + $0x1c0] sm:$0xff]  }
 0x188   : > { %5912 = vmatprep.mubr.msk.f32.mxu0 %vm838_vm0, %v1650_v19  ;;  %v467_v19 = vunpack.c.h.bf16 %v6258_v43 }
 0x18a   : > { %v1669_v63 = vmul.f32 %v6939_v24, %v467_v19 }
 0x18b   : > { %5913 = vmatmul.mubr.msk.f32.gmra.mrb[138].mxu0 %vm838_vm0, %v1651_v1  ;;  %v8802_v1 = vld [vmem:[#allocation10_spill] sm:$0xff] }
 0x18c   : > { %5915 = vmatprep.mubr.msk.f32.mxu0 %vm838_vm0, %v1652_v22  ;;  %v7152_v22 = vpop.f32.mrb[46].mxu1  ;;  %5762 = vmatmul.mubr.msk.bf16.gmra.mrb[160].mxu1 %vm838_vm0, %v8802_v1  ;;  %v8813_v1 = vld [vmem:[#allocation36_spill] sm:$0xff] }
 0x18d   : > { %v7159_v20 = vpop.f32.mrb[47].mxu1  ;;  %5765 = vmatprep.mubr.msk.bf16.mxu1 %vm838_vm0, %v8803_v41 }
 0x18f   : > { %5916 = vmatmul.mubr.msk.f32.gmra.mrb[140].mxu0 %vm838_vm0, %v1653_v34  ;;  %v7164_v34 = vpop.f32.mrb[48].mxu1 }
 0x190   : > { %5918 = vmatprep.mubr.msk.f32.mxu0 %vm838_vm0, %v1654_v27  ;;  %v7166_v27 = vpop.f32.mrb[49].mxu1 }
 0x191   : > { %v7170_v9 = vpop.f32.mrb[50].mxu1 }
 0x192   : > { %v7175_v7 = vpop.f32.mrb[51].mxu1 }
 0x193   : > { %5919 = vmatmul.mubr.msk.f32.gmra.mrb[142].mxu0 %vm838_vm0, %v1655_v51  ;;  %v1670_v51 = vmul.f32 %v8805_v2, %v468_v35  ;;  %v7177_v37 = vpop.f32.mrb[52].mxu1 }
 0x194   : > { %5921 = vmatprep.mubr.msk.f32.mxu0 %vm838_vm0, %v1656_v26  ;;  %v469_v26 = vunpack.c.h.bf16 %v6259_v39  ;;  %v7179_v29 = vpop.f32.mrb[53].mxu1  ;;  %v1678_v39 = vmul.f32 %v8813_v1, %v476_v16  ;;  %v486_v16 = vunpack.c.l.bf16 %v6268_v58  ;;  %v487_v1 = vunpack.c.h.bf16 %v6268_v58 }
 0x195   : > { %v7183_v24 = vpop.f32.mrb[54].mxu1 }
 0x196   : > { %v7190_v48 = vpop.f32.mrb[55].mxu1 }
 0x197   : > { %5922 = vmatmul.mubr.msk.f32.gmra.mrb[144].mxu0 %vm838_vm0, %v1657_v62  ;;  %v1671_v62 = vmul.f32 %v8806_v55, %v469_v26  ;;  %v7194_v0 = vpop.f32.mrb[56].mxu1 }
 0x198   : > { %5924 = vmatprep.mubr.msk.f32.mxu0 %vm838_vm0, %v1658_v59  ;;  %v8807_v59 = vld [vmem:[#allocation12_spill] sm:$0xff]  ;;  %v7196_v40 = vpop.f32.mrb[57].mxu1 }
 0x199   : > { %5766 = vmatmul.mubr.msk.bf16.gmra.mrb[164].mxu1 %vm838_vm0, %v8807_v59  ;;  %v7200_v50 = vpop.f32.mrb[58].mxu1  ;;  %v482_v59 = vunpack.c.l.bf16 %v6266_v52 }
 0x19b   : > { %5925 = vmatmul.mubr.msk.f32.gmra.mrb[146].mxu0 %vm838_vm0, %v1659_v13  ;;  %v8808_v13 = vld [vmem:[#allocation13_spill] sm:$0xff] }
 0x19c   : > { %5927 = vmatprep.mubr.msk.f32.mxu0 %vm838_vm0, %v1660_v56  ;;  %v472_v56 = vunpack.c.l.bf16 %v6261_v44  ;;  %5769 = vmatprep.mubr.msk.bf16.mxu1 %vm838_vm0, %v8808_v13 }
 0x19e   : > { %v1674_v46 = vmul.f32 %v8809_v6, %v472_v56  ;;  %v8817_v56 = vld [vmem:[#allocation38_spill] sm:$0xff]  ;;  %v8819_v6 = vld [vmem:[#allocation19_spill] sm:$0xff] }
 0x19f   : > { %5928 = vmatmul.mubr.msk.f32.gmra.mrb[148].mxu0 %vm838_vm0, %v1661_v60  ;;  %v6262_v60 = vld [vmem:[%s6438_s14 + $0x190] sm:$0xff]  }
 0x1a0   : > { %5930 = vmatprep.mubr.msk.f32.mxu0 %vm838_vm0, %v1662_v61  ;;  %v474_v47 = vunpack.c.l.bf16 %v6262_v60  ;;  %v7205_v61 = vpop.f32.mrb[59].mxu1 }
 0x1a1   : > { %v7207_v57 = vpop.f32.mrb[60].mxu1  ;;  %5770 = vmatmul.mubr.msk.bf16.gmra.mrb[168].mxu1 %vm838_vm0, %v8811_v18 }
 0x1a2   : > { %v1676_v43 = vmul.f32 %v6973_v11, %v474_v47  ;;  %5773 = vmatprep.mubr.msk.bf16.mxu1 %vm838_vm0, %v8812_v5  ;;  %v6264_v11 = vld [vmem:[%s6438_s14 + $0x1a0] sm:$0xff]  }
 0x1a3   : > { %5931 = vmatmul.mubr.msk.f32.gmra.mrb[150].mxu0 %vm838_vm0, %v1663_v53  ;;  %v475_v53 = vunpack.c.h.bf16 %v6262_v60  ;;  %v478_v35 = vunpack.c.l.bf16 %v6264_v11  ;;  %v479_v26 = vunpack.c.h.bf16 %v6264_v11  ;;  %v6269_v11 = vld [vmem:[%s6438_s14 + $0x1c8] sm:$0xff]  }
 0x1a4   : > { %5933 = vmatprep.mubr.msk.f32.mxu0 %vm838_vm0, %v1664_v17  ;;  %v7209_v17 = vpop.f32.mrb[61].mxu1 }
 0x1a5   : > { %v7213_v28 = vpop.f32.mrb[62].mxu1  ;;  %v1681_v55 = vmul.f32 %v6999_v36, %v479_v26  ;;  %v483_v36 = vunpack.c.h.bf16 %v6266_v52 }
 0x1a6   : > { %v7220_v54 = vpop.f32.mrb[63].mxu1 }
 0x1a7   : > { %5934 = vmatmul.mubr.msk.f32.gmra.mrb[152].mxu0 %vm838_vm0, %v1665_v45  ;;  %v7224_v45 = vpop.f32.mrb[64].mxu1 }
 0x1a8   : > { %5936 = vmatprep.mubr.msk.f32.mxu0 %vm838_vm0, %v1666_v3  ;;  %v1677_v3 = vmul.f32 %v6979_v32, %v475_v53  ;;  %v7228_v19 = vpop.f32.mrb[65].mxu1  ;;  %v6265_v32 = vld [vmem:[%s6438_s14 + $0x1a8] sm:$0xff]   ;;  %v1685_v53 = vmul.f32 %v7159_v20, %v483_v36 }
 0x1a9   : > { %v480_v2 = vunpack.c.l.bf16 %v6265_v32  ;;  %v481_v10 = vunpack.c.h.bf16 %v6265_v32  ;;  %v1689_v32 = vmul.f32 %v7175_v7, %v487_v1 }
 0x1ab   : > { %5937 = vmatmul.mubr.msk.f32.gmra.mrb[154].mxu0 %vm838_vm0, %v1667_v31  ;;  %v1679_v31 = vmul.f32 %v8814_v25, %v477_v21  ;;  %v1688_v25 = vmul.f32 %v7166_v27, %v486_v16 }
 0x1ac   : > { %5939 = vmatprep.mubr.msk.f32.mxu0 %vm838_vm0, %v1668_v4  ;;  %v7233_v4 = vpop.f32.mrb[66].mxu1 }
 0x1ad   : > { %v7235_v41 = vpop.f32.mrb[67].mxu1 }
 0x1ae   : > { %v7251_v44 = vpop.f32.mrb[68].mxu1 }
 0x1af   : > { %5940 = vmatmul.mubr.msk.f32.gmra.mrb[156].mxu0 %vm838_vm0, %v1669_v63  ;;  %v8815_v63 = vld [vmem:[#allocation16_spill] sm:$0xff] }
 0x1b0   : > { %5942 = vmatprep.mubr.msk.f32.mxu0 %vm838_vm0, %v1670_v51  ;;  %5774 = vmatmul.mubr.msk.bf16.gmra.mrb[172].mxu1 %vm838_vm0, %v8815_v63  ;;  %v1680_v51 = vmul.f32 %v6993_v15, %v478_v35  ;;  %v7253_v15 = vpop.f32.mrb[69].mxu1  ;;  %v488_v35 = vunpack.c.l.bf16 %v6269_v11  ;;  %v489_v63 = vunpack.c.h.bf16 %v6269_v11 }
 0x1b1   : > { %5777 = vmatprep.mubr.msk.bf16.mxu1 %vm838_vm0, %v8816_v30  ;;  %v7257_v13 = vpop.f32.mrb[70].mxu1 }
 0x1b2   : > { %v1690_v27 = vmul.f32 %v7164_v34, %v488_v35  ;;  %v1691_v7 = vmul.f32 %v7170_v9, %v489_v63 }
 0x1b3   : > { %5943 = vmatmul.mubr.msk.f32.gmra.mrb[158].mxu0 %vm838_vm0, %v1671_v62  ;;  %v1682_v62 = vmul.f32 %v6991_v33, %v480_v2  ;;  %v1684_v33 = vmul.f32 %v7149_v38, %v482_v59 }
 0x1b4   : > { %5945 = vmatprep.mubr.msk.f32.mxu0 %vm838_vm0, %v1672_v23  ;;  %v1683_v23 = vmul.f32 %v8817_v56, %v481_v10  ;;  %v6271_v56 = vld [vmem:[%s6438_s14 + $0x1d8] sm:$0xff]  }
 0x1b7   : > { %5946 = vmatmul.mubr.msk.f32.gmra.mrb[160].mxu0 %vm838_vm0, %v1673_v14  ;;  %v7263_v14 = vpop.f32.mrb[71].mxu1 }
 0x1b8   : > { %5948 = vmatprep.mubr.msk.f32.mxu0 %vm838_vm0, %v1674_v46  ;;  %5778 = vmatmul.mubr.msk.bf16.gmra.mrb[176].mxu1 %vm838_vm0, %v8818_v12  ;;  %v6267_v46 = vld [vmem:[%s6438_s14 + $0x1b8] sm:$0xff]   ;;  %v7272_v38 = vpop.f32.mrb[72].mxu1 }
 0x1b9   : > { %5781 = vmatprep.mubr.msk.bf16.mxu1 %vm838_vm0, %v8819_v6  ;;  %v484_v60 = vunpack.c.l.bf16 %v6267_v46  ;;  %v7276_v5 = vpop.f32.mrb[73].mxu1  ;;  %v8823_v6 = vld [vmem:[#allocation23_spill] sm:$0xff] }
 0x1bb   : > { %5949 = vmatmul.mubr.msk.f32.gmra.mrb[162].mxu0 %vm838_vm0, %v1675_v42  ;;  %v485_v42 = vunpack.c.h.bf16 %v6267_v46  ;;  %v1686_v18 = vmul.f32 %v7145_v49, %v484_v60  ;;  %v8820_v49 = vld [vmem:[#allocation20_spill] sm:$0xff]  ;;  %v493_v46 = vunpack.c.h.bf16 %v6271_v56 }
 0x1bc   : > { %5951 = vmatprep.mubr.msk.f32.mxu0 %vm838_vm0, %v1676_v43 }
 0x1bd   : > { %v1687_v20 = vmul.f32 %v7152_v22, %v485_v42 }
 0x1bf   : > { %5952 = vmatmul.mubr.msk.f32.gmra.mrb[164].mxu0 %vm838_vm0, %v1677_v3  ;;  %v7280_v3 = vpop.f32.mrb[74].mxu1 }
 0x1c0   : > { %5954 = vmatprep.mubr.msk.f32.mxu0 %vm838_vm0, %v1678_v39  ;;  %v7284_v39 = vpop.f32.mrb[75].mxu1  ;;  %5782 = vmatmul.mubr.msk.bf16.gmra.mrb[180].mxu1 %vm838_vm0, %v8820_v49  ;;  %v8824_v49 = vld [vmem:[#allocation24_spill] sm:$0xff] }
 0x1c1   : > { %v7297_v2 = vpop.f32.mrb[76].mxu1 }
 0x1c3   : > { %5955 = vmatmul.mubr.msk.f32.gmra.mrb[166].mxu0 %vm838_vm0, %v1679_v31  ;;  %v8821_v31 = vld [vmem:[#allocation21_spill] sm:$0xff] }
 0x1c4   : > { %5957 = vmatprep.mubr.msk.f32.mxu0 %vm838_vm0, %v1680_v51  ;;  %5785 = vmatprep.mubr.msk.bf16.mxu1 %vm838_vm0, %v8821_v31  ;;  %v6270_v51 = vld [vmem:[%s6438_s14 + $0x1d0] sm:$0xff]  }
 0x1c5   : > { %v490_v30 = vunpack.c.l.bf16 %v6270_v51  ;;  %v491_v59 = vunpack.c.h.bf16 %v6270_v51 }
 0x1c7   : > { %5958 = vmatmul.mubr.msk.f32.gmra.mrb[168].mxu0 %vm838_vm0, %v1681_v55  ;;  %v7302_v55 = vpop.f32.mrb[77].mxu1  ;;  %v1692_v12 = vmul.f32 %v7179_v29, %v490_v30  ;;  %v1693_v60 = vmul.f32 %v7190_v48, %v491_v59  ;;  %v1695_v48 = vmul.f32 %v7183_v24, %v493_v46 }
 0x1c8   : > { %5960 = vmatprep.mubr.msk.f32.mxu0 %vm838_vm0, %v1682_v62  ;;  %v7305_v52 = vpop.f32.mrb[78].mxu1 }
 0x1c9   : > { %v7310_v34 = vpop.f32.mrb[79].mxu1 }
 0x1ca   : > { %v5803_v47 = vpop.f32.mrb[64].mxu0  ;;  %v7323_v29 = vpop.f32.mrb[80].mxu1 }
 0x1cb   : > { %3484 = vrot.lane.b32.xlu0 %v5803_v47, %s6341_s25  ;;  %v2715_v8 = vpop.f32.mrb[65].mxu0  ;;  %5961 = vmatmul.mubr.msk.f32.gmra.mrb[170].mxu0 %vm838_vm0, %v1683_v23  ;;  %v492_v23 = vunpack.c.l.bf16 %v6271_v56 }
 0x1cc   : > { %5963 = vmatprep.mubr.msk.f32.mxu0 %vm838_vm0, %v1684_v33  ;;  %v8822_v33 = vld [vmem:[#allocation22_spill] sm:$0xff] }
 0x1cd   : > { %5786 = vmatmul.mubr.msk.bf16.gmra.mrb[184].mxu1 %vm838_vm0, %v8822_v33  ;;  %v1694_v47 = vmul.f32 %v7177_v37, %v492_v23 }
 0x1ce   : > { %v5806_v43 = vpop.f32.mrb[66].mxu0  ;;  %5789 = vmatprep.mubr.msk.bf16.mxu1 %vm838_vm0, %v8823_v6 }
 0x1cf   : > { %3482 = vrot.lane.b32.xlu0 %v2715_v8, %s6341_s25  ;;  %3488 = vrot.lane.b32.xlu1 %v5806_v43, %s6341_s25  ;;  %v2725_v21 = vpop.f32.mrb[67].mxu0  ;;  %v6272_v8 = vld [vmem:[%s6438_s14 + $0x1e0] sm:$0xff]  }
 0x1d0   : > { %5964 = vmatmul.mubr.msk.f32.gmra.mrb[172].mxu0 %vm838_vm0, %v1685_v53  ;;  %v494_v42 = vunpack.c.l.bf16 %v6272_v8  ;;  %v495_v43 = vunpack.c.h.bf16 %v6272_v8 }
 0x1d1   : > { %5966 = vmatprep.mubr.msk.f32.mxu0 %vm838_vm0, %v1686_v18  ;;  %v7328_v18 = vpop.f32.mrb[81].mxu1 }
 0x1d2   : > { %v5809_v26 = vpop.f32.mrb[68].mxu0  ;;  %v7331_v16 = vpop.f32.mrb[82].mxu1  ;;  %v1696_v1 = vmul.f32 %v7196_v40, %v494_v42 }
 0x1d3   : > { %3486 = vrot.lane.b32.xlu1 %v2725_v21, %s6341_s25  ;;  %v2735_v22 = vpop.f32.mrb[69].mxu0  ;;  %v7336_v37 = vpop.f32.mrb[83].mxu1  ;;  %v6273_v21 = vld [vmem:[%s6438_s14 + $0x1e8] sm:$0xff]  }
 0x1d4   : > { %3490 = vrot.lane.b32.xlu0 %v2735_v22, %s6341_s25  ;;  %5967 = vmatmul.mubr.msk.f32.gmra.mrb[174].mxu0 %vm838_vm0, %v1687_v20  ;;  %v496_v20 = vunpack.c.l.bf16 %v6273_v21  ;;  %v497_v24 = vunpack.c.h.bf16 %v6273_v21  ;;  %v7347_v31 = vpop.f32.mrb[84].mxu1 }
 0x1d5   : > { %5969 = vmatprep.mubr.msk.f32.mxu0 %vm838_vm0, %v1688_v25  ;;  %5790 = vmatmul.mubr.msk.bf16.gmra.mrb[188].mxu1 %vm838_vm0, %v8824_v49  ;;  %v1697_v25 = vmul.f32 %v7205_v61, %v495_v43  ;;  %8825 = vst [vmem:[#allocation5_spill] sm:$0xff] %v7347_v31 }
 0x1d6   : > { %v5812_v10 = vpop.f32.mrb[70].mxu0  ;;  %v1698_v40 = vmul.f32 %v7194_v0, %v496_v20  ;;  %v1699_v61 = vmul.f32 %v7200_v50, %v497_v24 }
 0x1d7   : > { %3492 = vrot.lane.b32.xlu1 %v5809_v26, %s6341_s25  ;;  %v2745_v62 = vpop.f32.mrb[71].mxu0  ;;  %v6274_v26 = vld [vmem:[%s6438_s14 + $0x1f0] sm:$0xff]  }
 0x1d8   : > { %3494 = vrot.lane.b32.xlu0 %v2745_v62, %s6341_s25  ;;  %5970 = vmatmul.mubr.msk.f32.gmra.mrb[176].mxu0 %vm838_vm0, %v1689_v32  ;;  %v498_v22 = vunpack.c.l.bf16 %v6274_v26  ;;  %v7352_v32 = vpop.f32.mrb[85].mxu1  ;;  %v499_v30 = vunpack.c.h.bf16 %v6274_v26 }
 0x1d9   : > { %5972 = vmatprep.mubr.msk.f32.mxu0 %vm838_vm0, %v1690_v27  ;;  %v7355_v51 = vpop.f32.mrb[86].mxu1 }
 0x1da   : > { %v5815_v36 = vpop.f32.mrb[72].mxu0  ;;  %8826 = vst [vmem:[#allocation25_spill] sm:$0xff] %v7355_v51  ;;  %v7360_v0 = vpop.f32.mrb[87].mxu1  ;;  %v1701_v50 = vmul.f32 %v7220_v54, %v499_v30 }
 0x1db   : > { %3496 = vrot.lane.b32.xlu1 %v5812_v10, %s6341_s25  ;;  %v2755_v9 = vpop.f32.mrb[73].mxu0  ;;  %8827 = vst [vmem:[#allocation26_spill] sm:$0xff] %v7360_v0  ;;  %v6275_v10 = vld [vmem:[%s6438_s14 + $0x1f8] sm:$0xff]  }
 0x1dc   : > { %3498 = vrot.lane.b32.xlu0 %v2755_v9, %s6341_s25  ;;  %5973 = vmatmul.mubr.msk.f32.gmra.mrb[178].mxu0 %vm838_vm0, %v1691_v7  ;;  %v500_v62 = vunpack.c.l.bf16 %v6275_v10  ;;  %v1700_v7 = vmul.f32 %v7209_v17, %v498_v22  ;;  %v501_v23 = vunpack.c.h.bf16 %v6275_v10 }
 0x1dd   : > { %5975 = vmatprep.mubr.msk.f32.mxu0 %vm838_vm0, %v1692_v12  ;;  %v7369_v12 = vpop.f32.mrb[88].mxu1 }
 0x1de   : > { %v5818_v53 = vpop.f32.mrb[74].mxu0  ;;  %8828 = vst [vmem:[#allocation6_spill] sm:$0xff] %v7369_v12  ;;  %v1702_v33 = vmul.f32 %v7207_v57, %v500_v62  ;;  %v1703_v54 = vmul.f32 %v7213_v28, %v501_v23 }
 0x1df   : > { %3500 = vrot.lane.b32.xlu1 %v5815_v36, %s6341_s25  ;;  %v2765_v58 = vpop.f32.mrb[75].mxu0  ;;  %v7373_v36 = vpop.f32.mrb[89].mxu1 }
 0x1e0   : > { %3502 = vrot.lane.b32.xlu0 %v2765_v58, %s6341_s25  ;;  %5976 = vmatmul.mubr.msk.f32.gmra.mrb[180].mxu0 %vm838_vm0, %v1693_v60  ;;  %8829 = vst [vmem:[#allocation7_spill] sm:$0xff] %v7373_v36  ;;  %v7376_v9 = vpop.f32.mrb[90].mxu1 }
 0x1e1   : > { %5978 = vmatprep.mubr.msk.f32.mxu0 %vm838_vm0, %v1694_v47  ;;  %8830 = vst [vmem:[#allocation27_spill] sm:$0xff] %v7376_v9  ;;  %v7380_v46 = vpop.f32.mrb[91].mxu1 }
 0x1e2   : > { %v5821_v11 = vpop.f32.mrb[76].mxu0  ;;  %8831 = vst [vmem:[#allocation28_spill] sm:$0xff] %v7380_v46  ;;  %v7386_v47 = vpop.f32.mrb[92].mxu1 }
 0x1e3   : > { %3504 = vrot.lane.b32.xlu1 %v5818_v53, %s6341_s25  ;;  %v2775_v35 = vpop.f32.mrb[77].mxu0  ;;  %8832 = vst [vmem:[#allocation8_spill] sm:$0xff] %v7386_v47  ;;  %v7389_v42 = vpop.f32.mrb[93].mxu1 }
 0x1e4   : > { %3506 = vrot.lane.b32.xlu0 %v2775_v35, %s6341_s25  ;;  %5979 = vmatmul.mubr.msk.f32.gmra.mrb[182].mxu0 %vm838_vm0, %v1695_v48  ;;  %8833 = vst [vmem:[#allocation9_spill] sm:$0xff] %v7389_v42  ;;  %v7392_v53 = vpop.f32.mrb[94].mxu1 }
 0x1e5   : > { %5981 = vmatprep.mubr.msk.f32.mxu0 %vm838_vm0, %v1696_v1  ;;  %8834 = vst [vmem:[#allocation29_spill] sm:$0xff] %v7392_v53  ;;  %v7395_v58 = vpop.f32.mrb[95].mxu1 }
 0x1e6   : > { %v5824_v63 = vpop.f32.mrb[78].mxu0  ;;  %8835 = vst [vmem:[#allocation30_spill] sm:$0xff] %v7395_v58  ;;  %v7399_v21 = vpop.f32.mrb[96].mxu1 }
 0x1e7   : > { %3508 = vrot.lane.b32.xlu1 %v5821_v11, %s6341_s25  ;;  %v2785_v27 = vpop.f32.mrb[79].mxu0  ;;  %8836 = vst [vmem:[#allocation10_spill] sm:$0xff] %v7399_v21  ;;  %v7401_v1 = vpop.f32.mrb[97].mxu1 }
 0x1e8   : > { %3510 = vrot.lane.b32.xlu0 %v2785_v27, %s6341_s25  ;;  %5982 = vmatmul.mubr.msk.f32.gmra.mrb[184].mxu0 %vm838_vm0, %v1697_v25  ;;  %8837 = vst [vmem:[#allocation11_spill] sm:$0xff] %v7401_v1  ;;  %v7405_v11 = vpop.f32.mrb[98].mxu1 }
 0x1e9   : > { %5984 = vmatprep.mubr.msk.f32.mxu0 %vm838_vm0, %v1698_v40  ;;  %8838 = vst [vmem:[#allocation31_spill] sm:$0xff] %v7405_v11  ;;  %v7407_v35 = vpop.f32.mrb[99].mxu1 }
 0x1ea   : > { %v5827_v59 = vpop.f32.mrb[80].mxu0  ;;  %8839 = vst [vmem:[#allocation32_spill] sm:$0xff] %v7407_v35  ;;  %v7411_v40 = vpop.f32.mrb[100].mxu1 }
 0x1eb   : > { %3512 = vrot.lane.b32.xlu1 %v5824_v63, %s6341_s25  ;;  %v2795_v56 = vpop.f32.mrb[81].mxu0  ;;  %8840 = vst [vmem:[#allocation33_spill] sm:$0xff] %v7411_v40  ;;  %v7413_v22 = vpop.f32.mrb[101].mxu1 }
 0x1ec   : > { %3514 = vrot.lane.b32.xlu0 %v2795_v56, %s6341_s25  ;;  %5985 = vmatmul.mubr.msk.f32.gmra.mrb[186].mxu0 %vm838_vm0, %v1699_v61  ;;  %8841 = vst [vmem:[#allocation12_spill] sm:$0xff] %v7413_v22  ;;  %v7417_v27 = vpop.f32.mrb[102].mxu1 }
 0x1ed   : > { %5987 = vmatprep.mubr.msk.f32.mxu0 %vm838_vm0, %v1700_v7  ;;  %8842 = vst [vmem:[#allocation13_spill] sm:$0xff] %v7417_v27  ;;  %v7419_v61 = vpop.f32.mrb[103].mxu1 }
 0x1ee   : > { %v5830_v17 = vpop.f32.mrb[82].mxu0  ;;  %8843 = vst [vmem:[#allocation34_spill] sm:$0xff] %v7419_v61  ;;  %v7423_v62 = vpop.f32.mrb[104].mxu1 }
 0x1ef   : > { %3516 = vrot.lane.b32.xlu1 %v5827_v59, %s6341_s25  ;;  %v2805_v6 = vpop.f32.mrb[83].mxu0  ;;  %8844 = vst [vmem:[#allocation35_spill] sm:$0xff] %v7423_v62  ;;  %v7425_v59 = vpop.f32.mrb[105].mxu1 }
 0x1f0   : > { %3518 = vrot.lane.b32.xlu0 %v2805_v6, %s6341_s25  ;;  %5988 = vmatmul.mubr.msk.f32.gmra.mrb[188].mxu0 %vm838_vm0, %v1701_v50  ;;  %8845 = vst [vmem:[#allocation14_spill] sm:$0xff] %v7425_v59  ;;  %v7429_v23 = vpop.f32.mrb[106].mxu1 }
 0x1f1   : > { %5990 = vmatprep.mubr.msk.f32.mxu0 %vm838_vm0, %v1702_v33  ;;  %8846 = vst [vmem:[#allocation15_spill] sm:$0xff] %v7429_v23  ;;  %v7431_v50 = vpop.f32.mrb[107].mxu1 }
 0x1f2   : > { %v5833_v57 = vpop.f32.mrb[84].mxu0  ;;  %8847 = vst [vmem:[#allocation36_spill] sm:$0xff] %v7431_v50  ;;  %v7435_v6 = vpop.f32.mrb[108].mxu1 }
 0x1f3   : > { %3520 = vrot.lane.b32.xlu1 %v5830_v17, %s6341_s25  ;;  %v2815_v60 = vpop.f32.mrb[85].mxu0  ;;  %8848 = vst [vmem:[#allocation37_spill] sm:$0xff] %v7435_v6 }
 0x1f4   : > { %3522 = vrot.lane.b32.xlu0 %v2815_v60, %s6341_s25  ;;  %5991 = vmatmul.mubr.msk.f32.gmra.mrb[190].mxu0 %vm838_vm0, %v1703_v54 }
 0x1f6   : > { %v5836_v8 = vpop.f32.mrb[86].mxu0 }
 0x1f7   : > { %3524 = vrot.lane.b32.xlu1 %v5833_v57, %s6341_s25  ;;  %v2825_v28 = vpop.f32.mrb[87].mxu0  ;;  %v7437_v57 = vpop.f32.mrb[109].mxu1 }
 0x1f8   : > { %3526 = vrot.lane.b32.xlu0 %v2825_v28, %s6341_s25  ;;  %8849 = vst [vmem:[#allocation16_spill] sm:$0xff] %v7437_v57 }
 0x1fa   : > { %v5839_v48 = vpop.f32.mrb[88].mxu0 }
 0x1fb   : > { %3528 = vrot.lane.b32.xlu1 %v5836_v8, %s6341_s25  ;;  %v2835_v43 = vpop.f32.mrb[89].mxu0  ;;  %v7441_v8 = vpop.f32.mrb[110].mxu1 }
 0x1fc   : > { %3530 = vrot.lane.b32.xlu0 %v2835_v43, %s6341_s25  ;;  %8850 = vst [vmem:[#allocation17_spill] sm:$0xff] %v7441_v8  ;;  %v7443_v28 = vpop.f32.mrb[111].mxu1 }
 0x1fd   : > { %8851 = vst [vmem:[#allocation38_spill] sm:$0xff] %v7443_v28 }
 0x1fe   : > { %v5842_v20 = vpop.f32.mrb[90].mxu0 }
 0x1ff   : > { %3532 = vrot.lane.b32.xlu1 %v5839_v48, %s6341_s25  ;;  %v2845_v49 = vpop.f32.mrb[91].mxu0 }
 0x200   : > { %3534 = vrot.lane.b32.xlu0 %v2845_v49, %s6341_s25 }
 0x202   : > { %v5845_v24 = vpop.f32.mrb[92].mxu0 }
 0x203   : > { %3536 = vrot.lane.b32.xlu1 %v5842_v20, %s6341_s25  ;;  %v2855_v25 = vpop.f32.mrb[93].mxu0  ;;  %v7447_v20 = vpop.f32.mrb[112].mxu1 }
 0x204   : > { %3538 = vrot.lane.b32.xlu0 %v2855_v25, %s6341_s25  ;;  %8852 = vst [vmem:[#allocation18_spill] sm:$0xff] %v7447_v20 }
 0x206   : > { %v5848_v26 = vpop.f32.mrb[94].mxu0 }
 0x207   : > { %3540 = vrot.lane.b32.xlu1 %v5845_v24, %s6341_s25  ;;  %v2865_v63 = vpop.f32.mrb[95].mxu0  ;;  %v7449_v24 = vpop.f32.mrb[113].mxu1 }
 0x208   : > { %3542 = vrot.lane.b32.xlu0 %v2865_v63, %s6341_s25  ;;  %8853 = vst [vmem:[#allocation19_spill] sm:$0xff] %v7449_v24 }
 0x20a   : > { %v5851_v30 = vpop.f32.mrb[96].mxu0 }
 0x20b   : > { %3544 = vrot.lane.b32.xlu1 %v5848_v26, %s6341_s25  ;;  %v2875_v10 = vpop.f32.mrb[97].mxu0  ;;  %v7453_v26 = vpop.f32.mrb[114].mxu1 }
 0x20c   : > { %3546 = vrot.lane.b32.xlu0 %v2875_v10, %s6341_s25  ;;  %8854 = vst [vmem:[#allocation20_spill] sm:$0xff] %v7453_v26  ;;  %v7455_v63 = vpop.f32.mrb[115].mxu1 }
 0x20d   : > { %8855 = vst [vmem:[#allocation21_spill] sm:$0xff] %v7455_v63 }
 0x20e   : > { %v5854_v7 = vpop.f32.mrb[98].mxu0 }
 0x20f   : > { %3548 = vrot.lane.b32.xlu1 %v5851_v30, %s6341_s25  ;;  %v2885_v56 = vpop.f32.mrb[99].mxu0 }
 0x210   : > { %3550 = vrot.lane.b32.xlu0 %v2885_v56, %s6341_s25 }
 0x212   : > { %v5857_v33 = vpop.f32.mrb[100].mxu0 }
 0x213   : > { %3552 = vrot.lane.b32.xlu1 %v5854_v7, %s6341_s25  ;;  %v2895_v17 = vpop.f32.mrb[101].mxu0  ;;  %v7459_v7 = vpop.f32.mrb[116].mxu1 }
 0x214   : > { %3554 = vrot.lane.b32.xlu0 %v2895_v17, %s6341_s25  ;;  %8856 = vst [vmem:[#allocation22_spill] sm:$0xff] %v7459_v7 }
 0x216   : > { %v5860_v54 = vpop.f32.mrb[102].mxu0 }
 0x217   : > { %3556 = vrot.lane.b32.xlu1 %v5857_v33, %s6341_s25  ;;  %v2905_v60 = vpop.f32.mrb[103].mxu0  ;;  %v7461_v33 = vpop.f32.mrb[117].mxu1 }
 0x218   : > { %3558 = vrot.lane.b32.xlu0 %v2905_v60, %s6341_s25  ;;  %8857 = vst [vmem:[#allocation23_spill] sm:$0xff] %v7461_v33 }
 0x21a   : > { %v5863_v48 = vpop.f32.mrb[104].mxu0 }
 0x21b   : > { %3560 = vrot.lane.b32.xlu1 %v5860_v54, %s6341_s25  ;;  %v2915_v43 = vpop.f32.mrb[105].mxu0  ;;  %v7465_v54 = vpop.f32.mrb[118].mxu1 }
 0x21c   : > { %3562 = vrot.lane.b32.xlu0 %v2915_v43, %s6341_s25  ;;  %8858 = vst [vmem:[#allocation24_spill] sm:$0xff] %v7465_v54  ;;  %v7467_v60 = vpop.f32.mrb[119].mxu1 }
 0x21d   : > { %8859 = vst [vmem:[#allocation39_spill] sm:$0xff] %v7467_v60 }
 0x21e   : > { %v5866_v49 = vpop.f32.mrb[106].mxu0 }
 0x21f   : > { %3564 = vrot.lane.b32.xlu1 %v5863_v48, %s6341_s25  ;;  %v2925_v25 = vpop.f32.mrb[107].mxu0 }
 0x220   : > { %3566 = vrot.lane.b32.xlu0 %v2925_v25, %s6341_s25 }
 0x222   : > { %v5869_v30 = vpop.f32.mrb[108].mxu0 }
 0x223   : > { %3568 = vrot.lane.b32.xlu1 %v5866_v49, %s6341_s25  ;;  %v2935_v10 = vpop.f32.mrb[109].mxu0  ;;  %v7471_v49 = vpop.f32.mrb[120].mxu1 }
 0x224   : > { %3570 = vrot.lane.b32.xlu0 %v2935_v10, %s6341_s25  ;;  %8860 = vst [vmem:[#allocation40_spill] sm:$0xff] %v7471_v49  ;;  %v7473_v10 = vpop.f32.mrb[121].mxu1 }
 0x225   : > { %8861 = vst [vmem:[#allocation41_spill] sm:$0xff] %v7473_v10 }
 0x226   : > { %v5872_v56 = vpop.f32.mrb[110].mxu0 }
 0x227   : > { %3572 = vrot.lane.b32.xlu1 %v5869_v30, %s6341_s25  ;;  %v2945_v17 = vpop.f32.mrb[111].mxu0 }
 0x228   : > { %3574 = vrot.lane.b32.xlu0 %v2945_v17, %s6341_s25  ;;  %v7477_v17 = vpop.f32.mrb[122].mxu1 }
 0x229   : > { %8862 = vst [vmem:[#allocation42_spill] sm:$0xff] %v7477_v17  ;;  %v7479_v8 = vpop.f32.mrb[123].mxu1 }
 0x22a   : > { %v5875_v48 = vpop.f32.mrb[112].mxu0  ;;  %8863 = vst [vmem:[#allocation43_spill] sm:$0xff] %v7479_v8 }
 0x22b   : > { %3576 = vrot.lane.b32.xlu1 %v5872_v56, %s6341_s25  ;;  %v2955_v43 = vpop.f32.mrb[113].mxu0 }
 0x22c   : > { %3578 = vrot.lane.b32.xlu0 %v2955_v43, %s6341_s25  ;;  %v7483_v43 = vpop.f32.mrb[124].mxu1 }
 0x22d   : > { %8864 = vst [vmem:[#allocation44_spill] sm:$0xff] %v7483_v43  ;;  %v7485_v54 = vpop.f32.mrb[125].mxu1 }
 0x22e   : > { %v5878_v25 = vpop.f32.mrb[114].mxu0  ;;  %8865 = vst [vmem:[#allocation45_spill] sm:$0xff] %v7485_v54 }
 0x22f   : > { %3580 = vrot.lane.b32.xlu1 %v5875_v48, %s6341_s25  ;;  %v2965_v30 = vpop.f32.mrb[115].mxu0 }
 0x230   : > { %3582 = vrot.lane.b32.xlu0 %v2965_v30, %s6341_s25  ;;  %v7489_v30 = vpop.f32.mrb[126].mxu1 }
 0x231   : > { %8866 = vst [vmem:[#allocation46_spill] sm:$0xff] %v7489_v30  ;;  %v7491_v17 = vpop.f32.mrb[127].mxu1 }
 0x232   : > { %v5881_v6 = vpop.f32.mrb[116].mxu0  ;;  %8867 = vst [vmem:[#allocation47_spill] sm:$0xff] %v7491_v17 }
 0x233   : > { %3584 = vrot.lane.b32.xlu1 %v5878_v25, %s6341_s25  ;;  %v2975_v56 = vpop.f32.mrb[117].mxu0 }
 0x234   : > { %3586 = vrot.lane.b32.xlu0 %v2975_v56, %s6341_s25  ;;  %v7495_v56 = vpop.f32.mrb[128].mxu1 }
 0x235   : > { %v7499_v10 = vpop.f32.mrb[129].mxu1 }
 0x236   : > { %v5884_v49 = vpop.f32.mrb[118].mxu0 }
 0x237   : > { %3588 = vrot.lane.b32.xlu1 %v5881_v6, %s6341_s25  ;;  %v2985_v48 = vpop.f32.mrb[119].mxu0 }
 0x238   : > { %3590 = vrot.lane.b32.xlu0 %v2985_v48, %s6341_s25  ;;  %v7503_v48 = vpop.f32.mrb[130].mxu1 }
 0x23a   : > { %v5887_v8 = vpop.f32.mrb[120].mxu0 }
 0x23b   : > { %3592 = vrot.lane.b32.xlu1 %v5884_v49, %s6341_s25  ;;  %v2995_v25 = vpop.f32.mrb[121].mxu0 }
 0x23c   : > { %3594 = vrot.lane.b32.xlu0 %v2995_v25, %s6341_s25  ;;  %v7509_v25 = vpop.f32.mrb[131].mxu1 }
 0x23d   : > { %v7497_v43 = vpop.permute.xlu0 %3484  ;;  %v7513_v7 = vpop.f32.mrb[132].mxu1 }
 0x23e   : > { %v5890_v54 = vpop.f32.mrb[122].mxu0  ;;  %v7520_v23 = vpop.f32.mrb[133].mxu1 }
 0x23f   : > { %3596 = vrot.lane.b32.xlu1 %v5887_v8, %s6341_s25  ;;  %v3005_v6 = vpop.f32.mrb[123].mxu0  ;;  %v7523_v33 = vpop.f32.mrb[134].mxu1 }
 0x240   : > { %3598 = vrot.lane.b32.xlu0 %v3005_v6, %s6341_s25  ;;  %v7527_v62 = vpop.f32.mrb[135].mxu1 }
 0x241   : > { %v7505_v30 = vpop.permute.xlu0 %3482  ;;  %v7507_v49 = vpop.permute.xlu1 %3488 }
 0x242   : > { %v5893_v17 = vpop.f32.mrb[124].mxu0 }
 0x243   : > { %3600 = vrot.lane.b32.xlu1 %v5890_v54, %s6341_s25  ;;  %v3015_v28 = vpop.f32.mrb[125].mxu0 }
 0x244   : > { %3602 = vrot.lane.b32.xlu0 %v3015_v28, %s6341_s25 }
 0x245   : > { %v7515_v8 = vpop.permute.xlu1 %3486 }
 0x246   : > { %v7517_v57 = vpop.permute.xlu0 %3490  ;;  %v5896_v6 = vpop.f32.mrb[126].mxu0 }
 0x247   : > { %3604 = vrot.lane.b32.xlu1 %v5893_v17, %s6341_s25  ;;  %v3025_v60 = vpop.f32.mrb[127].mxu0  ;;  %v7533_v17 = vpop.f32.mrb[136].mxu1 }
 0x248   : > { %3606 = vrot.lane.b32.xlu0 %v3025_v60, %s6341_s25  ;;  %v7540_v27 = vpop.f32.mrb[137].mxu1 }
 0x249   : > { %v7525_v54 = vpop.permute.xlu1 %3492  ;;  %v7543_v24 = vpop.f32.mrb[138].mxu1 }
 0x24a   : > { %v7529_v28 = vpop.permute.xlu0 %3494  ;;  %v5899_v26 = vpop.f32.mrb[128].mxu0  ;;  %8868 = vst [vmem:[#allocation48_spill] sm:$0xff] %v7543_v24 }
 0x24b   : > { %3608 = vrot.lane.b32.xlu1 %v5896_v6, %s6341_s25  ;;  %v3035_v50 = vpop.f32.mrb[129].mxu0  ;;  %v7547_v40 = vpop.f32.mrb[139].mxu1 }
 0x24c   : > { %3610 = vrot.lane.b32.xlu0 %v3035_v50, %s6341_s25 }
 0x24d   : > { %v7535_v20 = vpop.permute.xlu1 %3496 }
 0x24e   : > { %v7537_v59 = vpop.permute.xlu0 %3498  ;;  %v5902_v60 = vpop.f32.mrb[130].mxu0 }
 0x24f   : > { %3612 = vrot.lane.b32.xlu1 %v5899_v26, %s6341_s25  ;;  %v3045_v63 = vpop.f32.mrb[131].mxu0  ;;  %v7553_v26 = vpop.f32.mrb[140].mxu1 }
 0x250   : > { %3614 = vrot.lane.b32.xlu0 %v3045_v63, %s6341_s25  ;;  %8869 = vst [vmem:[#allocation49_spill] sm:$0xff] %v7553_v26  ;;  %v7560_v1 = vpop.f32.mrb[141].mxu1 }
 0x251   : > { %v7545_v6 = vpop.permute.xlu1 %3500  ;;  %8870 = vst [vmem:[#allocation50_spill] sm:$0xff] %v7560_v1  ;;  %v7563_v53 = vpop.f32.mrb[142].mxu1 }
 0x252   : > { %v7549_v50 = vpop.permute.xlu0 %3502  ;;  %v5905_v61 = vpop.f32.mrb[132].mxu0  ;;  %8871 = vst [vmem:[#allocation51_spill] sm:$0xff] %v7563_v53 }
 0x253   : > { %3616 = vrot.lane.b32.xlu1 %v5902_v60, %s6341_s25  ;;  %v3055_v22 = vpop.f32.mrb[133].mxu0  ;;  %v7567_v47 = vpop.f32.mrb[143].mxu1 }
 0x254   : > { %3618 = vrot.lane.b32.xlu0 %v3055_v22, %s6341_s25  ;;  %8872 = vst [vmem:[#allocation52_spill] sm:$0xff] %v7567_v47 }
 0x255   : > { %v7555_v11 = vpop.permute.xlu1 %3504 }
 0x256   : > { %v7557_v21 = vpop.permute.xlu0 %3506  ;;  %v5908_v63 = vpop.f32.mrb[134].mxu0 }
 0x257   : > { %3620 = vrot.lane.b32.xlu1 %v5905_v61, %s6341_s25  ;;  %v3065_v35 = vpop.f32.mrb[135].mxu0  ;;  %v7573_v61 = vpop.f32.mrb[144].mxu1 }
 0x258   : > { %3622 = vrot.lane.b32.xlu0 %v3065_v35, %s6341_s25  ;;  %8873 = vst [vmem:[#allocation53_spill] sm:$0xff] %v7573_v61  ;;  %v7580_v36 = vpop.f32.mrb[145].mxu1 }
 0x259   : > { %v7565_v60 = vpop.permute.xlu1 %3508  ;;  %8874 = vst [vmem:[#allocation54_spill] sm:$0xff] %v7580_v36  ;;  %v7583_v51 = vpop.f32.mrb[146].mxu1 }
 0x25a   : > { %v7569_v22 = vpop.permute.xlu0 %3510  ;;  %v5911_v58 = vpop.f32.mrb[136].mxu0  ;;  %8875 = vst [vmem:[#allocation55_spill] sm:$0xff] %v7583_v51 }
 0x25b   : > { %3624 = vrot.lane.b32.xlu1 %v5908_v63, %s6341_s25  ;;  %v3075_v42 = vpop.f32.mrb[137].mxu0  ;;  %v7587_v53 = vpop.f32.mrb[147].mxu1 }
 0x25c   : > { %3626 = vrot.lane.b32.xlu0 %v3075_v42, %s6341_s25  ;;  %8876 = vst [vmem:[#allocation56_spill] sm:$0xff] %v7587_v53 }
 0x25d   : > { %v7575_v9 = vpop.permute.xlu1 %3512 }
 0x25e   : > { %v7577_v12 = vpop.permute.xlu0 %3514  ;;  %v5914_v35 = vpop.f32.mrb[138].mxu0 }
 0x25f   : > { %3628 = vrot.lane.b32.xlu1 %v5911_v58, %s6341_s25  ;;  %v3085_v46 = vpop.f32.mrb[139].mxu0  ;;  %v7593_v58 = vpop.f32.mrb[148].mxu1 }
 0x260   : > { %3630 = vrot.lane.b32.xlu0 %v3085_v46, %s6341_s25  ;;  %8877 = vst [vmem:[#allocation57_spill] sm:$0xff] %v7593_v58  ;;  %v7600_v47 = vpop.f32.mrb[149].mxu1 }
 0x261   : > { %v7585_v63 = vpop.permute.xlu1 %3516  ;;  %8878 = vst [vmem:[#allocation58_spill] sm:$0xff] %v7600_v47  ;;  %v7603_v53 = vpop.f32.mrb[150].mxu1 }
 0x262   : > { %v7589_v42 = vpop.permute.xlu0 %3518  ;;  %v5917_v61 = vpop.f32.mrb[140].mxu0  ;;  %8879 = vst [vmem:[#allocation59_spill] sm:$0xff] %v7603_v53 }
 0x263   : > { %3632 = vrot.lane.b32.xlu1 %v5914_v35, %s6341_s25  ;;  %v3095_v31 = vpop.f32.mrb[141].mxu0  ;;  %v7607_v0 = vpop.f32.mrb[151].mxu1 }
 0x264   : > { %3634 = vrot.lane.b32.xlu0 %v3095_v31, %s6341_s25  ;;  %8881 = vst [vmem:[#allocation61_spill] sm:$0xff] %v7607_v0 }
 0x265   : > { %v7595_v26 = vpop.permute.xlu1 %3520 }
 0x266   : > { %v7597_v36 = vpop.permute.xlu0 %3522  ;;  %v5920_v46 = vpop.f32.mrb[142].mxu0 }
 0x267   : > { %3636 = vrot.lane.b32.xlu1 %v5917_v61, %s6341_s25  ;;  %v3105_v51 = vpop.f32.mrb[143].mxu0  ;;  %v7613_v61 = vpop.f32.mrb[152].mxu1 }
 0x268   : > { %3638 = vrot.lane.b32.xlu0 %v3105_v51, %s6341_s25  ;;  %8883 = vst [vmem:[#allocation63_spill] sm:$0xff] %v7613_v61 }
 0x269   : > { %v7605_v35 = vpop.permute.xlu1 %3524 }
 0x26a   : > { %8880 = vst [vmem:[#allocation60_spill] sm:$0xff] %v7605_v35  ;;  %v7609_v31 = vpop.permute.xlu0 %3526  ;;  %v5923_v58 = vpop.f32.mrb[144].mxu0 }
 0x26b   : > { %8882 = vst [vmem:[#allocation62_spill] sm:$0xff] %v7609_v31  ;;  %3640 = vrot.lane.b32.xlu1 %v5920_v46, %s6341_s25  ;;  %v3115_v1 = vpop.f32.mrb[145].mxu0  ;;  %v7620_v35 = vpop.f32.mrb[153].mxu1 }
 0x26c   : > { %3642 = vrot.lane.b32.xlu0 %v3115_v1, %s6341_s25  ;;  %8886 = vst [vmem:[#allocation66_spill] sm:$0xff] %v7620_v35  ;;  %v7623_v0 = vpop.f32.mrb[154].mxu1 }
 0x26d   : > { %v7615_v24 = vpop.permute.xlu1 %3528  ;;  %8887 = vst [vmem:[#allocation67_spill] sm:$0xff] %v7623_v0  ;;  %v7627_v31 = vpop.f32.mrb[155].mxu1 }
 0x26e   : > { %8884 = vst [vmem:[#allocation64_spill] sm:$0xff] %v7615_v24  ;;  %v7617_v47 = vpop.permute.xlu0 %3530  ;;  %v5926_v51 = vpop.f32.mrb[146].mxu0  ;;  %8889 = vst [vmem:[#allocation69_spill] sm:$0xff] %v7627_v31 }
 0x26f   : > { %8885 = vst [vmem:[#allocation65_spill] sm:$0xff] %v7617_v47  ;;  %3644 = vrot.lane.b32.xlu1 %v5923_v58, %s6341_s25  ;;  %v3125_v53 = vpop.f32.mrb[147].mxu0 }
 0x270   : > { %3646 = vrot.lane.b32.xlu0 %v3125_v53, %s6341_s25 }
 0x271   : > { %v7625_v46 = vpop.permute.xlu1 %3532 }
 0x272   : > { %8888 = vst [vmem:[#allocation68_spill] sm:$0xff] %v7625_v46  ;;  %v7629_v1 = vpop.permute.xlu0 %3534  ;;  %v5929_v61 = vpop.f32.mrb[148].mxu0 }
 0x273   : > { %8890 = vst [vmem:[#allocation70_spill] sm:$0xff] %v7629_v1  ;;  %3648 = vrot.lane.b32.xlu1 %v5926_v51, %s6341_s25  ;;  %v3135_v47 = vpop.f32.mrb[149].mxu0 }
 0x274   : > { %3650 = vrot.lane.b32.xlu0 %v3135_v47, %s6341_s25 }
 0x275   : > { %v7633_v58 = vpop.permute.xlu1 %3536 }
 0x276   : > { %8891 = vst [vmem:[#allocation71_spill] sm:$0xff] %v7633_v58  ;;  %v7635_v24 = vpop.permute.xlu0 %3538  ;;  %v5932_v35 = vpop.f32.mrb[150].mxu0 }
 0x277   : > { %8892 = vst [vmem:[#allocation72_spill] sm:$0xff] %v7635_v24  ;;  %3652 = vrot.lane.b32.xlu1 %v5929_v61, %s6341_s25  ;;  %v3145_v53 = vpop.f32.mrb[151].mxu0 }
 0x278   : > { %3654 = vrot.lane.b32.xlu0 %v3145_v53, %s6341_s25 }
 0x279   : > { %v7639_v0 = vpop.permute.xlu1 %3540 }
 0x27a   : > { %8893 = vst [vmem:[#allocation73_spill] sm:$0xff] %v7639_v0  ;;  %v7641_v31 = vpop.permute.xlu0 %3542  ;;  %v5935_v1 = vpop.f32.mrb[152].mxu0 }
 0x27b   : > { %8894 = vst [vmem:[#allocation74_spill] sm:$0xff] %v7641_v31  ;;  %3656 = vrot.lane.b32.xlu1 %v5932_v35, %s6341_s25  ;;  %v3155_v51 = vpop.f32.mrb[153].mxu0 }
 0x27c   : > { %3658 = vrot.lane.b32.xlu0 %v3155_v51, %s6341_s25 }
 0x27d   : > { %v7645_v47 = vpop.permute.xlu1 %3544 }
 0x27e   : > { %8895 = vst [vmem:[#allocation75_spill] sm:$0xff] %v7645_v47  ;;  %v7647_v58 = vpop.permute.xlu0 %3546  ;;  %v5938_v24 = vpop.f32.mrb[154].mxu0 }
 0x27f   : > { %8896 = vst [vmem:[#allocation76_spill] sm:$0xff] %v7647_v58  ;;  %3660 = vrot.lane.b32.xlu1 %v5935_v1, %s6341_s25  ;;  %v7650_v61 = vpop.f32.mrb[155].mxu0 }
 0x280   : > { %8897 = vst [vmem:[#allocation77_spill] sm:$0xff] %v7650_v61 }
 0x281   : > { %v7652_v53 = vpop.permute.xlu1 %3548 }
 0x282   : > { %8898 = vst [vmem:[#allocation78_spill] sm:$0xff] %v7652_v53  ;;  %v7654_v0 = vpop.permute.xlu0 %3550  ;;  %v5941_v31 = vpop.f32.mrb[156].mxu0 }
 0x283   : > { %8899 = vst [vmem:[#allocation79_spill] sm:$0xff] %v7654_v0  ;;  %3664 = vrot.lane.b32.xlu1 %v5938_v24, %s6341_s25  ;;  %v7657_v35 = vpop.f32.mrb[157].mxu0 }
 0x284   : > { %8900 = vst [vmem:[#allocation80_spill] sm:$0xff] %v7657_v35 }
 0x285   : > { %v7659_v46 = vpop.permute.xlu1 %3552 }
 0x286   : > { %8901 = vst [vmem:[#allocation81_spill] sm:$0xff] %v7659_v46  ;;  %v7661_v51 = vpop.permute.xlu0 %3554  ;;  %v5944_v47 = vpop.f32.mrb[158].mxu0 }
 0x287   : > { %8902 = vst [vmem:[#allocation82_spill] sm:$0xff] %v7661_v51  ;;  %3668 = vrot.lane.b32.xlu1 %v5941_v31, %s6341_s25  ;;  %v7664_v58 = vpop.f32.mrb[159].mxu0 }
 0x288   : > { %8903 = vst [vmem:[#allocation83_spill] sm:$0xff] %v7664_v58 }
 0x289   : > { %v7666_v1 = vpop.permute.xlu1 %3556 }
 0x28a   : > { %8904 = vst [vmem:[#allocation84_spill] sm:$0xff] %v7666_v1  ;;  %v7668_v61 = vpop.permute.xlu0 %3558  ;;  %v5947_v53 = vpop.f32.mrb[160].mxu0 }
 0x28b   : > { %8905 = vst [vmem:[#allocation85_spill] sm:$0xff] %v7668_v61  ;;  %3672 = vrot.lane.b32.xlu1 %v5944_v47, %s6341_s25  ;;  %v7671_v0 = vpop.f32.mrb[161].mxu0 }
 0x28d   : > { %v7673_v24 = vpop.permute.xlu1 %3560 }
 0x28e   : > { %8906 = vst [vmem:[#allocation86_spill] sm:$0xff] %v7673_v24  ;;  %v7675_v35 = vpop.permute.xlu0 %3562  ;;  %v5950_v46 = vpop.f32.mrb[162].mxu0 }
 0x28f   : > { %8907 = vst [vmem:[#allocation87_spill] sm:$0xff] %v7675_v35  ;;  %3676 = vrot.lane.b32.xlu1 %v5947_v53, %s6341_s25  ;;  %v7678_v51 = vpop.f32.mrb[163].mxu0  ;;  %v3867_v53 = vsel %vm3866_vm1, %v7228_v19, %v7505_v30 }
 0x291   : > { %v7680_v31 = vpop.permute.xlu1 %3564 }
 0x292   : > { %8908 = vst [vmem:[#allocation88_spill] sm:$0xff] %v7680_v31  ;;  %v7682_v58 = vpop.permute.xlu0 %3566  ;;  %v5953_v1 = vpop.f32.mrb[164].mxu0 }
 0x293   : > { %8909 = vst [vmem:[#allocation89_spill] sm:$0xff] %v7682_v58  ;;  %3680 = vrot.lane.b32.xlu1 %v5950_v46, %s6341_s25  ;;  %v7685_v61 = vpop.f32.mrb[165].mxu0  ;;  %v3996_v46 = vsel %vm3995_vm2, %v3867_v53, 0.0  ;;  %v3869_v53 = vsel %vm3866_vm1, %v7224_v45, %v7515_v8 }
 0x294   : > { %8910 = vst [vmem:[#allocation90_spill] sm:$0xff] %v7685_v61 }
 0x295   : > { %v7687_v47 = vpop.permute.xlu1 %3568 }
 0x296   : > { %8911 = vst [vmem:[#allocation91_spill] sm:$0xff] %v7687_v47  ;;  %v7689_v24 = vpop.permute.xlu0 %3570  ;;  %v5956_v35 = vpop.f32.mrb[166].mxu0  ;;  %v3868_v47 = vsel %vm3866_vm1, %v7235_v41, %v7497_v43 }
 0x297   : > { %8912 = vst [vmem:[#allocation92_spill] sm:$0xff] %v7689_v24  ;;  %3684 = vrot.lane.b32.xlu1 %v5953_v1, %s6341_s25  ;;  %v7695_v31 = vpop.f32.mrb[167].mxu0  ;;  %v3997_v1 = vsel %vm3995_vm2, %v3868_v47, 0.0  ;;  %v3870_v47 = vsel %vm3866_vm1, %v7233_v4, %v7507_v49 }
 0x299   : > { %v7697_v58 = vpop.permute.xlu1 %3572 }
 0x29a   : > { %8913 = vst [vmem:[#allocation93_spill] sm:$0xff] %v7697_v58  ;;  %v7703_v61 = vpop.permute.xlu0 %3574  ;;  %4124 = vxpose.xlu0.b32.start [1/16] (narrow) %v3996_v46, 8  ;;  %v5959_v24 = vpop.f32.mrb[168].mxu0  ;;  %v3998_v46 = vsel %vm3995_vm2, %v3869_v53, 0.0 }
 0x29b   : > { %8914 = vst [vmem:[#allocation94_spill] sm:$0xff] %v7703_v61  ;;  %3688 = vrot.lane.b32.xlu1 %v5956_v35, %s6341_s25  ;;  %v7706_v19 = vpop.f32.mrb[169].mxu0  ;;  %v3871_v61 = vsel %vm3866_vm1, %v7253_v15, %v7517_v57 }
 0x29d   : > { %v7708_v30 = vpop.permute.xlu1 %3576 }
 0x29e   : > { %8915 = vst [vmem:[#allocation95_spill] sm:$0xff] %v7708_v30  ;;  %v7714_v58 = vpop.permute.xlu0 %3578  ;;  %4125 = vxpose.xlu0.b32.cont [2/16] (narrow) %v3997_v1, 8  ;;  %v7716_v41 = vpop.f32.mrb[170].mxu0 }
 0x29f   : > { %8916 = vst [vmem:[#allocation96_spill] sm:$0xff] %v7714_v58  ;;  %3692 = vrot.lane.b32.xlu1 %v5959_v24, %s6341_s25  ;;  %v7719_v43 = vpop.f32.mrb[171].mxu0  ;;  %v3999_v24 = vsel %vm3995_vm2, %v3870_v47, 0.0 }
 0x2a1   : > { %v7721_v35 = vpop.permute.xlu1 %3580 }
 0x2a2   : > { %8917 = vst [vmem:[#allocation97_spill] sm:$0xff] %v7721_v35  ;;  %v7727_v30 = vpop.permute.xlu0 %3582  ;;  %4126 = vxpose.xlu0.b32.cont [3/16] (narrow) %v3998_v46, 8  ;;  %v4000_v46 = vsel %vm3995_vm2, %v3871_v61, 0.0 }
 0x2a3   : > { %8918 = vst [vmem:[#allocation98_spill] sm:$0xff] %v7727_v30  ;;  %v7729_v45 = vpop.f32.mrb[172].mxu0 }
 0x2a4   : > { %v7731_v8 = vpop.f32.mrb[173].mxu0 }
 0x2a5   : > { %v7733_v1 = vpop.permute.xlu1 %3584 }
 0x2a6   : > { %8919 = vst [vmem:[#allocation99_spill] sm:$0xff] %v7733_v1  ;;  %v7739_v53 = vpop.permute.xlu0 %3586  ;;  %4127 = vxpose.xlu0.b32.cont [4/16] (narrow) %v3999_v24, 8  ;;  %v3872_v1 = vsel %vm3866_vm1, %v7263_v14, %v7525_v54  ;;  %v7767_v14 = vpop.f32.mrb[156].mxu1 }
 0x2a7   : > { %8920 = vst [vmem:[#allocation100_spill] sm:$0xff] %v7739_v53  ;;  %v7741_v35 = vpop.f32.mrb[174].mxu0  ;;  %v4001_v24 = vsel %vm3995_vm2, %v3872_v1, 0.0  ;;  %8925 = vst [vmem:[#allocation105_spill] sm:$0xff] %v7767_v14  ;;  %v3874_v1 = vsel %vm3866_vm1, %v7257_v13, %v7535_v20 }
 0x2a8   : > { %v7743_v4 = vpop.f32.mrb[175].mxu0 }
 0x2a9   : > { %v7745_v49 = vpop.permute.xlu1 %3588 }
 0x2aa   : > { %8921 = vst [vmem:[#allocation101_spill] sm:$0xff] %v7745_v49  ;;  %v7751_v47 = vpop.permute.xlu0 %3590  ;;  %4128 = vxpose.xlu0.b32.cont [5/16] (narrow) %v4000_v46, 8  ;;  %v3873_v49 = vsel %vm3866_vm1, %v7251_v44, %v7529_v28  ;;  %v7771_v46 = vpop.f32.mrb[157].mxu1 }
 0x2ab   : > { %8922 = vst [vmem:[#allocation102_spill] sm:$0xff] %v7751_v47  ;;  %v7753_v30 = vpop.f32.mrb[176].mxu0  ;;  %8926 = vst [vmem:[#allocation106_spill] sm:$0xff] %v7771_v46  ;;  %v7781_v28 = vpop.f32.mrb[158].mxu1 }
 0x2ac   : > { %v7755_v15 = vpop.f32.mrb[177].mxu0  ;;  %8929 = vst [vmem:[#allocation109_spill] sm:$0xff] %v7781_v28  ;;  %v7785_v14 = vpop.f32.mrb[159].mxu1 }
 0x2ad   : > { %v7757_v57 = vpop.permute.xlu1 %3592  ;;  %8930 = vst [vmem:[#allocation110_spill] sm:$0xff] %v7785_v14 }
 0x2ae   : > { %8923 = vst [vmem:[#allocation103_spill] sm:$0xff] %v7757_v57  ;;  %v7763_v61 = vpop.permute.xlu0 %3594  ;;  %4129 = vxpose.xlu0.b32.cont [6/16] (narrow) %v4001_v24, 8  ;;  %v4002_v57 = vsel %vm3995_vm2, %v3873_v49, 0.0  ;;  %v3875_v49 = vsel %vm3866_vm1, %v7276_v5, %v7537_v59 }
 0x2af   : > { %8924 = vst [vmem:[#allocation104_spill] sm:$0xff] %v7763_v61  ;;  %v7765_v53 = vpop.f32.mrb[178].mxu0 }
 0x2b0   : > { %v7769_v54 = vpop.f32.mrb[179].mxu0 }
 0x2b1   : > { %v7773_v47 = vpop.permute.xlu1 %3596 }
 0x2b2   : > { %8927 = vst [vmem:[#allocation107_spill] sm:$0xff] %v7773_v47  ;;  %v7779_v44 = vpop.permute.xlu0 %3598  ;;  %4130 = vxpose.xlu0.b32.cont [7/16] (narrow) %v4002_v57, 8  ;;  %v4003_v47 = vsel %vm3995_vm2, %v3874_v1, 0.0  ;;  %v7799_v57 = vpop.f32.mrb[160].mxu1  ;;  %v3876_v1 = vsel %vm3866_vm1, %v7284_v39, %v7545_v6 }
 0x2b3   : > { %8928 = vst [vmem:[#allocation108_spill] sm:$0xff] %v7779_v44  ;;  %v7783_v24 = vpop.f32.mrb[180].mxu0  ;;  %8933 = vst [vmem:[#allocation113_spill] sm:$0xff] %v7799_v57  ;;  %v7803_v14 = vpop.f32.mrb[161].mxu1 }
 0x2b4   : > { %v7787_v61 = vpop.f32.mrb[181].mxu0  ;;  %8934 = vst [vmem:[#allocation114_spill] sm:$0xff] %v7803_v14  ;;  %v7813_v59 = vpop.f32.mrb[162].mxu1 }
 0x2b5   : > { %v7789_v46 = vpop.permute.xlu1 %3600 }
 0x2b6   : > { %8931 = vst [vmem:[#allocation111_spill] sm:$0xff] %v7789_v46  ;;  %v7795_v13 = vpop.permute.xlu0 %3602  ;;  %4131 = vxpose.xlu0.b32.cont [8/16] (narrow) %v4003_v47, 8  ;;  %v4004_v46 = vsel %vm3995_vm2, %v3875_v49, 0.0  ;;  %v3877_v49 = vsel %vm3866_vm1, %v7272_v38, %v7549_v50  ;;  %v3878_v38 = vsel %vm3866_vm1, %v7280_v3, %v7555_v11  ;;  %v3883_v3 = vsel %vm3866_vm1, %v7328_v18, %v7577_v12 }
 0x2b7   : > { %8932 = vst [vmem:[#allocation112_spill] sm:$0xff] %v7795_v13  ;;  %v7797_v20 = vpop.f32.mrb[182].mxu0  ;;  %v7817_v13 = vpop.f32.mrb[163].mxu1  ;;  %v4012_v18 = vsel %vm3995_vm2, %v3883_v3, 0.0 }
 0x2b8   : > { %v7801_v28 = vpop.f32.mrb[183].mxu0  ;;  %v7827_v6 = vpop.f32.mrb[164].mxu1 }
 0x2b9   : > { %v7805_v44 = vpop.permute.xlu1 %3604  ;;  %v7835_v58 = vpop.f32.mrb[165].mxu1 }
 0x2ba   : > { %8935 = vst [vmem:[#allocation115_spill] sm:$0xff] %v7805_v44  ;;  %v7811_v5 = vpop.permute.xlu0 %3606  ;;  %4132 = vxpose.xlu0.b32.cont [9/16] (narrow) %v4004_v46, 8  ;;  %v4005_v44 = vsel %vm3995_vm2, %v3876_v1, 0.0  ;;  %v4006_v1 = vsel %vm3995_vm2, %v3877_v49, 0.0 }
 0x2bb   : > { %8936 = vst [vmem:[#allocation116_spill] sm:$0xff] %v7811_v5  ;;  %v7815_v47 = vpop.f32.mrb[184].mxu0 }
 0x2bc   : > { %8937 = vst [vmem:[#allocation117_spill] sm:$0xff] %v7815_v47  ;;  %v7819_v57 = vpop.f32.mrb[185].mxu0 }
 0x2bd   : > { %v7821_v14 = vpop.permute.xlu1 %3608 }
 0x2be   : > { %8938 = vst [vmem:[#allocation118_spill] sm:$0xff] %v7821_v14  ;;  %v3611_v39 = vpop.permute.xlu0 %3610  ;;  %4133 = vxpose.xlu0.b32.cont [10/16] (narrow) %v4005_v44, 8 }
 0x2bf   : > { %v7831_v46 = vsel %vm3866_vm1, %v7499_v10, %v3611_v39  ;;  %v7833_v5 = vpop.f32.mrb[186].mxu0  ;;  %v7847_v10 = vpop.f32.mrb[166].mxu1 }
 0x2c0   : > { %8939 = vst [vmem:[#allocation119_spill] sm:$0xff] %v7831_v46  ;;  %v7837_v47 = vpop.f32.mrb[187].mxu0  ;;  %v7853_v46 = vpop.f32.mrb[167].mxu1 }
 0x2c1   : > { %8940 = vst [vmem:[#allocation120_spill] sm:$0xff] %v7837_v47  ;;  %v3613_v14 = vpop.permute.xlu1 %3612  ;;  %v7875_v12 = vpop.f32.mrb[168].mxu1 }
 0x2c2   : > { %v7845_v50 = vsel %vm3866_vm1, %v7509_v25, %v3613_v14  ;;  %v3615_v44 = vpop.permute.xlu0 %3614  ;;  %4134 = vxpose.xlu0.b32.cont [11/16] (narrow) %v4006_v1, 8  ;;  %v4007_v25 = vsel %vm3995_vm2, %v3878_v38, 0.0  ;;  %v3879_v14 = vsel %vm3866_vm1, %v7302_v55, %v7557_v21  ;;  %v3884_v55 = vsel %vm3866_vm1, %v7336_v37, %v7585_v63  ;;  %v7882_v21 = vpop.f32.mrb[169].mxu1 }
 0x2c3   : > { %v7851_v39 = vsel %vm3866_vm1, %v7495_v56, %v3615_v44  ;;  %v7855_v47 = vpop.f32.mrb[188].mxu0  ;;  %v4013_v63 = vsel %vm3995_vm2, %v3884_v55, 0.0 }
 0x2c4   : > { %v7868_v1 = vpop.f32.mrb[189].mxu0 }
 0x2c5   : > { %v3617_v11 = vpop.permute.xlu1 %3616 }
 0x2c6   : > { %v7866_v49 = vsel %vm3866_vm1, %v7503_v48, %v3617_v11  ;;  %v3619_v56 = vpop.permute.xlu0 %3618  ;;  %4135 = vxpose.xlu0.b32.cont [12/16] (narrow) %v4007_v25, 8  ;;  %v4008_v11 = vsel %vm3995_vm2, %v3879_v14, 0.0  ;;  %v3881_v14 = vsel %vm3866_vm1, %v7297_v2, %v7569_v22 }
 0x2c7   : > { %v7872_v44 = vsel %vm3866_vm1, %v7520_v23, %v3619_v56  ;;  %v7877_v38 = vpop.f32.mrb[190].mxu0  ;;  %v3880_v23 = vsel %vm3866_vm1, %v7310_v34, %v7565_v60  ;;  %v7892_v56 = vpop.f32.mrb[170].mxu1  ;;  %v3885_v34 = vsel %vm3866_vm1, %v7323_v29, %v7589_v42  ;;  %v3886_v42 = vsel %vm3866_vm1, %v7331_v16, %v7595_v26 }
 0x2c8   : > { %4156 = vxpose.xlu1.b32.start [1/16] (narrow) %v4012_v18, 8  ;;  %v7899_v18 = vpop.f32.mrb[171].mxu1  ;;  %v4014_v29 = vsel %vm3995_vm2, %v3885_v34, 0.0  ;;  %v4010_v2 = vsel %vm3995_vm2, %v3881_v14, 0.0  ;;  %v4015_v16 = vsel %vm3995_vm2, %v3886_v42, 0.0  ;;  %v3887_v26 = vsel %vm3866_vm1, %v7352_v32, %v7597_v36  ;;  %v8943_v34 = vld [vmem:[#allocation50_spill] sm:$0xff] }
 0x2c9   : > { %v3621_v48 = vpop.permute.xlu1 %3620  ;;  %v8946_v14 = vld [vmem:[#allocation26_spill] sm:$0xff] }
 0x2ca   : > { %v7890_v3 = vsel %vm3866_vm1, %v7527_v62, %v3621_v48  ;;  %v3623_v25 = vpop.permute.xlu0 %3622  ;;  %4136 = vxpose.xlu0.b32.cont [13/16] (narrow) %v4008_v11, 8  ;;  %v4009_v62 = vsel %vm3995_vm2, %v3880_v23, 0.0 }
 0x2cb   : > { %v7896_v37 = vsel %vm3866_vm1, %v7513_v7, %v3623_v25 }
 0x2cc   : > { %4157 = vxpose.xlu1.b32.cont [2/16] (narrow) %v4013_v63, 8 }
 0x2cd   : > { %v3625_v60 = vpop.permute.xlu1 %3624 }
 0x2ce   : > { %v7910_v7 = vsel %vm3866_vm1, %v7523_v33, %v3625_v60  ;;  %v3627_v48 = vpop.permute.xlu0 %3626  ;;  %4137 = vxpose.xlu0.b32.cont [14/16] (narrow) %v4009_v62, 8  ;;  %v3882_v33 = vsel %vm3866_vm1, %v7305_v52, %v7575_v9  ;;  %v8941_v9 = vld [vmem:[#allocation48_spill] sm:$0xff]  ;;  %v4016_v60 = vsel %vm3995_vm2, %v3887_v26, 0.0 }
 0x2cf   : > { %v7914_v55 = vsel %vm3866_vm1, %v7540_v27, %v3627_v48  ;;  %v4011_v52 = vsel %vm3995_vm2, %v3882_v33, 0.0  ;;  %v8945_v62 = vld [vmem:[#allocation60_spill] sm:$0xff] }
 0x2d0   : > { %4158 = vxpose.xlu1.b32.cont [3/16] (narrow) %v4014_v29, 8  ;;  %v3888_v32 = vsel %vm3866_vm1, %v8946_v14, %v8945_v62  ;;  %v8947_v48 = vld [vmem:[#allocation52_spill] sm:$0xff] }
 0x2d1   : > { %v3629_v11 = vpop.permute.xlu1 %3628  ;;  %v4017_v33 = vsel %vm3995_vm2, %v3888_v32, 0.0  ;;  %v7971_v32 = vpop.f32.mrb[191].mxu0 }
 0x2d2   : > { %v7926_v22 = vsel %vm3866_vm1, %v7547_v40, %v3629_v11  ;;  %v3631_v27 = vpop.permute.xlu0 %3630  ;;  %4138 = vxpose.xlu0.b32.cont [15/16] (narrow) %v4010_v2, 8  ;;  %v8949_v11 = vld [vmem:[#allocation49_spill] sm:$0xff] }
 0x2d3   : > { %v7930_v23 = vsel %vm3866_vm1, %v7533_v17, %v3631_v27  ;;  %v8951_v27 = vld [vmem:[#allocation62_spill] sm:$0xff] }
 0x2d4   : > { %4159 = vxpose.xlu1.b32.cont [4/16] (narrow) %v4015_v16, 8  ;;  %v8952_v16 = vld [vmem:[#allocation5_spill] sm:$0xff] }
 0x2d5   : > { %v3633_v25 = vpop.permute.xlu1 %3632  ;;  %v3889_v26 = vsel %vm3866_vm1, %v8952_v16, %v8951_v27  ;;  %v8959_v16 = vld [vmem:[#allocation68_spill] sm:$0xff] }
 0x2d6   : > { %v7939_v40 = vsel %vm3866_vm1, %v8941_v9, %v3633_v25  ;;  %v3635_v63 = vpop.permute.xlu0 %3634  ;;  %4139 = vxpose.xlu0.b32.end [16/16] (narrow) %v4011_v52, 8  ;;  %v8953_v52 = vld [vmem:[#allocation51_spill] sm:$0xff] }
 0x2d7   : > { %8942 = vst [vmem:[#allocation48_spill] sm:$0xff] %v7939_v40  ;;  %v7943_v17 = vsel %vm3866_vm1, %v8943_v34, %v3635_v63  ;;  %v4018_v63 = vsel %vm3995_vm2, %v3889_v26, 0.0  ;;  %v8955_v34 = vld [vmem:[#allocation64_spill] sm:$0xff]  ;;  %v8973_v40 = vld [vmem:[#allocation29_spill] sm:$0xff] }
 0x2d8   : > { %8944 = vst [vmem:[#allocation50_spill] sm:$0xff] %v7943_v17  ;;  %4160 = vxpose.xlu1.b32.cont [5/16] (narrow) %v4016_v60, 8  ;;  %v8956_v60 = vld [vmem:[#allocation25_spill] sm:$0xff]  ;;  %v8960_v26 = vld [vmem:[#allocation28_spill] sm:$0xff] }
 0x2d9   : > { %v3637_v36 = vpop.permute.xlu1 %3636  ;;  %v3890_v62 = vsel %vm3866_vm1, %v8956_v60, %v8955_v34  ;;  %v8961_v34 = vld [vmem:[#allocation70_spill] sm:$0xff] }
 0x2da   : > { %v7951_v29 = vsel %vm3866_vm1, %v8947_v48, %v3637_v36  ;;  %v3639_v42 = vpop.permute.xlu0 %3638  ;;  %v4019_v36 = vsel %vm3995_vm2, %v3890_v62, 0.0  ;;  %v8957_v48 = vld [vmem:[#allocation65_spill] sm:$0xff]  ;;  %v8962_v60 = vld [vmem:[#allocation6_spill] sm:$0xff] }
 0x2db   : > { %8948 = vst [vmem:[#allocation60_spill] sm:$0xff] %v7951_v29  ;;  %v7955_v2 = vsel %vm3866_vm1, %v8949_v11, %v3639_v42  ;;  %v8958_v42 = vld [vmem:[#allocation7_spill] sm:$0xff]  ;;  %v3893_v62 = vsel %vm3866_vm1, %v8962_v60, %v8961_v34  ;;  %v8967_v60 = vld [vmem:[#allocation73_spill] sm:$0xff] }
 0x2dc   : > { %8950 = vst [vmem:[#allocation26_spill] sm:$0xff] %v7955_v2  ;;  %4161 = vxpose.xlu1.b32.cont [6/16] (narrow) %v4017_v33, 8  ;;  %v3891_v11 = vsel %vm3866_vm1, %v8958_v42, %v8957_v48  ;;  %v8963_v42 = vld [vmem:[#allocation71_spill] sm:$0xff] }
 0x2dd   : > { %v3641_v25 = vpop.permute.xlu1 %3640  ;;  %v4020_v27 = vsel %vm3995_vm2, %v3891_v11, 0.0  ;;  %v8964_v11 = vld [vmem:[#allocation27_spill] sm:$0xff] }
 0x2de   : > { %v7963_v9 = vsel %vm3866_vm1, %v8953_v52, %v3641_v25  ;;  %v3892_v25 = vsel %vm3866_vm1, %v8960_v26, %v8959_v16  ;;  %v8965_v26 = vld [vmem:[#allocation72_spill] sm:$0xff] }
 0x2df   : > { %8954 = vst [vmem:[#allocation52_spill] sm:$0xff] %v7963_v9  ;;  %v3894_v9 = vsel %vm3866_vm1, %v8964_v11, %v8963_v42  ;;  %v8969_v11 = vld [vmem:[#allocation74_spill] sm:$0xff] }
 0x2e0   : > { %4162 = vxpose.xlu1.b32.cont [7/16] (narrow) %v4018_v63, 8  ;;  %v4021_v63 = vsel %vm3995_vm2, %v3892_v25, 0.0  ;;  %v8966_v25 = vld [vmem:[#allocation9_spill] sm:$0xff] }
 0x2e1   : > { %v7969_v14 = vpop.permute.xlu1 %3644  ;;  %v3895_v2 = vsel %vm3866_vm1, %v8966_v25, %v8965_v26  ;;  %v8972_v25 = vld [vmem:[#allocation75_spill] sm:$0xff] }
 0x2e4   : > { %4163 = vxpose.xlu1.b32.cont [8/16] (narrow) %v4019_v36, 8  ;;  %v4022_v36 = vsel %vm3995_vm2, %v3893_v62, 0.0  ;;  %v8968_v62 = vld [vmem:[#allocation30_spill] sm:$0xff] }
 0x2e5   : > { %v7977_v33 = vpop.permute.xlu1 %3648  ;;  %v3896_v29 = vsel %vm3866_vm1, %v8968_v62, %v8967_v60  ;;  %v8975_v62 = vld [vmem:[#allocation80_spill] sm:$0xff] }
 0x2e8   : > { %4164 = vxpose.xlu1.b32.cont [9/16] (narrow) %v4020_v27, 8  ;;  %v4023_v27 = vsel %vm3995_vm2, %v3894_v9, 0.0  ;;  %v8970_v9 = vld [vmem:[#allocation8_spill] sm:$0xff] }
 0x2e9   : > { %v7983_v52 = vpop.permute.xlu1 %3652  ;;  %v3897_v17 = vsel %vm3866_vm1, %v8970_v9, %v8969_v11  ;;  %v8977_v9 = vld [vmem:[#allocation83_spill] sm:$0xff] }
 0x2ec   : > { %4165 = vxpose.xlu1.b32.cont [10/16] (narrow) %v4021_v63, 8  ;;  %v4024_v63 = vsel %vm3995_vm2, %v3895_v2, 0.0  ;;  %v4026_v2 = vsel %vm3995_vm2, %v3897_v17, 0.0 }
 0x2ed   : > { %v7989_v48 = vpop.permute.xlu1 %3656 }
 0x2f0   : > { %4166 = vxpose.xlu1.b32.cont [11/16] (narrow) %v4022_v36, 8  ;;  %v4025_v36 = vsel %vm3995_vm2, %v3896_v29, 0.0 }
 0x2f1   : > { %v7995_v16 = vpop.permute.xlu1 %3660 }
 0x2f4   : > { %4167 = vxpose.xlu1.b32.cont [12/16] (narrow) %v4023_v27, 8  ;;  %v8971_v27 = vld [vmem:[#allocation77_spill] sm:$0xff] }
 0x2f5   : > { %v8001_v34 = vpop.permute.xlu1 %3664 }
 0x2f8   : > { %4168 = vxpose.xlu1.b32.cont [13/16] (narrow) %v4024_v63, 8  ;;  %v3898_v63 = vsel %vm3866_vm1, %v8973_v40, %v8972_v25 }
 0x2f9   : > { %v8007_v42 = vpop.permute.xlu1 %3668 }
 0x2fc   : > { %4169 = vxpose.xlu1.b32.cont [14/16] (narrow) %v4025_v36, 8  ;;  %v4027_v36 = vsel %vm3995_vm2, %v3898_v63, 0.0  ;;  %v8981_v63 = vld [vmem:[#allocation90_spill] sm:$0xff] }
 0x2fd   : > { %v8013_v26 = vpop.permute.xlu1 %3672 }
 0x2ff   : > { %3662 = vrot.lane.b32.xlu0 %v8971_v27, %s6341_s25 }
 0x300   : > { %4170 = vxpose.xlu1.b32.cont [15/16] (narrow) %v4026_v2, 8 }
 0x301   : > { %v3677_v60 = vpop.permute.xlu1 %3676 }
 0x302   : > { %v8023_v29 = vsel %vm3866_vm1, %v7817_v13, %v3677_v60 }
 0x303   : > { %8974 = vst [vmem:[#allocation49_spill] sm:$0xff] %v8023_v29  ;;  %3666 = vrot.lane.b32.xlu0 %v8975_v62, %s6341_s25 }
 0x304   : > { %4171 = vxpose.xlu1.b32.end [16/16] (narrow) %v4027_v36, 8 }
 0x305   : > { %v3681_v11 = vpop.permute.xlu1 %3680 }
 0x306   : > { %v8030_v17 = vsel %vm3866_vm1, %v7813_v59, %v3681_v11 }
 0x307   : > { %8976 = vst [vmem:[#allocation62_spill] sm:$0xff] %v8030_v17  ;;  %3670 = vrot.lane.b32.xlu0 %v8977_v9, %s6341_s25 }
 0x309   : > { %v3685_v40 = vpop.permute.xlu1 %3684 }
 0x30a   : > { %v8036_v27 = vsel %vm3866_vm1, %v7853_v46, %v3685_v40  ;;  %v8052_v46 = vpop.f32.mrb[172].mxu1 }
 0x30b   : > { %8978 = vst [vmem:[#allocation5_spill] sm:$0xff] %v8036_v27  ;;  %3674 = vrot.lane.b32.xlu0 %v7671_v0, %s6341_s25  ;;  %v8054_v60 = vpop.f32.mrb[173].mxu1  ;;  %v9007_v27 = vld [vmem:[#allocation13_spill] sm:$0xff] }
 0x30c   : > { %v8056_v0 = vpop.f32.mrb[174].mxu1 }
 0x30d   : > { %v3689_v13 = vpop.permute.xlu1 %3688 }
 0x30e   : > { %v8042_v2 = vsel %vm3866_vm1, %v7847_v10, %v3689_v13  ;;  %v8060_v10 = vpop.f32.mrb[175].mxu1 }
 0x30f   : > { %8979 = vst [vmem:[#allocation51_spill] sm:$0xff] %v8042_v2  ;;  %3678 = vrot.lane.b32.xlu0 %v7678_v51, %s6341_s25  ;;  %v8064_v51 = vpop.f32.mrb[176].mxu1 }
 0x311   : > { %v3693_v59 = vpop.permute.xlu1 %3692 }
 0x312   : > { %v8048_v25 = vsel %vm3866_vm1, %v7899_v18, %v3693_v59  ;;  %v8066_v18 = vpop.f32.mrb[177].mxu1  ;;  %v8993_v59 = vld [vmem:[#allocation79_spill] sm:$0xff] }
 0x313   : > { %8980 = vst [vmem:[#allocation64_spill] sm:$0xff] %v8048_v25  ;;  %3682 = vrot.lane.b32.xlu0 %v8981_v63, %s6341_s25  ;;  %v8068_v62 = vpop.f32.mrb[178].mxu1  ;;  %v8994_v63 = vld [vmem:[#allocation10_spill] sm:$0xff]  ;;  %v8996_v25 = vld [vmem:[#allocation31_spill] sm:$0xff] }
 0x314   : > { %v8072_v36 = vpop.f32.mrb[179].mxu1 }
 0x317   : > { %3686 = vrot.lane.b32.xlu0 %v7695_v31, %s6341_s25  ;;  %v8078_v31 = vpop.f32.mrb[180].mxu1 }
 0x31b   : > { %3690 = vrot.lane.b32.xlu0 %v7706_v19, %s6341_s25  ;;  %v8080_v19 = vpop.f32.mrb[181].mxu1 }
 0x31c   : > { %v8084_v11 = vpop.f32.mrb[182].mxu1 }
 0x31f   : > { %3694 = vrot.lane.b32.xlu0 %v7719_v43, %s6341_s25  ;;  %v8088_v43 = vpop.f32.mrb[183].mxu1 }
 0x322   : > { %3696 = vrot.lane.b32.xlu1 %v7716_v41, %s6341_s25  ;;  %v8094_v41 = vpop.f32.mrb[184].mxu1 }
 0x323   : > { %3698 = vrot.lane.b32.xlu0 %v7731_v8, %s6341_s25  ;;  %8982 = vst [vmem:[#allocation25_spill] sm:$0xff] %v8094_v41  ;;  %v8096_v8 = vpop.f32.mrb[185].mxu1  ;;  %v9022_v41 = vld [vmem:[#allocation23_spill] sm:$0xff] }
 0x326   : > { %3700 = vrot.lane.b32.xlu1 %v7729_v45, %s6341_s25  ;;  %v8100_v45 = vpop.f32.mrb[186].mxu1 }
 0x327   : > { %3702 = vrot.lane.b32.xlu0 %v7743_v4, %s6341_s25  ;;  %8983 = vst [vmem:[#allocation65_spill] sm:$0xff] %v8100_v45  ;;  %v8104_v4 = vpop.f32.mrb[187].mxu1 }
 0x32a   : > { %3704 = vrot.lane.b32.xlu1 %v7741_v35, %s6341_s25  ;;  %v8126_v35 = vpop.permute.xlu0 %3642 }
 0x32b   : > { %3706 = vrot.lane.b32.xlu0 %v7755_v15, %s6341_s25 }
 0x32e   : > { %3708 = vrot.lane.b32.xlu1 %v7753_v30, %s6341_s25  ;;  %v8984_v30 = vld [vmem:[#allocation117_spill] sm:$0xff] }
 0x32f   : > { %3710 = vrot.lane.b32.xlu0 %v7769_v54, %s6341_s25  ;;  %v8988_v54 = vld [vmem:[#allocation11_spill] sm:$0xff] }
 0x332   : > { %3712 = vrot.lane.b32.xlu1 %v7765_v53, %s6341_s25  ;;  %v8128_v53 = vpop.f32.mrb[188].mxu1 }
 0x333   : > { %3714 = vrot.lane.b32.xlu0 %v7787_v61, %s6341_s25  ;;  %8985 = vst [vmem:[#allocation7_spill] sm:$0xff] %v8128_v53  ;;  %v8130_v15 = vpop.f32.mrb[189].mxu1  ;;  %v8987_v61 = vld [vmem:[#allocation76_spill] sm:$0xff] }
 0x334   : > { %8986 = vst [vmem:[#allocation68_spill] sm:$0xff] %v8130_v15 }
 0x336   : > { %3716 = vrot.lane.b32.xlu1 %v7783_v24, %s6341_s25  ;;  %v8135_v24 = vpop.permute.xlu0 %3646 }
 0x337   : > { %3718 = vrot.lane.b32.xlu0 %v7801_v28, %s6341_s25  ;;  %v3899_v28 = vsel %vm3866_vm1, %v8988_v54, %v8987_v61  ;;  %v8995_v54 = vld [vmem:[#allocation81_spill] sm:$0xff] }
 0x33a   : > { %3720 = vrot.lane.b32.xlu1 %v7797_v20, %s6341_s25  ;;  %v8137_v20 = vpop.f32.mrb[190].mxu1  ;;  %v8145_v40 = vpop.permute.xlu0 %3650 }
 0x33b   : > { %3722 = vrot.lane.b32.xlu0 %v7819_v57, %s6341_s25  ;;  %8989 = vst [vmem:[#allocation28_spill] sm:$0xff] %v8137_v20  ;;  %v8139_v57 = vpop.f32.mrb[191].mxu1 }
 0x33c   : > { %8990 = vst [vmem:[#allocation70_spill] sm:$0xff] %v8139_v57  ;;  %v9006_v57 = vld [vmem:[#allocation86_spill] sm:$0xff] }
 0x33e   : > { %3724 = vrot.lane.b32.xlu1 %v8984_v30, %s6341_s25  ;;  %v3901_v30 = vsel %vm3866_vm1, %v8994_v63, %v8993_v59  ;;  %v8155_v20 = vpop.permute.xlu0 %3654  ;;  %v8999_v59 = vld [vmem:[#allocation84_spill] sm:$0xff]  ;;  %v9000_v63 = vld [vmem:[#allocation34_spill] sm:$0xff] }
 0x33f   : > { %v4030_v61 = vsel %vm3995_vm2, %v3901_v30, 0.0  ;;  %v3904_v30 = vsel %vm3866_vm1, %v9000_v63, %v8999_v59  ;;  %v3906_v59 = vsel %vm3866_vm1, %v9007_v27, %v9006_v57  ;;  %v9012_v57 = vld [vmem:[#allocation98_spill] sm:$0xff] }
 0x342   : > { %3728 = vrot.lane.b32.xlu1 %v7833_v5, %s6341_s25  ;;  %v4028_v5 = vsel %vm3995_vm2, %v3899_v28, 0.0  ;;  %v3902_v28 = vsel %vm3866_vm1, %v8996_v25, %v8995_v54  ;;  %v8161_v2 = vpop.permute.xlu0 %3658  ;;  %v9002_v54 = vld [vmem:[#allocation85_spill] sm:$0xff] }
 0x346   : > { %3732 = vrot.lane.b32.xlu1 %v7855_v47, %s6341_s25  ;;  %v8991_v47 = vld [vmem:[#allocation78_spill] sm:$0xff]  ;;  %v8167_v25 = vpop.trf.xlu0 }
 0x347   : > { %9001 = vst [vmem:[#allocation6_spill] sm:$0xff] %v8167_v25  ;;  %v9009_v25 = vld [vmem:[#allocation21_spill] sm:$0xff] }
 0x34a   : > { %3736 = vrot.lane.b32.xlu1 %v7877_v38, %s6341_s25  ;;  %v8992_v38 = vld [vmem:[#allocation32_spill] sm:$0xff] }
 0x34b   : > { %v3900_v9 = vsel %vm3866_vm1, %v8992_v38, %v8991_v47  ;;  %v8997_v47 = vld [vmem:[#allocation82_spill] sm:$0xff]  ;;  %v8998_v38 = vld [vmem:[#allocation12_spill] sm:$0xff] }
 0x34c   : > { %v4029_v13 = vsel %vm3995_vm2, %v3900_v9, 0.0  ;;  %v3903_v9 = vsel %vm3866_vm1, %v8998_v38, %v8997_v47  ;;  %v9004_v47 = vld [vmem:[#allocation96_spill] sm:$0xff] }
 0x359   : > { %4188 = vxpose.xlu0.b32.start [1/16] (narrow) %v4028_v5, 8  ;;  %v4031_v5 = vsel %vm3995_vm2, %v3902_v28, 0.0  ;;  %v9003_v28 = vld [vmem:[#allocation33_spill] sm:$0xff] }
 0x35a   : > { %v3905_v53 = vsel %vm3866_vm1, %v9003_v28, %v9002_v54  ;;  %v9010_v28 = vld [vmem:[#allocation87_spill] sm:$0xff] }
 0x35d   : > { %4189 = vxpose.xlu0.b32.cont [2/16] (narrow) %v4029_v13, 8  ;;  %v4032_v13 = vsel %vm3995_vm2, %v3903_v9, 0.0  ;;  %v4034_v9 = vsel %vm3995_vm2, %v3905_v53, 0.0 }
 0x361   : > { %4190 = vxpose.xlu0.b32.cont [3/16] (narrow) %v4030_v61, 8  ;;  %v4033_v61 = vsel %vm3995_vm2, %v3904_v30, 0.0  ;;  %v9008_v30 = vld [vmem:[#allocation97_spill] sm:$0xff] }
 0x362   : > { %v3916_v54 = vsel %vm3866_vm1, %v9009_v25, %v9008_v30  ;;  %v9014_v25 = vld [vmem:[#allocation88_spill] sm:$0xff] }
 0x363   : > { %v4045_v27 = vsel %vm3995_vm2, %v3916_v54, 0.0 }
 0x365   : > { %4191 = vxpose.xlu0.b32.cont [4/16] (narrow) %v4031_v5, 8  ;;  %v9005_v5 = vld [vmem:[#allocation19_spill] sm:$0xff] }
 0x366   : > { %v3915_v38 = vsel %vm3866_vm1, %v9005_v5, %v9004_v47  ;;  %v9011_v47 = vld [vmem:[#allocation14_spill] sm:$0xff] }
 0x367   : > { %v4044_v63 = vsel %vm3995_vm2, %v3915_v38, 0.0  ;;  %v3907_v53 = vsel %vm3866_vm1, %v9011_v47, %v9010_v28  ;;  %v9016_v47 = vld [vmem:[#allocation99_spill] sm:$0xff] }
 0x368   : > { %v4036_v15 = vsel %vm3995_vm2, %v3907_v53, 0.0 }
 0x369   : > { %4192 = vxpose.xlu0.b32.cont [5/16] (narrow) %v4032_v13, 8 }
 0x36d   : > { %4193 = vxpose.xlu0.b32.cont [6/16] (narrow) %v4033_v61, 8  ;;  %v4035_v61 = vsel %vm3995_vm2, %v3906_v59, 0.0 }
 0x371   : > { %v8180_v13 = vpop.permute.xlu0 %3662  ;;  %4194 = vxpose.xlu0.b32.cont [7/16] (narrow) %v4034_v9, 8  ;;  %v9013_v9 = vld [vmem:[#allocation18_spill] sm:$0xff] }
 0x372   : > { %v3917_v38 = vsel %vm3866_vm1, %v9013_v9, %v9012_v57  ;;  %v9018_v57 = vld [vmem:[#allocation89_spill] sm:$0xff] }
 0x373   : > { %4220 = vxpose.xlu1.b32.start [1/16] (narrow) %v4044_v63, 8  ;;  %v9015_v63 = vld [vmem:[#allocation36_spill] sm:$0xff]  ;;  %v4046_v28 = vsel %vm3995_vm2, %v3917_v38, 0.0 }
 0x374   : > { %v3908_v59 = vsel %vm3866_vm1, %v9015_v63, %v9014_v25  ;;  %v9020_v63 = vld [vmem:[#allocation114_spill] sm:$0xff]  ;;  %v9021_v38 = vld [vmem:[#allocation100_spill] sm:$0xff] }
 0x375   : > { %v8190_v5 = vpop.permute.xlu0 %3666  ;;  %4195 = vxpose.xlu0.b32.cont [8/16] (narrow) %v4035_v61, 8  ;;  %v9017_v61 = vld [vmem:[#allocation20_spill] sm:$0xff]  ;;  %v4037_v45 = vsel %vm3995_vm2, %v3908_v59, 0.0  ;;  %v3919_v17 = vsel %vm3866_vm1, %v9022_v41, %v9021_v38  ;;  %v9023_v59 = vld [vmem:[#allocation91_spill] sm:$0xff] }
 0x376   : > { %v3918_v54 = vsel %vm3866_vm1, %v9017_v61, %v9016_v47  ;;  %v9024_v47 = vld [vmem:[#allocation15_spill] sm:$0xff] }
 0x377   : > { %4221 = vxpose.xlu1.b32.cont [2/16] (narrow) %v4045_v27, 8  ;;  %v9019_v27 = vld [vmem:[#allocation35_spill] sm:$0xff]  ;;  %v4047_v25 = vsel %vm3995_vm2, %v3918_v54, 0.0  ;;  %v3910_v61 = vsel %vm3866_vm1, %v9024_v47, %v9023_v59  ;;  %v9025_v54 = vld [vmem:[#allocation113_spill] sm:$0xff]  ;;  %v9030_v47 = vld [vmem:[#allocation102_spill] sm:$0xff] }
 0x378   : > { %v3909_v53 = vsel %vm3866_vm1, %v9019_v27, %v9018_v57  ;;  %v4039_v41 = vsel %vm3995_vm2, %v3910_v61, 0.0  ;;  %v9032_v61 = vld [vmem:[#allocation93_spill] sm:$0xff] }
 0x379   : > { %v8200_v30 = vpop.permute.xlu0 %3670  ;;  %4196 = vxpose.xlu0.b32.cont [9/16] (narrow) %v4036_v15, 8 }
 0x37b   : > { %4222 = vxpose.xlu1.b32.cont [3/16] (narrow) %v4046_v28, 8  ;;  %v4038_v28 = vsel %vm3995_vm2, %v3909_v53, 0.0  ;;  %v9028_v53 = vld [vmem:[#allocation92_spill] sm:$0xff] }
 0x37d   : > { %v3675_v9 = vpop.permute.xlu0 %3674  ;;  %4197 = vxpose.xlu0.b32.cont [10/16] (narrow) %v4037_v45, 8  ;;  %v4048_v45 = vsel %vm3995_vm2, %v3919_v17, 0.0 }
 0x37e   : > { %v8213_v15 = vsel %vm3866_vm1, %v9020_v63, %v3675_v9  ;;  %v9026_v9 = vld [vmem:[#allocation101_spill] sm:$0xff]  ;;  %v9027_v63 = vld [vmem:[#allocation39_spill] sm:$0xff] }
 0x37f   : > { %4223 = vxpose.xlu1.b32.cont [4/16] (narrow) %v4047_v25, 8  ;;  %v3920_v29 = vsel %vm3866_vm1, %v9027_v63, %v9026_v9  ;;  %v9029_v25 = vld [vmem:[#allocation16_spill] sm:$0xff]  ;;  %v9033_v9 = vld [vmem:[#allocation38_spill] sm:$0xff] }
 0x380   : > { %v3911_v38 = vsel %vm3866_vm1, %v9029_v25, %v9028_v53  ;;  %v3912_v63 = vsel %vm3866_vm1, %v9033_v9, %v9032_v61  ;;  %v9035_v25 = vld [vmem:[#allocation24_spill] sm:$0xff] }
 0x381   : > { %v3679_v57 = vpop.permute.xlu0 %3678  ;;  %4198 = vxpose.xlu0.b32.cont [11/16] (narrow) %v4038_v28, 8  ;;  %v4049_v28 = vsel %vm3995_vm2, %v3920_v29, 0.0  ;;  %v9039_v9 = vld [vmem:[#allocation104_spill] sm:$0xff] }
 0x382   : > { %v8225_v27 = vsel %vm3866_vm1, %v9025_v54, %v3679_v57  ;;  %v9031_v57 = vld [vmem:[#allocation22_spill] sm:$0xff] }
 0x383   : > { %4224 = vxpose.xlu1.b32.cont [5/16] (narrow) %v4048_v45, 8  ;;  %v3921_v54 = vsel %vm3866_vm1, %v9031_v57, %v9030_v47  ;;  %v4040_v45 = vsel %vm3995_vm2, %v3911_v38, 0.0  ;;  %v9036_v38 = vld [vmem:[#allocation94_spill] sm:$0xff]  ;;  %v9037_v47 = vld [vmem:[#allocation37_spill] sm:$0xff] }
 0x384   : > { %v3913_v57 = vsel %vm3866_vm1, %v9037_v47, %v9036_v38  ;;  %v9043_v47 = vld [vmem:[#allocation107_spill] sm:$0xff] }
 0x385   : > { %v3683_v59 = vpop.permute.xlu0 %3682  ;;  %4199 = vxpose.xlu0.b32.cont [12/16] (narrow) %v4039_v41, 8  ;;  %v4050_v41 = vsel %vm3995_vm2, %v3921_v54, 0.0 }
 0x386   : > { %v8237_v17 = vsel %vm3866_vm1, %v7835_v58, %v3683_v59  ;;  %v9034_v58 = vld [vmem:[#allocation103_spill] sm:$0xff] }
 0x387   : > { %4225 = vxpose.xlu1.b32.cont [6/16] (narrow) %v4049_v28, 8  ;;  %v3922_v59 = vsel %vm3866_vm1, %v9035_v25, %v9034_v58  ;;  %v4041_v28 = vsel %vm3995_vm2, %v3912_v63, 0.0  ;;  %v4042_v63 = vsel %vm3995_vm2, %v3913_v57, 0.0  ;;  %v9041_v58 = vld [vmem:[#allocation95_spill] sm:$0xff]  ;;  %v9042_v25 = vld [vmem:[#allocation17_spill] sm:$0xff] }
 0x388   : > { %v3914_v38 = vsel %vm3866_vm1, %v9042_v25, %v9041_v58  ;;  %v9046_v58 = vld [vmem:[#allocation40_spill] sm:$0xff] }
 0x389   : > { %v3687_v53 = vpop.permute.xlu0 %3686  ;;  %4200 = vxpose.xlu0.b32.cont [13/16] (narrow) %v4040_v45, 8  ;;  %v4051_v45 = vsel %vm3995_vm2, %v3922_v59, 0.0 }
 0x38a   : > { %v8249_v29 = vsel %vm3866_vm1, %v7827_v6, %v3687_v53  ;;  %v8263_v6 = vpop.trf.xlu1  ;;  %v9040_v53 = vld [vmem:[#allocation41_spill] sm:$0xff] }
 0x38b   : > { %4226 = vxpose.xlu1.b32.cont [7/16] (narrow) %v4050_v41, 8  ;;  %9038 = vst [vmem:[#allocation71_spill] sm:$0xff] %v8263_v6  ;;  %v3923_v41 = vsel %vm3866_vm1, %v9040_v53, %v9039_v9 }
 0x38c   : > { %v4052_v59 = vsel %vm3995_vm2, %v3923_v41, 0.0 }
 0x38d   : > { %v3691_v61 = vpop.permute.xlu0 %3690  ;;  %4201 = vxpose.xlu0.b32.cont [14/16] (narrow) %v4041_v28, 8 }
 0x38e   : > { %v8261_v54 = vsel %vm3866_vm1, %v7882_v21, %v3691_v61  ;;  %v9044_v61 = vld [vmem:[#allocation43_spill] sm:$0xff] }
 0x38f   : > { %4227 = vxpose.xlu1.b32.cont [8/16] (narrow) %v4051_v45, 8  ;;  %v3924_v6 = vsel %vm3866_vm1, %v9044_v61, %v9043_v47  ;;  %v4043_v45 = vsel %vm3995_vm2, %v3914_v38, 0.0  ;;  %v9047_v47 = vld [vmem:[#allocation111_spill] sm:$0xff] }
 0x390   : > { %v4053_v41 = vsel %vm3995_vm2, %v3924_v6, 0.0 }
 0x391   : > { %v3695_v28 = vpop.permute.xlu0 %3694  ;;  %4202 = vxpose.xlu0.b32.cont [15/16] (narrow) %v4042_v63, 8  ;;  %v9045_v63 = vld [vmem:[#allocation108_spill] sm:$0xff] }
 0x392   : > { %v8275_v21 = vsel %vm3866_vm1, %v7875_v12, %v3695_v28  ;;  %v3925_v25 = vsel %vm3866_vm1, %v9046_v58, %v9045_v63  ;;  %v9051_v58 = vld [vmem:[#allocation115_spill] sm:$0xff] }
 0x393   : > { %4228 = vxpose.xlu1.b32.cont [9/16] (narrow) %v4052_v59, 8  ;;  %v4054_v59 = vsel %vm3995_vm2, %v3925_v25, 0.0  ;;  %v9052_v25 = vld [vmem:[#allocation47_spill] sm:$0xff] }
 0x394   : > { %v3697_v57 = vpop.permute.xlu1 %3696 }
 0x395   : > { %v8283_v9 = vsel %vm3866_vm1, %v7892_v56, %v3697_v57  ;;  %v3699_v53 = vpop.permute.xlu0 %3698  ;;  %4203 = vxpose.xlu0.b32.end [16/16] (narrow) %v4043_v45, 8 }
 0x396   : > { %v8288_v12 = vsel %vm3866_vm1, %v8054_v60, %v3699_v53  ;;  %v9048_v60 = vld [vmem:[#allocation42_spill] sm:$0xff]  ;;  %v9049_v53 = vld [vmem:[#allocation112_spill] sm:$0xff] }
 0x397   : > { %4229 = vxpose.xlu1.b32.cont [10/16] (narrow) %v4053_v41, 8  ;;  %v3926_v61 = vsel %vm3866_vm1, %v9048_v60, %v9047_v47  ;;  %v9050_v41 = vld [vmem:[#allocation45_spill] sm:$0xff]  ;;  %v9054_v47 = vld [vmem:[#allocation44_spill] sm:$0xff] }
 0x398   : > { %v3701_v28 = vpop.permute.xlu1 %3700  ;;  %v3927_v63 = vsel %vm3866_vm1, %v9050_v41, %v9049_v53  ;;  %v9057_v41 = vld [vmem:[#allocation54_spill] sm:$0xff] }
 0x399   : > { %v8295_v38 = vsel %vm3866_vm1, %v8060_v10, %v3701_v28  ;;  %v3703_v56 = vpop.permute.xlu0 %3702  ;;  %v4055_v10 = vsel %vm3995_vm2, %v3926_v61, 0.0  ;;  %v3928_v28 = vsel %vm3866_vm1, %v9052_v25, %v9051_v58  ;;  %v9055_v61 = vld [vmem:[#allocation118_spill] sm:$0xff]  ;;  %v9058_v58 = vld [vmem:[#allocation56_spill] sm:$0xff] }
 0x39a   : > { %v8300_v6 = vsel %vm3866_vm1, %v8052_v46, %v3703_v56  ;;  %v4056_v46 = vsel %vm3995_vm2, %v3927_v63, 0.0  ;;  %v4057_v56 = vsel %vm3995_vm2, %v3928_v28, 0.0  ;;  %v3947_v63 = vsel %vm3866_vm1, %v9057_v41, %v8126_v35  ;;  %v9064_v41 = vld [vmem:[#allocation57_spill] sm:$0xff] }
 0x39b   : > { %4230 = vxpose.xlu1.b32.cont [11/16] (narrow) %v4054_v59, 8  ;;  %v9053_v59 = vld [vmem:[#allocation116_spill] sm:$0xff]  ;;  %v3948_v25 = vsel %vm3866_vm1, %v9058_v58, %v7969_v14  ;;  %v9066_v58 = vld [vmem:[#allocation66_spill] sm:$0xff] }
 0x39c   : > { %v3705_v45 = vpop.permute.xlu1 %3704  ;;  %v4077_v28 = vsel %vm3995_vm2, %v3948_v25, 0.0 }
 0x39d   : > { %v8307_v57 = vsel %vm3866_vm1, %v8056_v0, %v3705_v45  ;;  %v3929_v0 = vsel %vm3866_vm1, %v9054_v47, %v9053_v59  ;;  %v9056_v45 = vld [vmem:[#allocation46_spill] sm:$0xff] }
 0x39e   : > { %v4058_v60 = vsel %vm3995_vm2, %v3929_v0, 0.0  ;;  %v9060_v0 = vld [vmem:[#allocation55_spill] sm:$0xff] }
 0x39f   : > { %4231 = vxpose.xlu1.b32.cont [12/16] (narrow) %v4055_v10, 8  ;;  %v3930_v10 = vsel %vm3866_vm1, %v9056_v45, %v9055_v61  ;;  %v3950_v35 = vsel %vm3866_vm1, %v9060_v0, %v7977_v33  ;;  %v9062_v61 = vld [vmem:[#allocation58_spill] sm:$0xff]  ;;  %v9069_v0 = vld [vmem:[#allocation67_spill] sm:$0xff] }
 0x3a0   : > { %v4059_v53 = vsel %vm3995_vm2, %v3930_v10, 0.0  ;;  %v4079_v14 = vsel %vm3995_vm2, %v3950_v35, 0.0  ;;  %v3951_v45 = vsel %vm3866_vm1, %v9062_v61, %v8145_v40  ;;  %v9063_v10 = vld [vmem:[#allocation61_spill] sm:$0xff]  ;;  %v3953_v40 = vsel %vm3866_vm1, %v9064_v41, %v8155_v20  ;;  %v9071_v61 = vld [vmem:[#allocation119_spill] sm:$0xff] }
 0x3a1   : > { %v3952_v33 = vsel %vm3866_vm1, %v9063_v10, %v7983_v52  ;;  %v4061_v10 = vsel %vm3995_vm2, %v7845_v50, 0.0  ;;  %v4062_v41 = vsel %vm3995_vm2, %v7851_v39, 0.0 }
 0x3a3   : > { %4232 = vxpose.xlu1.b32.cont [13/16] (narrow) %v4056_v46, 8  ;;  %v4076_v46 = vsel %vm3995_vm2, %v3947_v63, 0.0  ;;  %v4082_v63 = vsel %vm3995_vm2, %v3953_v40, 0.0 }
 0x3a7   : > { %4233 = vxpose.xlu1.b32.cont [14/16] (narrow) %v4057_v56, 8  ;;  %v9059_v56 = vld [vmem:[#allocation53_spill] sm:$0xff] }
 0x3a8   : > { %v3949_v59 = vsel %vm3866_vm1, %v9059_v56, %v8135_v24  ;;  %v4080_v24 = vsel %vm3995_vm2, %v3951_v45, 0.0  ;;  %v9072_v45 = vld [vmem:[#allocation110_spill] sm:$0xff] }
 0x3a9   : > { %v4078_v47 = vsel %vm3995_vm2, %v3949_v59, 0.0  ;;  %v9068_v59 = vld [vmem:[#allocation63_spill] sm:$0xff] }
 0x3ab   : > { %4234 = vxpose.xlu1.b32.cont [15/16] (narrow) %v4058_v60, 8  ;;  %v9061_v60 = vld [vmem:[#allocation120_spill] sm:$0xff] }
 0x3af   : > { %4235 = vxpose.xlu1.b32.end [16/16] (narrow) %v4059_v53, 8  ;;  %v4081_v53 = vsel %vm3995_vm2, %v3952_v33, 0.0  ;;  %v9073_v33 = vld [vmem:[#allocation105_spill] sm:$0xff] }
 0x3b3   : > { %4284 = vxpose.xlu1.b32.start [1/16] (narrow) %v4076_v46, 8 }
 0x3b7   : > { %4285 = vxpose.xlu1.b32.cont [2/16] (narrow) %v4077_v28, 8  ;;  %v9067_v28 = vld [vmem:[#allocation69_spill] sm:$0xff] }
 0x3b8   : > { %v3956_v20 = vsel %vm3866_vm1, %v9067_v28, %v7995_v16 }
 0x3b9   : > { %v4085_v56 = vsel %vm3995_vm2, %v3956_v20, 0.0 }
 0x3bb   : > { %4286 = vxpose.xlu1.b32.cont [3/16] (narrow) %v4078_v47, 8 }
 0x3be   : > { %3726 = vrot.lane.b32.xlu0 %v9061_v60, %s6341_s25  ;;  %v9070_v60 = vld [vmem:[#allocation106_spill] sm:$0xff] }
 0x3bf   : > { %4287 = vxpose.xlu1.b32.cont [4/16] (narrow) %v4079_v14, 8  ;;  %v3959_v16 = vsel %vm3866_vm1, %v9070_v60, %v8190_v5  ;;  %v3961_v5 = vsel %vm3866_vm1, %v9073_v33, %v8200_v30 }
 0x3c0   : > { %v4088_v14 = vsel %vm3995_vm2, %v3959_v16, 0.0 }
 0x3c2   : > { %3730 = vrot.lane.b32.xlu0 %v7868_v1, %s6341_s25  ;;  %v9065_v1 = vld [vmem:[#allocation59_spill] sm:$0xff] }
 0x3c3   : > { %4288 = vxpose.xlu1.b32.cont [5/16] (narrow) %v4080_v24, 8  ;;  %v3954_v46 = vsel %vm3866_vm1, %v9065_v1, %v7989_v48  ;;  %v3957_v48 = vsel %vm3866_vm1, %v9068_v59, %v8180_v13  ;;  %v4060_v13 = vsel %vm3995_vm2, %v9071_v61, 0.0  ;;  %v3960_v24 = vsel %vm3866_vm1, %v9072_v45, %v8007_v42  ;;  %v9074_v42 = vld [vmem:[#allocation109_spill] sm:$0xff] }
 0x3c4   : > { %v4083_v52 = vsel %vm3995_vm2, %v3954_v46, 0.0  ;;  %v4086_v47 = vsel %vm3995_vm2, %v3957_v48, 0.0  ;;  %v3962_v40 = vsel %vm3866_vm1, %v9074_v42, %v8013_v26  ;;  %v4063_v1 = vsel %vm3995_vm2, %v7866_v49, 0.0  ;;  %v3709_v46 = vpop.permute.xlu1 %3708 }
 0x3c5   : > { %v4091_v50 = vsel %vm3995_vm2, %v3962_v40, 0.0  ;;  %v3980_v26 = vsel %vm3866_vm1, %v8072_v36, %v3709_v46  ;;  %v4065_v49 = vsel %vm3995_vm2, %v7890_v3, 0.0  ;;  %v4067_v3 = vsel %vm3995_vm2, %v7910_v7, 0.0 }
 0x3c6   : > { %3734 = vrot.lane.b32.xlu0 %v7971_v32, %s6341_s25  ;;  %v3955_v32 = vsel %vm3866_vm1, %v9066_v58, %v8161_v2  ;;  %v3958_v2 = vsel %vm3866_vm1, %v9069_v0, %v8001_v34  ;;  %v4089_v34 = vsel %vm3995_vm2, %v3960_v24, 0.0  ;;  %v4069_v7 = vsel %vm3995_vm2, %v7926_v22, 0.0  ;;  %v9075_v22 = vld [vmem:[#allocation48_spill] sm:$0xff]  ;;  %s6345_s25 = smov [#allocation2]  }
 0x3c7   : > { %4289 = vxpose.xlu1.b32.cont [6/16] (narrow) %v4081_v53, 8  ;;  %v4084_v25 = vsel %vm3995_vm2, %v3955_v32, 0.0  ;;  %v4087_v35 = vsel %vm3995_vm2, %v3958_v2, 0.0  ;;  %v4090_v53 = vsel %vm3995_vm2, %v3961_v5, 0.0  ;;  %v4109_v32 = vsel %vm3995_vm2, %v3980_v26, 0.0  ;;  %v9079_v5 = vld [vmem:[#allocation52_spill] sm:$0xff] }
 0x3c8   : > { %v4094_v40 = vsel %vm3995_vm2, %v8225_v27, 0.0  ;;  %v9083_v26 = vld [vmem:[#allocation65_spill] sm:$0xff]  ;;  %v4096_v27 = vsel %vm3995_vm2, %v8237_v17, 0.0  ;;  %v4098_v17 = vsel %vm3995_vm2, %v8249_v29, 0.0  ;;  %v4100_v29 = vsel %vm3995_vm2, %v8261_v54, 0.0  ;;  %s6280_s26 = sshll.u32 %s6345_s25, 4  ;;  %s6281_s26 = int_to_ptr.vmem [resolvable:$false] %s6280_s26 }
 0x3c9   : > { %v4105_v54 = vsel %vm3995_vm2, %v8295_v38, 0.0  ;;  %v9092_v38 = vld [vmem:[#allocation71_spill] sm:$0xff]  ;;  %s6282_s30 = scalar_lea.vmem %s6281_s26, 256  ;;  %p6283_p1 = scmp.lt.s32.totalorder %s8687_s13, %s6281_s26 }
 0x3ca   : > { %p6284_p2 = scmp.lt.s32.totalorder %s6282_s30, %s6276_s23 }
 0x3cb   : > { %4290 = vxpose.xlu1.b32.cont [7/16] (narrow) %v4082_v63, 8  ;;  %v3707_v63 = vpop.permute.xlu0 %3706 }
 0x3cc   : > { %v3979_v30 = vsel %vm3866_vm1, %v8066_v18, %v3707_v63  ;;  %p6285_p3 = por %p6284_p2, %p6283_p1 }
 0x3cd   : > { %v4108_v39 = vsel %vm3995_vm2, %v3979_v30, 0.0 }
 0x3ce   : > { %p6286_p4 = pnand %p6285_p3, %p6279_p0 }
 0x3cf   : > { %4291 = vxpose.xlu1.b32.cont [8/16] (narrow) %v4083_v52, 8  ;;  %v4064_v52 = vsel %vm3995_vm2, %v7872_v44, 0.0  ;;  %v3711_v58 = vpop.permute.xlu0 %3710  ;;  %v4066_v44 = vsel %vm3995_vm2, %v7896_v37, 0.0  ;;  %v4068_v37 = vsel %vm3995_vm2, %v7914_v55, 0.0  ;;  %v4070_v55 = vsel %vm3995_vm2, %v7930_v23, 0.0  ;;  %v9076_v23 = vld [vmem:[#allocation50_spill] sm:$0xff] }
 0x3d0   : > { %v3981_v18 = vsel %vm3866_vm1, %v8064_v51, %v3711_v58  ;;  %v4072_v45 = vsel %vm3995_vm2, %v9076_v23, 0.0  ;;  %v4381_v23 = vmax.f32 %v9092_v38, 0.0 }
 0x3d1   : > { %v4110_v28 = vsel %vm3995_vm2, %v3981_v18, 0.0  ;;  %v9084_v18 = vld [vmem:[#allocation68_spill] sm:$0xff] }
 0x3d2   : > { %vm4397_vm5 = vcmp.eq.f32.partialorder %v4381_v23, inf  ;;  %vm4399_vm7 = vcmp.eq.f32.partialorder %v4381_v23, 0.0 }
 0x3d3   : > { %4292 = vxpose.xlu1.b32.cont [9/16] (narrow) %v4084_v25, 8  ;;  %v3713_v25 = vpop.permute.xlu1 %3712  ;;  %v3715_v20 = vpop.permute.xlu0 %3714 }
 0x3d4   : > { %v3982_v36 = vsel %vm3866_vm1, %v8068_v62, %v3713_v25  ;;  %v3983_v51 = vsel %vm3866_vm1, %v8080_v19, %v3715_v20 }
 0x3d5   : > { %v4112_v48 = vsel %vm3995_vm2, %v3983_v51, 0.0 }
 0x3d7   : > { %4293 = vxpose.xlu1.b32.cont [10/16] (narrow) %v4085_v56, 8  ;;  %v4111_v56 = vsel %vm3995_vm2, %v3982_v36, 0.0  ;;  %v3717_v59 = vpop.permute.xlu1 %3716 }
 0x3d8   : > { %v3984_v62 = vsel %vm3866_vm1, %v8088_v43, %v3717_v59 }
 0x3d9   : > { %v4113_v0 = vsel %vm3995_vm2, %v3984_v62, 0.0  ;;  %v9088_v62 = vld [vmem:[#allocation51_spill] sm:$0xff] }
 0x3db   : > { %4294 = vxpose.xlu1.b32.cont [11/16] (narrow) %v4086_v47, 8  ;;  %v3719_v47 = vpop.permute.xlu0 %3718  ;;  %v3721_v2 = vpop.permute.xlu1 %3720 }
 0x3dc   : > { %v3985_v19 = vsel %vm3866_vm1, %v8078_v31, %v3719_v47  ;;  %v3986_v43 = vsel %vm3866_vm1, %v8084_v11, %v3721_v2  ;;  %v4099_v47 = vsel %vm3995_vm2, %v9088_v62, 0.0 }
 0x3dd   : > { %v4115_v16 = vsel %vm3995_vm2, %v3986_v43, 0.0 }
 0x3df   : > { %4295 = vxpose.xlu1.b32.cont [12/16] (narrow) %v4087_v35, 8  ;;  %v4114_v35 = vsel %vm3995_vm2, %v3985_v19, 0.0  ;;  %v3723_v60 = vpop.permute.xlu0 %3722  ;;  %v3725_v61 = vpop.permute.xlu1 %3724  ;;  %v9089_v19 = vld [vmem:[#allocation28_spill] sm:$0xff] }
 0x3e0   : > { %v3987_v31 = vsel %vm3866_vm1, %v8096_v8, %v3723_v60  ;;  %v3988_v11 = vsel %vm3866_vm1, %v8104_v4, %v3725_v61  ;;  %v9078_v8 = vld [vmem:[#allocation26_spill] sm:$0xff]  ;;  %v4092_v4 = vsel %vm3995_vm2, %v8213_v15, 0.0  ;;  %v4102_v60 = vsel %vm3995_vm2, %v8275_v21, 0.0 }
 0x3e1   : > { %v4117_v24 = vsel %vm3995_vm2, %v3988_v11, 0.0  ;;  %v4074_v33 = vsel %vm3995_vm2, %v9078_v8, 0.0  ;;  %v4107_v21 = vsel %vm3995_vm2, %v8307_v57, 0.0 }
 0x3e3   : > { %4296 = vxpose.xlu1.b32.cont [13/16] (narrow) %v4088_v14, 8  ;;  %v4071_v14 = vsel %vm3995_vm2, %v9075_v22, 0.0  ;;  %v8464_v63 = vpop.trf.xlu0  ;;  %v3729_v30 = vpop.permute.xlu1 %3728  ;;  %v4104_v22 = vsel %vm3995_vm2, %v8288_v12, 0.0  ;;  %v9091_v12 = vld [vmem:[#allocation6_spill] sm:$0xff] }
 0x3e4   : > { %4252 = vxpose.xlu0.b32.start [1/16] (narrow) %v4060_v13, 8  ;;  %v4116_v13 = vsel %vm3995_vm2, %v3987_v31, 0.0  ;;  %v3990_v58 = vsel %vm3866_vm1, %v9083_v26, %v3729_v30  ;;  %v6342_v31 = vmov 1   ;;  %v4380_v61 = vmax.f32 %v9091_v12, 0.0 }
 0x3e6   : > { %6180 = vrsqrt.f32 %v4380_v61  ;;  %vm4390_vm3 = vcmp.eq.f32.partialorder %v4380_v61, inf  ;;  %vm4392_vm4 = vcmp.eq.f32.partialorder %v4380_v61, 0.0 }
 0x3e7   : > { %4297 = vxpose.xlu1.b32.cont [14/16] (narrow) %v4089_v34, 8  ;;  %v9077_v34 = vld [vmem:[#allocation60_spill] sm:$0xff]  ;;  %v3733_v36 = vpop.permute.xlu1 %3732  ;;  %6182 = vrsqrt.f32 %v4381_v23 }
 0x3e8   : > { %4253 = vxpose.xlu0.b32.cont [2/16] (narrow) %v4061_v10, 8  ;;  %v4073_v10 = vsel %vm3995_vm2, %v9077_v34, 0.0 }
 0x3eb   : > { %4298 = vxpose.xlu1.b32.cont [15/16] (narrow) %v4090_v53, 8  ;;  %v4075_v53 = vsel %vm3995_vm2, %v9079_v5, 0.0 }
 0x3ec   : > { %4254 = vxpose.xlu0.b32.cont [3/16] (narrow) %v4062_v41, 8  ;;  %v9080_v41 = vld [vmem:[#allocation49_spill] sm:$0xff] }
 0x3ed   : > { %v4093_v42 = vsel %vm3995_vm2, %v9080_v41, 0.0 }
 0x3ef   : > { %4299 = vxpose.xlu1.b32.end [16/16] (narrow) %v4091_v50, 8  ;;  %v9081_v50 = vld [vmem:[#allocation62_spill] sm:$0xff] }
 0x3f0   : > { %4255 = vxpose.xlu0.b32.cont [4/16] (narrow) %v4063_v1, 8  ;;  %v4095_v1 = vsel %vm3995_vm2, %v9081_v50, 0.0  ;;  %v6181_v8 = vpop.eup %6180 }
 0x3f3   : > { %4348 = vxpose.xlu1.b32.start [1/16] (narrow) %v4108_v39, 8  ;;  %v9082_v39 = vld [vmem:[#allocation25_spill] sm:$0xff] }
 0x3f4   : > { %4256 = vxpose.xlu0.b32.cont [5/16] (narrow) %v4064_v52, 8 }
 0x3f7   : > { %4349 = vxpose.xlu1.b32.cont [2/16] (narrow) %v4109_v32, 8 }
 0x3f8   : > { %4257 = vxpose.xlu0.b32.cont [6/16] (narrow) %v4065_v49, 8  ;;  %v4119_v49 = vsel %vm3995_vm2, %v3990_v58, 0.0 }
 0x3fb   : > { %4350 = vxpose.xlu1.b32.cont [3/16] (narrow) %v4110_v28, 8  ;;  %v9085_v28 = vld [vmem:[#allocation5_spill] sm:$0xff] }
 0x3fc   : > { %4258 = vxpose.xlu0.b32.cont [7/16] (narrow) %v4066_v44, 8  ;;  %v4097_v44 = vsel %vm3995_vm2, %v9085_v28, 0.0 }
 0x3ff   : > { %4351 = vxpose.xlu1.b32.cont [4/16] (narrow) %v4111_v56, 8  ;;  %v9086_v56 = vld [vmem:[#allocation70_spill] sm:$0xff] }
 0x400   : > { %4259 = vxpose.xlu0.b32.cont [8/16] (narrow) %v4067_v3, 8  ;;  %v3992_v3 = vsel %vm3866_vm1, %v9086_v56, %v3733_v36 }
 0x401   : > { %v4121_v59 = vsel %vm3995_vm2, %v3992_v3, 0.0 }
 0x403   : > { %4352 = vxpose.xlu1.b32.cont [5/16] (narrow) %v4112_v48, 8  ;;  %v9087_v48 = vld [vmem:[#allocation7_spill] sm:$0xff] }
 0x404   : > { %4260 = vxpose.xlu0.b32.cont [9/16] (narrow) %v4068_v37, 8 }
 0x407   : > { %4353 = vxpose.xlu1.b32.cont [6/16] (narrow) %v4113_v0, 8  ;;  %v3737_v0 = vpop.permute.xlu1 %3736 }
 0x408   : > { %4261 = vxpose.xlu0.b32.cont [10/16] (narrow) %v4069_v7, 8  ;;  %v3994_v2 = vsel %vm3866_vm1, %v9089_v19, %v3737_v0 }
 0x40b   : > { %4354 = vxpose.xlu1.b32.cont [7/16] (narrow) %v4114_v35, 8  ;;  %v4123_v35 = vsel %vm3995_vm2, %v3994_v2, 0.0 }
 0x40c   : > { %4262 = vxpose.xlu0.b32.cont [11/16] (narrow) %v4070_v55, 8  ;;  %v9090_v55 = vld [vmem:[#allocation64_spill] sm:$0xff] }
 0x40d   : > { %v4101_v43 = vsel %vm3995_vm2, %v9090_v55, 0.0 }
 0x40f   : > { %4355 = vxpose.xlu1.b32.cont [8/16] (narrow) %v4115_v16, 8  ;;  %v4103_v16 = vsel %vm3995_vm2, %v8283_v9, 0.0  ;;  %v4638_v9 = vld [vmem:[%s8731_s4] sm:$0xf] }
 0x410   : > { %4263 = vxpose.xlu0.b32.cont [12/16] (narrow) %v4071_v14, 8  ;;  %v4106_v14 = vsel %vm3995_vm2, %v8300_v6, 0.0  ;;  %v4382_v6 = vmax.f32 %v8464_v63, 0.0 }
 0x412   : > { %6184 = vrsqrt.f32 %v4382_v6  ;;  %vm4404_vm6 = vcmp.eq.f32.partialorder %v4382_v6, inf  ;;  %v4407_v26 = vand.u32 2147483648, %v4382_v6  ;;  %vm4406_vm8 = vcmp.eq.f32.partialorder %v4382_v6, 0.0 }
 0x413   : > { %4356 = vxpose.xlu1.b32.cont [9/16] (narrow) %v4116_v13, 8  ;;  %v8514_v13 = vpop.trf.xlu1 }
 0x414   : > { %4264 = vxpose.xlu0.b32.cont [13/16] (narrow) %v4072_v45, 8  ;;  %v4383_v11 = vmax.f32 %v8514_v13, 0.0 }
 0x416   : > { %6186 = vrsqrt.f32 %v4383_v11  ;;  %vm4411_vm9 = vcmp.eq.f32.partialorder %v4383_v11, inf  ;;  %vm4413_vm12 = vcmp.eq.f32.partialorder %v4383_v11, 0.0 }
 0x417   : > { %4357 = vxpose.xlu1.b32.cont [10/16] (narrow) %v4117_v24, 8 }
 0x418   : > { %4265 = vxpose.xlu0.b32.cont [14/16] (narrow) %v4073_v10, 8  ;;  %v6343_v10 = vmov 0  }
 0x41c   : > { %4266 = vxpose.xlu0.b32.cont [15/16] (narrow) %v4074_v33, 8 }
 0x420   : > { %4267 = vxpose.xlu0.b32.end [16/16] (narrow) %v4075_v53, 8  ;;  %v6183_v53 = vpop.eup %6182 }
 0x421   : > { %v6185_v41 = vpop.eup %6184  ;;  %v4396_v50 = vmul.f32 %v6183_v53, %v4381_v23 }
 0x422   : > { %v6187_v30 = vpop.eup %6186 }
 0x423   : > { %v4398_v58 = vsel %vm4397_vm5, %v4381_v23, %v4396_v50 }
 0x424   : > { %4316 = vxpose.xlu0.b32.start [1/16] (narrow) %v4092_v4, 8  ;;  %v4389_v4 = vmul.f32 %v6181_v8, %v4380_v61 }
 0x428   : > { %4317 = vxpose.xlu0.b32.cont [2/16] (narrow) %v4093_v42, 8  ;;  %v4393_v42 = vand.u32 2147483648, %v4380_v61 }
 0x42c   : > { %4318 = vxpose.xlu0.b32.cont [3/16] (narrow) %v4094_v40, 8  ;;  %v4391_v40 = vsel %vm4390_vm3, %v4380_v61, %v4389_v4 }
 0x430   : > { %v3727_v46 = vpop.permute.xlu0 %3726  ;;  %4319 = vxpose.xlu0.b32.cont [4/16] (narrow) %v4095_v1, 8  ;;  %v4403_v1 = vmul.f32 %v6185_v41, %v4382_v6 }
 0x431   : > { %v3989_v15 = vsel %vm3866_vm1, %v9082_v39, %v3727_v46 }
 0x432   : > { %v4118_v52 = vsel %vm3995_vm2, %v3989_v15, 0.0  ;;  %v4394_v15 = vsel %vm4392_vm4, %v4393_v42, %v4391_v40 }
 0x433   : > { %4358 = vxpose.xlu1.b32.cont [11/16] (narrow) %v4118_v52, 8  ;;  %v8518_v45 = vpop.trf.xlu1  ;;  %v4400_v52 = vand.u32 2147483648, %v4381_v23 }
 0x434   : > { %v3731_v32 = vpop.permute.xlu0 %3730  ;;  %4320 = vxpose.xlu0.b32.cont [5/16] (narrow) %v4096_v27, 8  ;;  %v4385_v24 = vmax.f32 %v8518_v45, 0.0  ;;  %v4405_v27 = vsel %vm4404_vm6, %v4382_v6, %v4403_v1 }
 0x435   : > { %v3991_v25 = vsel %vm3866_vm1, %v9084_v18, %v3731_v32  ;;  %v4410_v32 = vmul.f32 %v6187_v30, %v4383_v11  ;;  %v4408_v36 = vsel %vm4406_vm8, %v4407_v26, %v4405_v27 }
 0x436   : > { %v4120_v20 = vsel %vm3995_vm2, %v3991_v25, 0.0  ;;  %6188 = vrsqrt.f32 %v4385_v24  ;;  %v4444_v25 = vadd.f32 1e-08, %v4394_v15  ;;  %vm4425_vm10 = vcmp.eq.f32.partialorder %v4385_v24, inf }
 0x437   : > { %4359 = vxpose.xlu1.b32.cont [12/16] (narrow) %v4119_v49, 8  ;;  %v4412_v56 = vsel %vm4411_vm9, %v4383_v11, %v4410_v32  ;;  %v4428_v3 = vand.u32 2147483648, %v4385_v24  ;;  %vm4427_vm13 = vcmp.eq.f32.partialorder %v4385_v24, 0.0  ;;  %v4446_v0 = vadd.f32 1e-08, %v4408_v36 }
 0x438   : > { %4321 = vxpose.xlu0.b32.cont [6/16] (narrow) %v4097_v44, 8  ;;  %v3735_v51 = vpop.permute.xlu0 %3734  ;;  %v4401_v44 = vsel %vm4399_vm7, %v4400_v52, %v4398_v58 }
 0x439   : > { %v3993_v37 = vsel %vm3866_vm1, %v9087_v48, %v3735_v51  ;;  %v4445_v48 = vadd.f32 1e-08, %v4401_v44  ;;  %vm4500_vm1 = vcmask 1043456  }
 0x43a   : > { %v4122_v7 = vsel %vm3995_vm2, %v3993_v37, 0.0 }
 0x43b   : > { %4360 = vxpose.xlu1.b32.cont [13/16] (narrow) %v4120_v20, 8  ;;  %v4414_v20 = vand.u32 2147483648, %v4383_v11 }
 0x43c   : > { %4322 = vxpose.xlu0.b32.cont [7/16] (narrow) %v4098_v17, 8 }
 0x43d   : > { %v4415_v62 = vsel %vm4413_vm12, %v4414_v20, %v4412_v56 }
 0x43f   : > { %4361 = vxpose.xlu1.b32.cont [14/16] (narrow) %v4121_v59, 8 }
 0x440   : > { %4323 = vxpose.xlu0.b32.cont [8/16] (narrow) %v4099_v47, 8  ;;  %v6189_v46 = vpop.eup %6188 }
 0x441   : > { %v4424_v49 = vmul.f32 %v6189_v46, %v4385_v24 }
 0x443   : > { %4362 = vxpose.xlu1.b32.cont [15/16] (narrow) %v4122_v7, 8  ;;  %v4426_v51 = vsel %vm4425_vm10, %v4385_v24, %v4424_v49 }
 0x444   : > { %4324 = vxpose.xlu0.b32.cont [9/16] (narrow) %v4100_v29, 8  ;;  %v4429_v7 = vsel %vm4427_vm13, %v4428_v3, %v4426_v51  ;;  %v4460_v29 = vlaneseq }
 0x445   : > { %v4449_v55 = vadd.f32 1e-08, %v4429_v7 }
 0x447   : > { %4363 = vxpose.xlu1.b32.end [16/16] (narrow) %v4123_v35, 8  ;;  %v4447_v35 = vadd.f32 1e-08, %v4415_v62 }
 0x448   : > { %4325 = vxpose.xlu0.b32.cont [10/16] (narrow) %v4101_v43, 8 }
 0x44c   : > { %4326 = vxpose.xlu0.b32.cont [11/16] (narrow) %v4102_v60, 8 }
 0x450   : > { %4327 = vxpose.xlu0.b32.cont [12/16] (narrow) %v4103_v16, 8  ;;  %v8536_v16 = vshrl.u32 %v4460_v29, 7 }
 0x454   : > { %4328 = vxpose.xlu0.b32.cont [13/16] (narrow) %v4104_v22, 8 }
 0x458   : > { %4329 = vxpose.xlu0.b32.cont [14/16] (narrow) %v4105_v54, 8 }
 0x45c   : > { %4330 = vxpose.xlu0.b32.cont [15/16] (narrow) %v4106_v14, 8 }
 0x460   : > { %4331 = vxpose.xlu0.b32.end [16/16] (narrow) %v4107_v21, 8  ;;  %v8542_v21 = vsub.s32 4, %v8536_v16 }
 0x464   : > { %v8520_v57 = vpop.trf.xlu0 }
 0x465   : > { %6046 = vset.pattern.permute.xlu1 %v6342_v31  ;;  %v8525_v34 = vmax.f32 %v8520_v57, 0.0 }
 0x466   : > { %4694 = vperm.xlu1 %6046, %v4638_v9  }
 0x467   : > { %6190 = vrsqrt.f32 %v8525_v34  ;;  %vm4418_vm11 = vcmp.eq.f32.partialorder %v8525_v34, inf  ;;  %v4421_v59 = vand.u32 2147483648, %v8525_v34  ;;  %vm4420_vm15 = vcmp.eq.f32.partialorder %v8525_v34, 0.0 }
 0x471   : > { %v6191_v39 = vpop.eup %6190 }
 0x472   : > { %v4417_v28 = vmul.f32 %v6191_v39, %v8525_v34 }
 0x474   : > { %v4419_v37 = vsel %vm4418_vm11, %v8525_v34, %v4417_v28 }
 0x475   : > { %v4422_v2 = vsel %vm4420_vm15, %v4421_v59, %v4419_v37 }
 0x476   : > { %v4448_v60 = vadd.f32 1e-08, %v4422_v2 }
 0x489   : > { %6045 = vset.pattern.permute.xlu0 %v6343_v10 }
 0x48a   : > { %4641 = vperm.xlu0 %6045, %v4638_v9  }
 0x48b   : > { %v8528_v33 = vpop.trf.xlu1 }
 0x48c   : > { %v4387_v5 = vmax.f32 %v8528_v33, 0.0 }
 0x48e   : > { %6192 = vrsqrt.f32 %v4387_v5  ;;  %6047 = vset.pattern.permute.xlu0 %v6342_v31  ;;  %vm4439_vm14 = vcmp.eq.f32.partialorder %v4387_v5, inf  ;;  %v4442_v47 = vand.u32 2147483648, %v4387_v5  ;;  %vm4441_vm0 = vcmp.eq.f32.partialorder %v4387_v5, 0.0 }
 0x48f   : > { %6194 = vrcp.f32 %v4444_v25 }
 0x490   : > { %6196 = vrcp.f32 %v4445_v48 }
 0x491   : > { %6198 = vrcp.f32 %v4446_v0 }
 0x492   : > { %6200 = vrcp.f32 %v4447_v35 }
 0x493   : > { %6202 = vrcp.f32 %v4449_v55 }
 0x494   : > { %6204 = vrcp.f32 %v4448_v60 }
 0x498   : > { %v6193_v18 = vpop.eup %6192 }
 0x499   : > { %v4438_v17 = vmul.f32 %v6193_v18, %v4387_v5  ;;  %v6195_v9 = vpop.eup %6194 }
 0x49a   : > { %v6197_v31 = vpop.eup %6196  ;;  %v4463_v23 = vrot.slane %v6195_v9, %v8542_v21 }
 0x49b   : > { %v4440_v19 = vsel %vm4439_vm14, %v4387_v5, %v4438_v17  ;;  %v6199_v61 = vpop.eup %6198  ;;  %v4467_v6 = vrot.slane %v6197_v31, %v8542_v21 }
 0x49c   : > { %v4443_v43 = vsel %vm4441_vm0, %v4442_v47, %v4440_v19  ;;  %v6201_v11 = vpop.eup %6200  ;;  %v4471_v34 = vrot.slane %v6199_v61, %v8542_v21  ;;  %v8548_v8 = vmul.f32 %v4463_v23, %v9091_v12 }
 0x49d   : > { %v4451_v22 = vadd.f32 1e-08, %v4443_v43  ;;  %v6203_v24 = vpop.eup %6202  ;;  %v8551_v53 = vmul.f32 %v4467_v6, %v9092_v38  ;;  %v4475_v4 = vrot.slane %v6201_v11, %v8542_v21 }
 0x49e   : > { %v6205_v10 = vpop.eup %6204  ;;  %v8555_v50 = vmul.f32 %v4471_v34, %v8464_v63  ;;  %v4483_v1 = vrot.slane %v6203_v24, %v8542_v21  ;;  %v4501_v12 = vsel %vm4500_vm1, %v8548_v8, -inf }
 0x49f   : > { %v4479_v30 = vrot.slane %v6205_v10, %v8542_v21  ;;  %v4508_v38 = vsel %vm4500_vm1, %v8551_v53, -inf  ;;  %v8564_v39 = vmul.f32 %v4475_v4, %v8514_v13  ;;  %v4502_v63 = vrot.slane %v4501_v12, 4 }
 0x4a0   : > { %v4515_v58 = vsel %vm4500_vm1, %v8555_v50, -inf  ;;  %v8570_v27 = vmul.f32 %v4483_v1, %v8518_v45  ;;  %v4509_v32 = vrot.slane %v4508_v38, 4 }
 0x4a1   : > { %v8573_v49 = vmul.f32 %v4479_v30, %v8520_v57  ;;  %v4522_v13 = vsel %vm4500_vm1, %v8564_v39, -inf  ;;  %v4516_v25 = vrot.slane %v4515_v58, 4  ;;  %v4503_v28 = vmax.f32 %v4501_v12, %v4502_v63 }
 0x4a2   : > { %v4536_v44 = vsel %vm4500_vm1, %v8570_v27, -inf  ;;  %v4510_v36 = vmax.f32 %v4508_v38, %v4509_v32  ;;  %v4523_v20 = vrot.slane %v4522_v13, 4 }
 0x4a3   : > { %v4529_v45 = vsel %vm4500_vm1, %v8573_v49, -inf  ;;  %v4517_v56 = vmax.f32 %v4515_v58, %v4516_v25  ;;  %v4537_v3 = vrot.slane %v4536_v44, 4  ;;  %v4504_v17 = vrot.slane %v4503_v28, 2 }
 0x4a4   : > { %v8538_v54 = vpop.trf.xlu0  ;;  %v4530_v51 = vrot.slane %v4529_v45, 4  ;;  %v4511_v59 = vrot.slane %v4510_v36, 2 }
 0x4a5   : > { %v4386_v14 = vmax.f32 %v8538_v54, 0.0  ;;  %v4518_v62 = vrot.slane %v4517_v56, 2  ;;  %v4538_v47 = vmax.f32 %v4536_v44, %v4537_v3  ;;  %v4505_v0 = vmax.f32 %v4503_v28, %v4504_v17 }
 0x4a6   : > { %v4531_v7 = vmax.f32 %v4529_v45, %v4530_v51  ;;  %v4512_v2 = vmax.f32 %v4510_v36, %v4511_v59 }
 0x4a7   : > { %6206 = vrsqrt.f32 %v4386_v14  ;;  %vm4432_vm2 = vcmp.eq.f32.partialorder %v4386_v14, inf  ;;  %v4435_v41 = vand.u32 2147483648, %v4386_v14  ;;  %vm4434_vm3 = vcmp.eq.f32.partialorder %v4386_v14, 0.0 }
 0x4a8   : > { %6208 = vrcp.f32 %v4451_v22  ;;  %v4519_v43 = vmax.f32 %v4517_v56, %v4518_v62  ;;  %v4539_v60 = vrot.slane %v4538_v47, 2  ;;  %v4506_v22 = vrot.slane %v4505_v0, 1 }
 0x4a9   : > { %v4513_v31 = vrot.slane %v4512_v2, 1 }
 0x4aa   : > { %v4520_v11 = vrot.slane %v4519_v43, 1  ;;  %v4540_v24 = vmax.f32 %v4538_v47, %v4539_v60  ;;  %v4507_v10 = vmax.f32 %v4505_v0, %v4506_v22 }
 0x4ab   : > { %v4514_v4 = vmax.f32 %v4512_v2, %v4513_v31 }
 0x4ac   : > { %v4541_v1 = vrot.slane %v4540_v24, 1  ;;  %v4557_v30 = vsub.f32 %v8548_v8, %v4507_v10 }
 0x4ad   : > { %v4558_v38 = vsub.f32 %v8551_v53, %v4514_v4 }
 0x4ae   : > { %v4542_v58 = vmax.f32 %v4540_v24, %v4541_v1  ;;  %v4565_v32 = vmul.f32 1.442695, %v4557_v30 }
 0x4af   : > { %v4567_v25 = vmul.f32 1.442695, %v4558_v38 }
 0x4b0   : > { %v4562_v45 = vsub.f32 %v8570_v27, %v4542_v58 }
 0x4b1   : > { %v6207_v5 = vpop.eup %6206 }
 0x4b2   : > { %v6209_v42 = vpop.eup %6208  ;;  %v4431_v40 = vmul.f32 %v6207_v5, %v4386_v14 }
 0x4b3   : > { %v4491_v15 = vrot.slane %v6209_v42, %v8542_v21 }
 0x4b4   : > { %v4433_v46 = vsel %vm4432_vm2, %v4386_v14, %v4431_v40  ;;  %v4532_v14 = vrot.slane %v4531_v7, 2 }
 0x4b5   : > { %v4436_v52 = vsel %vm4434_vm3, %v4435_v41, %v4433_v46  ;;  %v8578_v18 = vmul.f32 %v4491_v15, %v8528_v33  ;;  %v4524_v33 = vmax.f32 %v4522_v13, %v4523_v20 }
 0x4b6   : > { %v4450_v26 = vadd.f32 1e-08, %v4436_v52  ;;  %v4533_v5 = vmax.f32 %v4531_v7, %v4532_v14 }
 0x4b7   : > { %v4550_v57 = vsel %vm4500_vm1, %v8578_v18, -inf  ;;  %v4525_v29 = vrot.slane %v4524_v33, 2 }
 0x4b8   : > { %6210 = vrcp.f32 %v4450_v26  ;;  %v4551_v48 = vrot.slane %v4550_v57, 4  ;;  %v4534_v46 = vrot.slane %v4533_v5, 1 }
 0x4b9   : > { %v4526_v61 = vmax.f32 %v4524_v33, %v4525_v29  ;;  %6212 = vpow2.f32 %v4565_v32 }
 0x4ba   : > { %v4552_v35 = vmax.f32 %v4550_v57, %v4551_v48  ;;  %v4535_v13 = vmax.f32 %v4533_v5, %v4534_v46  ;;  %6214 = vpow2.f32 %v4567_v25 }
 0x4bb   : > { %v4527_v41 = vrot.slane %v4526_v61, 1 }
 0x4bc   : > { %v4553_v23 = vrot.slane %v4552_v35, 2  ;;  %v4561_v8 = vsub.f32 %v8573_v49, %v4535_v13 }
 0x4bd   : > { %v4528_v15 = vmax.f32 %v4526_v61, %v4527_v41 }
 0x4be   : > { %v4554_v42 = vmax.f32 %v4552_v35, %v4553_v23  ;;  %v4573_v3 = vmul.f32 1.442695, %v4561_v8 }
 0x4bf   : > { %v4560_v28 = vsub.f32 %v8564_v39, %v4528_v15 }
 0x4c0   : > { %v4555_v52 = vrot.slane %v4554_v42, 1 }
 0x4c1   : > { %v4571_v53 = vmul.f32 1.442695, %v4560_v28 }
 0x4c2   : > { %v6211_v37 = vpop.eup %6210  ;;  %v4556_v44 = vmax.f32 %v4554_v42, %v4555_v52 }
 0x4c3   : > { %v4487_v19 = vrot.slane %v6211_v37, %v8542_v21  ;;  %v8596_v39 = vpop.eup %6212 }
 0x4c4   : > { %v4564_v57 = vsub.f32 %v8578_v18, %v4556_v44  ;;  %v8598_v27 = vpop.eup %6214  ;;  %v4581_v18 = vsel %vm4500_vm1, %v8596_v39, 0.0 }
 0x4c5   : > { %v4498_v55 = vmul.f32 %v4487_v19, %v8538_v54  ;;  %v4521_v54 = vmax.f32 %v4519_v43, %v4520_v11  ;;  %v4588_v59 = vsel %vm4500_vm1, %v8598_v27, 0.0  ;;  %v4582_v48 = vrot.slane %v4581_v18, 4 }
 0x4c6   : > { %v4579_v17 = vmul.f32 1.442695, %v4564_v57  ;;  %v4589_v47 = vrot.slane %v4588_v59, 4 }
 0x4c7   : > { %v4543_v9 = vsel %vm4500_vm1, %v4498_v55, -inf  ;;  %v4559_v63 = vsub.f32 %v8555_v50, %v4521_v54  ;;  %v4575_v50 = vmul.f32 1.442695, %v4562_v45  ;;  %v4583_v35 = vadd.f32 %v4582_v48, %v4581_v18 }
 0x4c8   : > { %v4544_v6 = vrot.slane %v4543_v9, 4  ;;  %v4590_v43 = vadd.f32 %v4589_v47, %v4588_v59  ;;  %v6344_v18 = vmov 1966171168   ;;  %v4655_v47 = vsub.s32 2, %v8536_v16 }
 0x4c9   : > { %v4569_v20 = vmul.f32 1.442695, %v4559_v63  ;;  %v4584_v23 = vrot.slane %v4583_v35, 2  ;;  %v4798_v59 = vunpack.c.l.s4 %v6344_v18 }
 0x4ca   : > { %v4545_v34 = vmax.f32 %v4543_v9, %v4544_v6  ;;  %v4591_v11 = vrot.slane %v4590_v43, 2 }
 0x4cb   : > { %6216 = vpow2.f32 %v4569_v20  ;;  %v4585_v41 = vadd.f32 %v4584_v23, %v4583_v35  ;;  %v4667_v35 = vsub.s32 5, %v8536_v16 }
 0x4cc   : > { %v4546_v40 = vrot.slane %v4545_v34, 2  ;;  %6218 = vpow2.f32 %v4571_v53 }
 0x4cd   : > { %6220 = vpow2.f32 %v4575_v50  ;;  %v4586_v38 = vrot.slane %v4585_v41, 1 }
 0x4ce   : > { %v4547_v12 = vmax.f32 %v4545_v34, %v4546_v40  ;;  %6222 = vpow2.f32 %v4573_v3  ;;  %v4592_v40 = vadd.f32 %v4591_v11, %v4590_v43  ;;  %v4675_v43 = vsub.s32 7, %v8536_v16 }
 0x4cf   : > { %6224 = vpow2.f32 %v4579_v17  ;;  %v4587_v25 = vadd.f32 %v4586_v38, %v4585_v41  ;;  %v4647_v17 = vsub.s32 0, %v8536_v16 }
 0x4d0   : > { %v4548_v26 = vrot.slane %v4547_v12, 1  ;;  %v4593_v52 = vrot.slane %v4592_v40, 1 }
 0x4d2   : > { %v4549_v36 = vmax.f32 %v4547_v12, %v4548_v26  ;;  %v4594_v44 = vadd.f32 %v4593_v52, %v4592_v40 }
 0x4d4   : > { %v4563_v56 = vsub.f32 %v4498_v55, %v4549_v36 }
 0x4d5   : > { %v8600_v49 = vpop.eup %6216 }
 0x4d6   : > { %v4577_v51 = vmul.f32 1.442695, %v4563_v56  ;;  %v8606_v33 = vpop.eup %6218  ;;  %v4595_v37 = vsel %vm4500_vm1, %v8600_v49, 0.0 }
 0x4d7   : > { %v8610_v62 = vpop.eup %6220  ;;  %v4602_v7 = vsel %vm4500_vm1, %v8606_v33, 0.0  ;;  %v4596_v2 = vrot.slane %v4595_v37, 4 }
 0x4d8   : > { %6226 = vpow2.f32 %v4577_v51  ;;  %v8612_v0 = vpop.eup %6222  ;;  %v4616_v55 = vsel %vm4500_vm1, %v8610_v62, 0.0  ;;  %v4603_v60 = vrot.slane %v4602_v7, 4  ;;  %v4651_v51 = vsub.s32 1, %v8536_v16 }
 0x4d9   : > { %v8616_v19 = vpop.eup %6224  ;;  %v4609_v22 = vsel %vm4500_vm1, %v8612_v0, 0.0  ;;  %v4597_v9 = vadd.f32 %v4596_v2, %v4595_v37  ;;  %v4617_v31 = vrot.slane %v4616_v55, 4  ;;  %6228 = vrcp.f32 %v4587_v25  ;;  %v4637_v37 = vld [vmem:[%s242_s9] sm:$0xff] }
 0x4da   : > { %v4630_v14 = vsel %vm4500_vm1, %v8616_v19, 0.0  ;;  %v4610_v6 = vrot.slane %v4609_v22, 4  ;;  %v4604_v24 = vadd.f32 %v4603_v60, %v4602_v7  ;;  %6230 = vrcp.f32 %v4594_v44 }
 0x4db   : > { %v4631_v34 = vrot.slane %v4630_v14, 4  ;;  %v4598_v5 = vrot.slane %v4597_v9, 2  ;;  %v4618_v4 = vadd.f32 %v4617_v31, %v4616_v55  ;;  %v4659_v7 = vsub.s32 3, %v8536_v16 }
 0x4dc   : > { %v4611_v42 = vadd.f32 %v4610_v6, %v4609_v22  ;;  %v4605_v54 = vrot.slane %v4604_v24, 2  ;;  %v4671_v55 = vsub.s32 6, %v8536_v16  ;;  %v4799_v31 = vunpack.c.0.s8 %v4798_v59 }
 0x4dd   : > { %v4632_v1 = vadd.f32 %v4631_v34, %v4630_v14  ;;  %v4599_v30 = vadd.f32 %v4598_v5, %v4597_v9  ;;  %v4619_v46 = vrot.slane %v4618_v4, 2  ;;  %v4648_v14 = vrot.slane %v4637_v37, %v4647_v17 }
 0x4de   : > { %v4612_v15 = vrot.slane %v4611_v42, 2  ;;  %v4606_v26 = vadd.f32 %v4605_v54, %v4604_v24  ;;  %v4652_v9 = vrot.slane %v4637_v37, %v4651_v51  ;;  %v4660_v23 = vrot.slane %v4637_v37, %v4659_v7 }
 0x4df   : > { %v4633_v63 = vrot.slane %v4632_v1, 2  ;;  %v4600_v32 = vrot.slane %v4599_v30, 1  ;;  %v4620_v13 = vadd.f32 %v4619_v46, %v4618_v4  ;;  %v4664_v6 = vrot.slane %v4637_v37, %v8542_v21 }
 0x4e0   : > { %v4613_v28 = vadd.f32 %v4612_v15, %v4611_v42  ;;  %v4607_v36 = vrot.slane %v4606_v26, 1  ;;  %v4668_v11 = vrot.slane %v4637_v37, %v4667_v35  ;;  %v4672_v24 = vrot.slane %v4637_v37, %v4671_v55 }
 0x4e1   : > { %v4634_v20 = vadd.f32 %v4633_v63, %v4632_v1  ;;  %v4601_v8 = vadd.f32 %v4600_v32, %v4599_v30  ;;  %v4621_v53 = vrot.slane %v4620_v13, 1  ;;  %v4676_v34 = vrot.slane %v4637_v37, %v4675_v43 }
 0x4e2   : > { %v8618_v29 = vpop.eup %6226  ;;  %v4614_v57 = vrot.slane %v4613_v28, 1  ;;  %v4608_v56 = vadd.f32 %v4607_v36, %v4606_v26  ;;  %v8643_v41 = vsub.s32 %v4799_v31, %v8536_v16 }
 0x4e3   : > { %v4623_v61 = vsel %vm4500_vm1, %v8618_v29, 0.0  ;;  %v4635_v50 = vrot.slane %v4634_v20, 1  ;;  %6232 = vrcp.f32 %v4601_v8  ;;  %v4622_v48 = vadd.f32 %v4621_v53, %v4620_v13 }
 0x4e4   : > { %v4624_v10 = vrot.slane %v4623_v61, 4  ;;  %v4615_v2 = vadd.f32 %v4614_v57, %v4613_v28  ;;  %6234 = vrcp.f32 %v4608_v56 }
 0x4e5   : > { %v4636_v60 = vadd.f32 %v4635_v50, %v4634_v20  ;;  %6236 = vrcp.f32 %v4622_v48  ;;  %v4695_v4 = vpop.permute.xlu1 %4694 }
 0x4e6   : > { %v4625_v12 = vadd.f32 %v4624_v10, %v4623_v61  ;;  %v4656_v61 = vrot.slane %v4637_v37, %v4655_v47  ;;  %6238 = vrcp.f32 %v4615_v2  ;;  %v8640_v10 = vpop.eup %6228 }
 0x4e7   : > { %6240 = vrcp.f32 %v4636_v60  ;;  %v8645_v42 = vpop.eup %6230 }
 0x4e8   : > { %v4626_v58 = vrot.slane %v4625_v12, 2 }
 0x4ea   : > { %v4627_v45 = vadd.f32 %v4626_v58, %v4625_v12 }
 0x4ec   : > { %v4628_v3 = vrot.slane %v4627_v45, 1 }
 0x4ed   : > { %v8647_v15 = vpop.eup %6232 }
 0x4ee   : > { %v4629_v22 = vadd.f32 %v4628_v3, %v4627_v45  ;;  %v8649_v28 = vpop.eup %6234 }
 0x4ef   : > { %v8659_v50 = vpop.eup %6236 }
 0x4f0   : > { %6242 = vrcp.f32 %v4629_v22  ;;  %v6239_v17 = vpop.eup %6238 }
 0x509   : > { %v4642_v5 = vpop.permute.xlu0 %4641 }
 0x50a   : > { %v4685_v40 = vmul.f32 %v4648_v14, %v4642_v5  ;;  %v4686_v54 = vmul.f32 %v4652_v9, %v4642_v5  ;;  %v4687_v1 = vmul.f32 %v4656_v61, %v4642_v5  ;;  %v4688_v12 = vmul.f32 %v4660_v23, %v4642_v5 }
 0x50b   : > { %v4689_v21 = vmul.f32 %v4664_v6, %v4642_v5  ;;  %v4690_v30 = vmul.f32 %v4668_v11, %v4642_v5  ;;  %v4691_v46 = vmul.f32 %v4672_v24, %v4642_v5  ;;  %v4692_v38 = vmul.f32 %v4676_v34, %v4642_v5 }
 0x50c   : > { %v4697_v52 = vadd.f32 %v4695_v4, %v4685_v40  ;;  %v4698_v26 = vadd.f32 %v4695_v4, %v4686_v54  ;;  %v4699_v63 = vadd.f32 %v4695_v4, %v4687_v1  ;;  %v4700_v58 = vadd.f32 %v4695_v4, %v4688_v12 }
 0x50d   : > { %v4701_v32 = vadd.f32 %v4695_v4, %v4689_v21  ;;  %v4702_v13 = vadd.f32 %v4695_v4, %v4690_v30  ;;  %v4703_v16 = vadd.f32 %v4695_v4, %v4691_v46  ;;  %v4704_v25 = vadd.f32 %v4695_v4, %v4692_v38 }
 0x50e   : > { %v4705_v44 = vmul.f32 %v8596_v39, %v4697_v52  ;;  %v4706_v36 = vmul.f32 %v8598_v27, %v4698_v26  ;;  %v4707_v20 = vmul.f32 %v8600_v49, %v4699_v63  ;;  %v4708_v45 = vmul.f32 %v8606_v33, %v4700_v58 }
 0x50f   : > { %v4709_v8 = vmul.f32 %v8612_v0, %v4701_v32  ;;  %v4710_v53 = vmul.f32 %v8610_v62, %v4702_v13  ;;  %v4711_v57 = vmul.f32 %v8618_v29, %v4703_v16  ;;  %v4712_v56 = vmul.f32 %v8616_v19, %v4704_v25  ;;  %v6241_v62 = vpop.eup %6240 }
 0x510   : > { %v4713_v3 = vsel %vm4500_vm1, %v4705_v44, 0.0  ;;  %v4720_v39 = vsel %vm4500_vm1, %v4706_v36, 0.0  ;;  %v4727_v27 = vsel %vm4500_vm1, %v4707_v20, 0.0  ;;  %v4734_v49 = vsel %vm4500_vm1, %v4708_v45, 0.0  ;;  %v6243_v37 = vpop.eup %6242 }
 0x511   : > { %v4714_v33 = vrot.slane %v4713_v3, 4  ;;  %v4721_v51 = vrot.slane %v4720_v39, 4  ;;  %v4728_v0 = vrot.slane %v4727_v27, 4  ;;  %v4735_v18 = vrot.slane %v4734_v49, 4 }
 0x512   : > { %v4741_v29 = vsel %vm4500_vm1, %v4709_v8, 0.0  ;;  %v4748_v19 = vsel %vm4500_vm1, %v4710_v53, 0.0  ;;  %v4755_v59 = vsel %vm4500_vm1, %v4711_v57, 0.0  ;;  %v4762_v48 = vsel %vm4500_vm1, %v4712_v56, 0.0 }
 0x513   : > { %v4715_v47 = vadd.f32 %v4714_v33, %v4713_v3  ;;  %v4722_v7 = vadd.f32 %v4721_v51, %v4720_v39  ;;  %v4729_v2 = vadd.f32 %v4728_v0, %v4727_v27  ;;  %v4736_v35 = vadd.f32 %v4735_v18, %v4734_v49 }
 0x514   : > { %v4742_v55 = vrot.slane %v4741_v29, 4  ;;  %v4749_v43 = vrot.slane %v4748_v19, 4  ;;  %v4756_v60 = vrot.slane %v4755_v59, 4  ;;  %v4763_v22 = vrot.slane %v4762_v48, 4 }
 0x515   : > { %v4716_v14 = vrot.slane %v4715_v47, 2  ;;  %v4723_v9 = vrot.slane %v4722_v7, 2  ;;  %v4730_v31 = vrot.slane %v4729_v2, 2  ;;  %v4737_v61 = vrot.slane %v4736_v35, 2 }
 0x516   : > { %v4743_v23 = vadd.f32 %v4742_v55, %v4741_v29  ;;  %v4750_v6 = vadd.f32 %v4749_v43, %v4748_v19  ;;  %v4757_v11 = vadd.f32 %v4756_v60, %v4755_v59  ;;  %v4764_v24 = vadd.f32 %v4763_v22, %v4762_v48 }
 0x517   : > { %v4717_v34 = vadd.f32 %v4716_v14, %v4715_v47  ;;  %v4724_v5 = vadd.f32 %v4723_v9, %v4722_v7  ;;  %v4731_v4 = vadd.f32 %v4730_v31, %v4729_v2  ;;  %v4738_v40 = vadd.f32 %v4737_v61, %v4736_v35 }
 0x518   : > { %v4744_v54 = vrot.slane %v4743_v23, 2  ;;  %v4751_v1 = vrot.slane %v4750_v6, 2  ;;  %v4758_v12 = vrot.slane %v4757_v11, 2  ;;  %v4765_v21 = vrot.slane %v4764_v24, 2 }
 0x519   : > { %v4718_v30 = vrot.slane %v4717_v34, 1  ;;  %v4725_v46 = vrot.slane %v4724_v5, 1  ;;  %v4732_v38 = vrot.slane %v4731_v4, 1  ;;  %v4739_v52 = vrot.slane %v4738_v40, 1 }
 0x51a   : > { %v4745_v26 = vadd.f32 %v4744_v54, %v4743_v23  ;;  %v4752_v63 = vadd.f32 %v4751_v1, %v4750_v6  ;;  %v4759_v58 = vadd.f32 %v4758_v12, %v4757_v11  ;;  %v4766_v32 = vadd.f32 %v4765_v21, %v4764_v24 }
 0x51b   : > { %v4719_v13 = vadd.f32 %v4718_v30, %v4717_v34  ;;  %v4726_v16 = vadd.f32 %v4725_v46, %v4724_v5  ;;  %v4733_v25 = vadd.f32 %v4732_v38, %v4731_v4  ;;  %v4740_v44 = vadd.f32 %v4739_v52, %v4738_v40 }
 0x51c   : > { %v4746_v36 = vrot.slane %v4745_v26, 1  ;;  %v4753_v20 = vrot.slane %v4752_v63, 1  ;;  %v4760_v45 = vrot.slane %v4759_v58, 1  ;;  %v4767_v8 = vrot.slane %v4766_v32, 1 }
 0x51d   : > { %v4777_v53 = vmul.f32 %v8640_v10, %v4719_v13  ;;  %v4778_v57 = vmul.f32 %v8645_v42, %v4726_v16  ;;  %v4779_v56 = vmul.f32 %v8647_v15, %v4733_v25  ;;  %v4780_v3 = vmul.f32 %v8649_v28, %v4740_v44 }
 0x51e   : > { %v4747_v39 = vadd.f32 %v4746_v36, %v4745_v26  ;;  %v4754_v27 = vadd.f32 %v4753_v20, %v4752_v63  ;;  %v4761_v49 = vadd.f32 %v4760_v45, %v4759_v58  ;;  %v4768_v33 = vadd.f32 %v4767_v8, %v4766_v32 }
 0x51f   : > { %v4793_v51 = vcombine.low %v4777_v53, %v4778_v57  ;;  %v4794_v0 = vcombine.low %v4779_v56, %v4780_v3 }
 0x520   : > { %v4781_v18 = vmul.f32 %v6239_v17, %v4747_v39  ;;  %v4782_v29 = vmul.f32 %v8659_v50, %v4754_v27  ;;  %v4783_v19 = vmul.f32 %v6243_v37, %v4761_v49  ;;  %v4784_v59 = vmul.f32 %v6241_v62, %v4768_v33 }
 0x521   : > { %v4803_v10 = vrot.slane %v4793_v51, %v8643_v41  ;;  %v4810_v42 = vrot.slane %v4794_v0, %v8643_v41 }
 0x522   : > { %v4795_v15 = vcombine.low %v4781_v18, %v4782_v29  ;;  %v4796_v28 = vcombine.low %v4783_v19, %v4784_v59 }
 0x523   : > { %v4825_v48 = vcombine.low %v4803_v10, %v4810_v42 }
 0x524   : > { %v4817_v47 = vrot.slane %v4795_v15, %v8643_v41  ;;  %v4824_v7 = vrot.slane %v4796_v28, %v8643_v41 }
 0x525   : > { %v4833_v17 = vrot.slane %v4825_v48, %v8643_v41 }
 0x526   : > { %v4826_v2 = vcombine.low %v4817_v47, %v4824_v7 }
 0x528   : > { %v4840_v50 = vrot.slane %v4826_v2, %v8643_v41 }
 0x52a   : > { %v4841_v62 = vcombine.low %v4833_v17, %v4840_v50 }
 0x52c   : > { %4843 = vst [vmem:[%s232_s12] sm:$0xff] %v4841_v62 }
 0x52d   : > { %6289 = shalt.err (!%p6286_p4)
}
 0x52e   : > { %s6290_s7 = scalar_lea.hbm %s8685_s16, 128  ;;  %s6294_s8 = scalar_lea.hbm %s8732_s5, 256 }
 0x52f   : > { %p6291_p7 = scmp.ne.s32.totalorder %s8685_s16, %s6290_s7  ;;  %p6295_p10 = scmp.lt.u32.totalorder %s8685_s16, %s8732_s5 }
 0x530   : > { %p6296_p11 = scmp.lt.u32.totalorder %s6294_s8, %s6290_s7  ;;  %p6298_p13 = scmp.lt.u32.totalorder %s6290_s7, %s8685_s16 }
 0x531   : > { %p6292_p8 = pnand %p6291_p7, %p6414_p5 }
 0x532   : > { %p6297_p12 = por %p6296_p11, %p6295_p10 }
 0x533   : > { %p6293_p9 = pneg %p6292_p8 }
 0x534   : > { %p6299_p0 = por %p6298_p13, %p6297_p12 }
 0x536   : > { %p6300_p1 = pnand %p6299_p0, %p6293_p9 }
 0x538   : > { %6303 = shalt.err (!%p6300_p1)
}
 0x539   : > { %6001 = dma.vmem_to_hbm [thread:$0]  (%p6414_p5), %s8687_s13, 128, %s8685_s16, %s4845_s17  }
 0x53a PF: > { %p6007_p2 = scmp.ge.s32.totalorder %s6338_s21, 2  ;;  %s4871_s11 = sand.u32 1, %s6326_s18  }
 0x53b   : > { %s4872_s12 = scalar_lea.sflag [#allocation3], %s4871_s11 }
 0x53c   : > { %p6004_p3 = pnand %p6007_p2, %p6418_p6 }
 0x53e   : > { %6321 = dma.done.wait (!%p6004_p3), %s4872_s12, 128  }
 0x53f   : > { %6323 = vsyncadd (!%p6004_p3), %s4872_s12, 4294967168  ;;  %p15_p4 = scmp.ge.s32.totalorder %s6401_s24, 4   ;;  %s9093_s18 = smov %s6330_s19 }
 0x540   : > { %s9094_s19 = smov %s6334_s20  ;;  %s9095_s20 = smov %s6412_s27 }
 0x541   : > { %s9096_s21 = smov %s6401_s24  ;;  %17 = sbr.rel (!%p15_p4) target bundleno = 3 (0x3), region = 78 }
 0x548   :  { %4877 = vsyncpa [#allocation3], 1 }
 0x549   :  { %4879 = vsyncpa [#allocation3 + $0x1], 1 }

</bundles_post_ra>
